<compile_context>
chip_gen: v5e
topology: v5e:2x2
jax: 0.10.0
libtpu: 0.0.40
codegen_flags: <defaults>
</compile_context>

<pallas_src>
import math

import jax
import jax.numpy as jnp
from jax.experimental import pallas as pl
from jax.experimental.pallas import tpu as pltpu

BRIGHTNESS_FACTORS = (0.8, 1.0, 1.2)
KSIZE = 7
PAD = 3
_N_ACC = 4  # independent accumulator chains for the 98-tap conv


def graydim_fused_kernel(x_ref, w_ref, b_ref, o_ref, pad_ref):
    """One fused step over a block of Bb images.

    x_ref:   (Bb, 3, H, W)      RGB block (any real dtype; cast to f32 in-kernel).
    w_ref:   (2*7*7,) f32 SMEM  flattened Conv2d(2,1,7) weight, layout [c, kh, kw].
    b_ref:   (1,)    f32 SMEM   conv bias.
    o_ref:   (Bb, 1, H, W) f32  sigmoid attention map.
    pad_ref: (Bb, 2, H+6, W+6)  f32 VMEM scratch: zero-padded [avg, max] maps.
    """
    Bb = x_ref.shape[0]
    H = o_ref.shape[2]
    W = o_ref.shape[3]

    # --- RGB -> gray (cv2 coefficients), in f32.
    x = x_ref[...].astype(jnp.float32)
    gray = 0.299 * x[:, 0] + 0.587 * x[:, 1] + 0.114 * x[:, 2]          # (Bb, H, W)

    # cv2.convertScaleAbs(gray, alpha=f, beta=0) == clip(round(|f*gray|), 0, 255);
    # abs dropped: image inputs are non-negative and all factors are positive.
    adj = [jnp.clip(jnp.round(f * gray), 0.0, 255.0) for f in BRIGHTNESS_FACTORS]

    avg = (adj[0] + adj[1] + adj[2]) * (1.0 / 3.0)                      # torch.mean(dim=1)
    mx = jnp.maximum(jnp.maximum(adj[0], adj[1]), adj[2])               # torch.max(dim=1)[0]

    # --- Zero-padded [avg, max] maps in VMEM scratch (Conv2d padding=3).
    # Zeroed every step: scratch is per-core/persistent, borders must stay zero.
    pad_ref[...] = jnp.zeros_like(pad_ref)
    pad_ref[:, 0, PAD:PAD + H, PAD:PAD + W] = avg
    pad_ref[:, 1, PAD:PAD + H, PAD:PAD + W] = mx

    # --- 7x7 conv (2 -> 1 channel) + sigmoid.
    # Taps re-read from the VMEM scratch (address math on vld), 4 accumulator chains
    # so the ~196 VALU ops are not one serial dependency chain.
    accs = [jnp.zeros((Bb, H, W), jnp.float32) for _ in range(_N_ACC)]
    tap = 0
    for c in range(2):
        for kh in range(KSIZE):
            for kw in range(KSIZE):
                w = w_ref[c * KSIZE * KSIZE + kh * KSIZE + kw]
                accs[tap % _N_ACC] = accs[tap % _N_ACC] + w * pad_ref[:, c, kh:kh + H, kw:kw + W]
                tap += 1
    acc = (accs[0] + accs[1]) + (accs[2] + accs[3]) + b_ref[0]
    o_ref[:, 0, :, :] = jax.nn.sigmoid(acc)


def _pick_batch_block(B, H, W, itemsize, target_bytes=512 * 1024):
    """Largest divisor of B whose per-step input payload stays <= target_bytes.
    Amortizes the ~0.35us/step grid overhead at small images while keeping a
    parallel grid axis and bounded per-step VMEM for large images / v7x."""
    per_image = 3 * H * W * itemsize
    cap = max(1, min(B, target_bytes // max(per_image, 1)))
    block_b = 1
    for d in range(1, cap + 1):
        if B % d == 0:
            block_b = d
    return block_b


def graydim_forward(x, weight, bias, *, block_b=None):
    """x: (B, 3, H, W) RGB.  weight: (1, 2, 7, 7).  bias: (1,).
    Returns (B, 1, H, W) float32 attention map (== Graydim.forward)."""
    B, C, H, W = x.shape
    assert C == 3, "Graydim expects RGB input (3 channels)"

    weight_flat = jnp.asarray(weight, jnp.float32).reshape(-1)   # [o=1, c, kh, kw] -> flat
    bias_flat = jnp.asarray(bias, jnp.float32).reshape(-1)

    if block_b is None:
        block_b = _pick_batch_block(B, H, W, x.dtype.itemsize)
    assert B % block_b == 0

    return pl.pallas_call(
        graydim_fused_kernel,
        out_shape=jax.ShapeDtypeStruct((B, 1, H, W), jnp.float32),
        grid=(B // block_b,),
        in_specs=[
            pl.BlockSpec((block_b, 3, H, W), lambda i: (i, 0, 0, 0)),
            pl.BlockSpec(memory_space=pltpu.SMEM),   # flattened conv weight (98,)
            pl.BlockSpec(memory_space=pltpu.SMEM),   # bias (1,)
        ],
        out_specs=pl.BlockSpec((block_b, 1, H, W), lambda i: (i, 0, 0, 0)),
        scratch_shapes=[pltpu.VMEM((block_b, 2, H + 2 * PAD, W + 2 * PAD), jnp.float32)],
        compiler_params=pltpu.CompilerParams(dimension_semantics=("parallel",)),
    )(x, weight_flat, bias_flat)
    # TODO(synk): for very large frames on v7x (64 MiB VMEM), add H-tiling with a
    # 6-row halo instead of whole-image blocks.


def graydim_reference(x, weight, bias):
    """Pure-JAX reference of the same math, for a sanity check."""
    x = x.astype(jnp.float32)
    gray = 0.299 * x[:, 0] + 0.587 * x[:, 1] + 0.114 * x[:, 2]
    adj = jnp.stack([jnp.clip(jnp.round(f * gray), 0.0, 255.0) for f in BRIGHTNESS_FACTORS], axis=1)
    avg = jnp.mean(adj, axis=1, keepdims=True)
    mx = jnp.max(adj, axis=1, keepdims=True)
    inp = jnp.concatenate([avg, mx], axis=1)
    out = jax.lax.conv_general_dilated(
        inp, jnp.asarray(weight, jnp.float32).reshape(1, 2, KSIZE, KSIZE),
        window_strides=(1, 1), padding=((PAD, PAD), (PAD, PAD)),
        dimension_numbers=("NCHW", "OIHW", "NCHW"),
        precision=jax.lax.Precision.HIGHEST)
    return jax.nn.sigmoid(out + jnp.asarray(bias, jnp.float32).reshape(1, 1, 1, 1))


if __name__ == "__main__":
    key = jax.random.PRNGKey(0)
    kx, kw, kb = jax.random.split(key, 3)

    B, H, W = 2, 16, 16
    # Image-like RGB input in [0, 255).
    x = jax.random.uniform(kx, (B, 3, H, W), jnp.float32, 0.0, 255.0)

    # Deterministic Conv2d(2, 1, kernel_size=7) params (PyTorch-style uniform bound).
    fan_in = 2 * KSIZE * KSIZE
    bound = float(1.0 / math.sqrt(fan_in))
    weight = jax.random.uniform(kw, (1, 2, KSIZE, KSIZE), jnp.float32, -bound, bound)
    bias = jax.random.uniform(kb, (1,), jnp.float32, -bound, bound)

    out = graydim_forward(x, weight, bias)
    jax.block_until_ready(out)
    assert out.shape == (B, 1, H, W) and out.dtype == jnp.float32

    # Loose-tolerance sanity check vs pure-JAX reference (loose to absorb f32
    # summation-order differences and rare round-at-.5 boundary flips).
    ref = graydim_reference(x, weight, bias)
    max_err = float(jnp.max(jnp.abs(out - ref)))
    assert max_err < 5e-2, f"kernel vs reference mismatch: max_err={max_err}"

    print("KERNEL_OK")
</pallas_src>

<mosaic_0001>
module attributes {stable_mosaic.version = 11 : i64} {
  func.func @graydim_fused_kernel(%arg0: i32, %arg1: memref<2x3x16x16xf32, #tpu.memory_space<vmem>>, %arg2: memref<98xf32, #tpu.memory_space<smem>>, %arg3: memref<1xf32, #tpu.memory_space<smem>>, %arg4: memref<2x1x16x16xf32, #tpu.memory_space<vmem>>, %arg5: memref<2x2x22x22xf32, #tpu.memory_space<vmem>>) attributes {dimension_semantics = [#tpu.dimension_semantics<parallel>], iteration_bounds = array<i64: 1>, scalar_prefetch = 0 : i64, scratch_operands = 1 : i64, tpu.core_type = #tpu.core_type<tc>, window_params = [{transform_indices = @transform_0, window_bounds = array<i64: 2, 3, 16, 16>}, {transform_indices = @transform_1, window_bounds = array<i64: 98>}, {transform_indices = @transform_2, window_bounds = array<i64: 1>}, {transform_indices = @transform_3, window_bounds = array<i64: 2, 1, 16, 16>}]} {
    %c0 = arith.constant 0 : index
    %c0_0 = arith.constant 0 : index
    %c0_1 = arith.constant 0 : index
    %c0_2 = arith.constant 0 : index
    %0 = vector.load %arg1[%c0, %c0_0, %c0_1, %c0_2] : memref<2x3x16x16xf32, #tpu.memory_space<vmem>>, vector<2x3x16x16xf32>
    %1 = vector.extract_strided_slice %0 {offsets = [0, 0, 0, 0], sizes = [2, 1, 16, 16], strides = [1, 1, 1, 1]} : vector<2x3x16x16xf32> to vector<2x1x16x16xf32>
    %2 = vector.shape_cast %1 : vector<2x1x16x16xf32> to vector<2x16x16xf32>
    %cst = arith.constant 2.990000e-01 : f32
    %3 = vector.broadcast %cst : f32 to vector<2x16x16xf32>
    %4 = arith.mulf %3, %2 : vector<2x16x16xf32>
    %5 = vector.extract_strided_slice %0 {offsets = [0, 1, 0, 0], sizes = [2, 1, 16, 16], strides = [1, 1, 1, 1]} : vector<2x3x16x16xf32> to vector<2x1x16x16xf32>
    %6 = vector.shape_cast %5 : vector<2x1x16x16xf32> to vector<2x16x16xf32>
    %cst_3 = arith.constant 5.870000e-01 : f32
    %7 = vector.broadcast %cst_3 : f32 to vector<2x16x16xf32>
    %8 = arith.mulf %7, %6 : vector<2x16x16xf32>
    %9 = arith.addf %4, %8 : vector<2x16x16xf32>
    %10 = vector.extract_strided_slice %0 {offsets = [0, 2, 0, 0], sizes = [2, 1, 16, 16], strides = [1, 1, 1, 1]} : vector<2x3x16x16xf32> to vector<2x1x16x16xf32>
    %11 = vector.shape_cast %10 : vector<2x1x16x16xf32> to vector<2x16x16xf32>
    %cst_4 = arith.constant 1.140000e-01 : f32
    %12 = vector.broadcast %cst_4 : f32 to vector<2x16x16xf32>
    %13 = arith.mulf %12, %11 : vector<2x16x16xf32>
    %14 = arith.addf %9, %13 : vector<2x16x16xf32>
    %cst_5 = arith.constant 8.000000e-01 : f32
    %15 = vector.broadcast %cst_5 : f32 to vector<2x16x16xf32>
    %16 = arith.mulf %15, %14 : vector<2x16x16xf32>
    %17 = math.roundeven %16 : vector<2x16x16xf32>
    %cst_6 = arith.constant 0.000000e+00 : f32
    %cst_7 = arith.constant 2.550000e+02 : f32
    %18 = vector.broadcast %cst_6 : f32 to vector<2x16x16xf32>
    %19 = arith.maximumf %18, %17 : vector<2x16x16xf32>
    %20 = vector.broadcast %cst_7 : f32 to vector<2x16x16xf32>
    %21 = arith.minimumf %20, %19 : vector<2x16x16xf32>
    %cst_8 = arith.constant 1.000000e+00 : f32
    %22 = vector.broadcast %cst_8 : f32 to vector<2x16x16xf32>
    %23 = arith.mulf %22, %14 : vector<2x16x16xf32>
    %24 = math.roundeven %23 : vector<2x16x16xf32>
    %cst_9 = arith.constant 0.000000e+00 : f32
    %cst_10 = arith.constant 2.550000e+02 : f32
    %25 = vector.broadcast %cst_9 : f32 to vector<2x16x16xf32>
    %26 = arith.maximumf %25, %24 : vector<2x16x16xf32>
    %27 = vector.broadcast %cst_10 : f32 to vector<2x16x16xf32>
    %28 = arith.minimumf %27, %26 : vector<2x16x16xf32>
    %cst_11 = arith.constant 1.200000e+00 : f32
    %29 = vector.broadcast %cst_11 : f32 to vector<2x16x16xf32>
    %30 = arith.mulf %29, %14 : vector<2x16x16xf32>
    %31 = math.roundeven %30 : vector<2x16x16xf32>
    %cst_12 = arith.constant 0.000000e+00 : f32
    %cst_13 = arith.constant 2.550000e+02 : f32
    %32 = vector.broadcast %cst_12 : f32 to vector<2x16x16xf32>
    %33 = arith.maximumf %32, %31 : vector<2x16x16xf32>
    %34 = vector.broadcast %cst_13 : f32 to vector<2x16x16xf32>
    %35 = arith.minimumf %34, %33 : vector<2x16x16xf32>
    %36 = arith.addf %21, %28 : vector<2x16x16xf32>
    %37 = arith.addf %36, %35 : vector<2x16x16xf32>
    %cst_14 = arith.constant 0.333333343 : f32
    %38 = vector.broadcast %cst_14 : f32 to vector<2x16x16xf32>
    %39 = arith.mulf %37, %38 : vector<2x16x16xf32>
    %40 = arith.maximumf %21, %28 : vector<2x16x16xf32>
    %41 = arith.maximumf %40, %35 : vector<2x16x16xf32>
    %cst_15 = arith.constant 0.000000e+00 : f32
    %42 = vector.broadcast %cst_15 : f32 to vector<2x2x22x22xf32>
    %c0_16 = arith.constant 0 : index
    %c0_17 = arith.constant 0 : index
    %c0_18 = arith.constant 0 : index
    %c0_19 = arith.constant 0 : index
    %43 = vector.load %arg5[%c0_16, %c0_17, %c0_18, %c0_19] : memref<2x2x22x22xf32, #tpu.memory_space<vmem>>, vector<2x2x22x22xf32>
    tpu.vector_store %arg5[%c0_16, %c0_17, %c0_18, %c0_19], %42 {strides = array<i32>} : memref<2x2x22x22xf32, #tpu.memory_space<vmem>>, vector<2x2x22x22xf32>,
    %c0_20 = arith.constant 0 : index
    %c0_21 = arith.constant 0 : index
    %c3 = arith.constant 3 : index
    %c3_22 = arith.constant 3 : index
    %44 = vector.load %arg5[%c0_20, %c0_21, %c3, %c3_22] : memref<2x2x22x22xf32, #tpu.memory_space<vmem>>, vector<2x1x16x16xf32>
    %45 = vector.shape_cast %44 : vector<2x1x16x16xf32> to vector<2x16x16xf32>
    %46 = vector.shape_cast %39 : vector<2x16x16xf32> to vector<2x1x16x16xf32>
    tpu.vector_store %arg5[%c0_20, %c0_21, %c3, %c3_22], %46 {strides = array<i32>} : memref<2x2x22x22xf32, #tpu.memory_space<vmem>>, vector<2x1x16x16xf32>,
    %c0_23 = arith.constant 0 : index
    %c1 = arith.constant 1 : index
    %c3_24 = arith.constant 3 : index
    %c3_25 = arith.constant 3 : index
    %47 = vector.load %arg5[%c0_23, %c1, %c3_24, %c3_25] : memref<2x2x22x22xf32, #tpu.memory_space<vmem>>, vector<2x1x16x16xf32>
    %48 = vector.shape_cast %47 : vector<2x1x16x16xf32> to vector<2x16x16xf32>
    %49 = vector.shape_cast %41 : vector<2x16x16xf32> to vector<2x1x16x16xf32>
    tpu.vector_store %arg5[%c0_23, %c1, %c3_24, %c3_25], %49 {strides = array<i32>} : memref<2x2x22x22xf32, #tpu.memory_space<vmem>>, vector<2x1x16x16xf32>,
    %cst_26 = arith.constant 0.000000e+00 : f32
    %50 = vector.broadcast %cst_26 : f32 to vector<2x16x16xf32>
    %cst_27 = arith.constant 0.000000e+00 : f32
    %51 = vector.broadcast %cst_27 : f32 to vector<2x16x16xf32>
    %cst_28 = arith.constant 0.000000e+00 : f32
    %52 = vector.broadcast %cst_28 : f32 to vector<2x16x16xf32>
    %cst_29 = arith.constant 0.000000e+00 : f32
    %53 = vector.broadcast %cst_29 : f32 to vector<2x16x16xf32>
    %c0_30 = arith.constant 0 : index
    %54 = memref.load %arg2[%c0_30] : memref<98xf32, #tpu.memory_space<smem>>
    %c0_31 = arith.constant 0 : index
    %c0_32 = arith.constant 0 : index
    %c0_33 = arith.constant 0 : index
    %c0_34 = arith.constant 0 : index
    %55 = vector.load %arg5[%c0_31, %c0_32, %c0_33, %c0_34] : memref<2x2x22x22xf32, #tpu.memory_space<vmem>>, vector<2x1x16x16xf32>
    %56 = vector.shape_cast %55 : vector<2x1x16x16xf32> to vector<2x16x16xf32>
    %57 = vector.broadcast %54 : f32 to vector<2x16x16xf32>
    %58 = arith.mulf %57, %56 : vector<2x16x16xf32>
    %59 = arith.addf %50, %58 : vector<2x16x16xf32>
    %c1_35 = arith.constant 1 : index
    %60 = memref.load %arg2[%c1_35] : memref<98xf32, #tpu.memory_space<smem>>
    %c0_36 = arith.constant 0 : index
    %c0_37 = arith.constant 0 : index
    %c0_38 = arith.constant 0 : index
    %c1_39 = arith.constant 1 : index
    %61 = vector.load %arg5[%c0_36, %c0_37, %c0_38, %c1_39] : memref<2x2x22x22xf32, #tpu.memory_space<vmem>>, vector<2x1x16x16xf32>
    %62 = vector.shape_cast %61 : vector<2x1x16x16xf32> to vector<2x16x16xf32>
    %63 = vector.broadcast %60 : f32 to vector<2x16x16xf32>
    %64 = arith.mulf %63, %62 : vector<2x16x16xf32>
    %65 = arith.addf %51, %64 : vector<2x16x16xf32>
    %c2 = arith.constant 2 : index
    %66 = memref.load %arg2[%c2] : memref<98xf32, #tpu.memory_space<smem>>
    %c0_40 = arith.constant 0 : index
    %c0_41 = arith.constant 0 : index
    %c0_42 = arith.constant 0 : index
    %c2_43 = arith.constant 2 : index
    %67 = vector.load %arg5[%c0_40, %c0_41, %c0_42, %c2_43] : memref<2x2x22x22xf32, #tpu.memory_space<vmem>>, vector<2x1x16x16xf32>
    %68 = vector.shape_cast %67 : vector<2x1x16x16xf32> to vector<2x16x16xf32>
    %69 = vector.broadcast %66 : f32 to vector<2x16x16xf32>
    %70 = arith.mulf %69, %68 : vector<2x16x16xf32>
    %71 = arith.addf %52, %70 : vector<2x16x16xf32>
    %c3_44 = arith.constant 3 : index
    %72 = memref.load %arg2[%c3_44] : memref<98xf32, #tpu.memory_space<smem>>
    %c0_45 = arith.constant 0 : index
    %c0_46 = arith.constant 0 : index
    %c0_47 = arith.constant 0 : index
    %c3_48 = arith.constant 3 : index
    %73 = vector.load %arg5[%c0_45, %c0_46, %c0_47, %c3_48] : memref<2x2x22x22xf32, #tpu.memory_space<vmem>>, vector<2x1x16x16xf32>
    %74 = vector.shape_cast %73 : vector<2x1x16x16xf32> to vector<2x16x16xf32>
    %75 = vector.broadcast %72 : f32 to vector<2x16x16xf32>
    %76 = arith.mulf %75, %74 : vector<2x16x16xf32>
    %77 = arith.addf %53, %76 : vector<2x16x16xf32>
    %c4 = arith.constant 4 : index
    %78 = memref.load %arg2[%c4] : memref<98xf32, #tpu.memory_space<smem>>
    %c0_49 = arith.constant 0 : index
    %c0_50 = arith.constant 0 : index
    %c0_51 = arith.constant 0 : index
    %c4_52 = arith.constant 4 : index
    %79 = vector.load %arg5[%c0_49, %c0_50, %c0_51, %c4_52] : memref<2x2x22x22xf32, #tpu.memory_space<vmem>>, vector<2x1x16x16xf32>
    %80 = vector.shape_cast %79 : vector<2x1x16x16xf32> to vector<2x16x16xf32>
    %81 = vector.broadcast %78 : f32 to vector<2x16x16xf32>
    %82 = arith.mulf %81, %80 : vector<2x16x16xf32>
    %83 = arith.addf %59, %82 : vector<2x16x16xf32>
    %c5 = arith.constant 5 : index
    %84 = memref.load %arg2[%c5] : memref<98xf32, #tpu.memory_space<smem>>
    %c0_53 = arith.constant 0 : index
    %c0_54 = arith.constant 0 : index
    %c0_55 = arith.constant 0 : index
    %c5_56 = arith.constant 5 : index
    %85 = vector.load %arg5[%c0_53, %c0_54, %c0_55, %c5_56] : memref<2x2x22x22xf32, #tpu.memory_space<vmem>>, vector<2x1x16x16xf32>
    %86 = vector.shape_cast %85 : vector<2x1x16x16xf32> to vector<2x16x16xf32>
    %87 = vector.broadcast %84 : f32 to vector<2x16x16xf32>
    %88 = arith.mulf %87, %86 : vector<2x16x16xf32>
    %89 = arith.addf %65, %88 : vector<2x16x16xf32>
    %c6 = arith.constant 6 : index
    %90 = memref.load %arg2[%c6] : memref<98xf32, #tpu.memory_space<smem>>
    %c0_57 = arith.constant 0 : index
    %c0_58 = arith.constant 0 : index
    %c0_59 = arith.constant 0 : index
    %c6_60 = arith.constant 6 : index
    %91 = vector.load %arg5[%c0_57, %c0_58, %c0_59, %c6_60] : memref<2x2x22x22xf32, #tpu.memory_space<vmem>>, vector<2x1x16x16xf32>
    %92 = vector.shape_cast %91 : vector<2x1x16x16xf32> to vector<2x16x16xf32>
    %93 = vector.broadcast %90 : f32 to vector<2x16x16xf32>
    %94 = arith.mulf %93, %92 : vector<2x16x16xf32>
    %95 = arith.addf %71, %94 : vector<2x16x16xf32>
    %c7 = arith.constant 7 : index
    %96 = memref.load %arg2[%c7] : memref<98xf32, #tpu.memory_space<smem>>
    %c0_61 = arith.constant 0 : index
    %c0_62 = arith.constant 0 : index
    %c1_63 = arith.constant 1 : index
    %c0_64 = arith.constant 0 : index
    %97 = vector.load %arg5[%c0_61, %c0_62, %c1_63, %c0_64] : memref<2x2x22x22xf32, #tpu.memory_space<vmem>>, vector<2x1x16x16xf32>
    %98 = vector.shape_cast %97 : vector<2x1x16x16xf32> to vector<2x16x16xf32>
    %99 = vector.broadcast %96 : f32 to vector<2x16x16xf32>
    %100 = arith.mulf %99, %98 : vector<2x16x16xf32>
    %101 = arith.addf %77, %100 : vector<2x16x16xf32>
    %c8 = arith.constant 8 : index
    %102 = memref.load %arg2[%c8] : memref<98xf32, #tpu.memory_space<smem>>
    %c0_65 = arith.constant 0 : index
    %c0_66 = arith.constant 0 : index
    %c1_67 = arith.constant 1 : index
    %c1_68 = arith.constant 1 : index
    %103 = vector.load %arg5[%c0_65, %c0_66, %c1_67, %c1_68] : memref<2x2x22x22xf32, #tpu.memory_space<vmem>>, vector<2x1x16x16xf32>
    %104 = vector.shape_cast %103 : vector<2x1x16x16xf32> to vector<2x16x16xf32>
    %105 = vector.broadcast %102 : f32 to vector<2x16x16xf32>
    %106 = arith.mulf %105, %104 : vector<2x16x16xf32>
    %107 = arith.addf %83, %106 : vector<2x16x16xf32>
    %c9 = arith.constant 9 : index
    %108 = memref.load %arg2[%c9] : memref<98xf32, #tpu.memory_space<smem>>
    %c0_69 = arith.constant 0 : index
    %c0_70 = arith.constant 0 : index
    %c1_71 = arith.constant 1 : index
    %c2_72 = arith.constant 2 : index
    %109 = vector.load %arg5[%c0_69, %c0_70, %c1_71, %c2_72] : memref<2x2x22x22xf32, #tpu.memory_space<vmem>>, vector<2x1x16x16xf32>
    %110 = vector.shape_cast %109 : vector<2x1x16x16xf32> to vector<2x16x16xf32>
    %111 = vector.broadcast %108 : f32 to vector<2x16x16xf32>
    %112 = arith.mulf %111, %110 : vector<2x16x16xf32>
    %113 = arith.addf %89, %112 : vector<2x16x16xf32>
    %c10 = arith.constant 10 : index
    %114 = memref.load %arg2[%c10] : memref<98xf32, #tpu.memory_space<smem>>
    %c0_73 = arith.constant 0 : index
    %c0_74 = arith.constant 0 : index
    %c1_75 = arith.constant 1 : index
    %c3_76 = arith.constant 3 : index
    %115 = vector.load %arg5[%c0_73, %c0_74, %c1_75, %c3_76] : memref<2x2x22x22xf32, #tpu.memory_space<vmem>>, vector<2x1x16x16xf32>
    %116 = vector.shape_cast %115 : vector<2x1x16x16xf32> to vector<2x16x16xf32>
    %117 = vector.broadcast %114 : f32 to vector<2x16x16xf32>
    %118 = arith.mulf %117, %116 : vector<2x16x16xf32>
    %119 = arith.addf %95, %118 : vector<2x16x16xf32>
    %c11 = arith.constant 11 : index
    %120 = memref.load %arg2[%c11] : memref<98xf32, #tpu.memory_space<smem>>
    %c0_77 = arith.constant 0 : index
    %c0_78 = arith.constant 0 : index
    %c1_79 = arith.constant 1 : index
    %c4_80 = arith.constant 4 : index
    %121 = vector.load %arg5[%c0_77, %c0_78, %c1_79, %c4_80] : memref<2x2x22x22xf32, #tpu.memory_space<vmem>>, vector<2x1x16x16xf32>
    %122 = vector.shape_cast %121 : vector<2x1x16x16xf32> to vector<2x16x16xf32>
    %123 = vector.broadcast %120 : f32 to vector<2x16x16xf32>
    %124 = arith.mulf %123, %122 : vector<2x16x16xf32>
    %125 = arith.addf %101, %124 : vector<2x16x16xf32>
    %c12 = arith.constant 12 : index
    %126 = memref.load %arg2[%c12] : memref<98xf32, #tpu.memory_space<smem>>
    %c0_81 = arith.constant 0 : index
    %c0_82 = arith.constant 0 : index
    %c1_83 = arith.constant 1 : index
    %c5_84 = arith.constant 5 : index
    %127 = vector.load %arg5[%c0_81, %c0_82, %c1_83, %c5_84] : memref<2x2x22x22xf32, #tpu.memory_space<vmem>>, vector<2x1x16x16xf32>
    %128 = vector.shape_cast %127 : vector<2x1x16x16xf32> to vector<2x16x16xf32>
    %129 = vector.broadcast %126 : f32 to vector<2x16x16xf32>
    %130 = arith.mulf %129, %128 : vector<2x16x16xf32>
    %131 = arith.addf %107, %130 : vector<2x16x16xf32>
    %c13 = arith.constant 13 : index
    %132 = memref.load %arg2[%c13] : memref<98xf32, #tpu.memory_space<smem>>
    %c0_85 = arith.constant 0 : index
    %c0_86 = arith.constant 0 : index
    %c1_87 = arith.constant 1 : index
    %c6_88 = arith.constant 6 : index
    %133 = vector.load %arg5[%c0_85, %c0_86, %c1_87, %c6_88] : memref<2x2x22x22xf32, #tpu.memory_space<vmem>>, vector<2x1x16x16xf32>
    %134 = vector.shape_cast %133 : vector<2x1x16x16xf32> to vector<2x16x16xf32>
    %135 = vector.broadcast %132 : f32 to vector<2x16x16xf32>
    %136 = arith.mulf %135, %134 : vector<2x16x16xf32>
    %137 = arith.addf %113, %136 : vector<2x16x16xf32>
    %c14 = arith.constant 14 : index
    %138 = memref.load %arg2[%c14] : memref<98xf32, #tpu.memory_space<smem>>
    %c0_89 = arith.constant 0 : index
    %c0_90 = arith.constant 0 : index
    %c2_91 = arith.constant 2 : index
    %c0_92 = arith.constant 0 : index
    %139 = vector.load %arg5[%c0_89, %c0_90, %c2_91, %c0_92] : memref<2x2x22x22xf32, #tpu.memory_space<vmem>>, vector<2x1x16x16xf32>
    %140 = vector.shape_cast %139 : vector<2x1x16x16xf32> to vector<2x16x16xf32>
    %141 = vector.broadcast %138 : f32 to vector<2x16x16xf32>
    %142 = arith.mulf %141, %140 : vector<2x16x16xf32>
    %143 = arith.addf %119, %142 : vector<2x16x16xf32>
    %c15 = arith.constant 15 : index
    %144 = memref.load %arg2[%c15] : memref<98xf32, #tpu.memory_space<smem>>
    %c0_93 = arith.constant 0 : index
    %c0_94 = arith.constant 0 : index
    %c2_95 = arith.constant 2 : index
    %c1_96 = arith.constant 1 : index
    %145 = vector.load %arg5[%c0_93, %c0_94, %c2_95, %c1_96] : memref<2x2x22x22xf32, #tpu.memory_space<vmem>>, vector<2x1x16x16xf32>
    %146 = vector.shape_cast %145 : vector<2x1x16x16xf32> to vector<2x16x16xf32>
    %147 = vector.broadcast %144 : f32 to vector<2x16x16xf32>
    %148 = arith.mulf %147, %146 : vector<2x16x16xf32>
    %149 = arith.addf %125, %148 : vector<2x16x16xf32>
    %c16 = arith.constant 16 : index
    %150 = memref.load %arg2[%c16] : memref<98xf32, #tpu.memory_space<smem>>
    %c0_97 = arith.constant 0 : index
    %c0_98 = arith.constant 0 : index
    %c2_99 = arith.constant 2 : index
    %c2_100 = arith.constant 2 : index
    %151 = vector.load %arg5[%c0_97, %c0_98, %c2_99, %c2_100] : memref<2x2x22x22xf32, #tpu.memory_space<vmem>>, vector<2x1x16x16xf32>
    %152 = vector.shape_cast %151 : vector<2x1x16x16xf32> to vector<2x16x16xf32>
    %153 = vector.broadcast %150 : f32 to vector<2x16x16xf32>
    %154 = arith.mulf %153, %152 : vector<2x16x16xf32>
    %155 = arith.addf %131, %154 : vector<2x16x16xf32>
    %c17 = arith.constant 17 : index
    %156 = memref.load %arg2[%c17] : memref<98xf32, #tpu.memory_space<smem>>
    %c0_101 = arith.constant 0 : index
    %c0_102 = arith.constant 0 : index
    %c2_103 = arith.constant 2 : index
    %c3_104 = arith.constant 3 : index
    %157 = vector.load %arg5[%c0_101, %c0_102, %c2_103, %c3_104] : memref<2x2x22x22xf32, #tpu.memory_space<vmem>>, vector<2x1x16x16xf32>
    %158 = vector.shape_cast %157 : vector<2x1x16x16xf32> to vector<2x16x16xf32>
    %159 = vector.broadcast %156 : f32 to vector<2x16x16xf32>
    %160 = arith.mulf %159, %158 : vector<2x16x16xf32>
    %161 = arith.addf %137, %160 : vector<2x16x16xf32>
    %c18 = arith.constant 18 : index
    %162 = memref.load %arg2[%c18] : memref<98xf32, #tpu.memory_space<smem>>
    %c0_105 = arith.constant 0 : index
    %c0_106 = arith.constant 0 : index
    %c2_107 = arith.constant 2 : index
    %c4_108 = arith.constant 4 : index
    %163 = vector.load %arg5[%c0_105, %c0_106, %c2_107, %c4_108] : memref<2x2x22x22xf32, #tpu.memory_space<vmem>>, vector<2x1x16x16xf32>
    %164 = vector.shape_cast %163 : vector<2x1x16x16xf32> to vector<2x16x16xf32>
    %165 = vector.broadcast %162 : f32 to vector<2x16x16xf32>
    %166 = arith.mulf %165, %164 : vector<2x16x16xf32>
    %167 = arith.addf %143, %166 : vector<2x16x16xf32>
    %c19 = arith.constant 19 : index
    %168 = memref.load %arg2[%c19] : memref<98xf32, #tpu.memory_space<smem>>
    %c0_109 = arith.constant 0 : index
    %c0_110 = arith.constant 0 : index
    %c2_111 = arith.constant 2 : index
    %c5_112 = arith.constant 5 : index
    %169 = vector.load %arg5[%c0_109, %c0_110, %c2_111, %c5_112] : memref<2x2x22x22xf32, #tpu.memory_space<vmem>>, vector<2x1x16x16xf32>
    %170 = vector.shape_cast %169 : vector<2x1x16x16xf32> to vector<2x16x16xf32>
    %171 = vector.broadcast %168 : f32 to vector<2x16x16xf32>
    %172 = arith.mulf %171, %170 : vector<2x16x16xf32>
    %173 = arith.addf %149, %172 : vector<2x16x16xf32>
    %c20 = arith.constant 20 : index
    %174 = memref.load %arg2[%c20] : memref<98xf32, #tpu.memory_space<smem>>
    %c0_113 = arith.constant 0 : index
    %c0_114 = arith.constant 0 : index
    %c2_115 = arith.constant 2 : index
    %c6_116 = arith.constant 6 : index
    %175 = vector.load %arg5[%c0_113, %c0_114, %c2_115, %c6_116] : memref<2x2x22x22xf32, #tpu.memory_space<vmem>>, vector<2x1x16x16xf32>
    %176 = vector.shape_cast %175 : vector<2x1x16x16xf32> to vector<2x16x16xf32>
    %177 = vector.broadcast %174 : f32 to vector<2x16x16xf32>
    %178 = arith.mulf %177, %176 : vector<2x16x16xf32>
    %179 = arith.addf %155, %178 : vector<2x16x16xf32>
    %c21 = arith.constant 21 : index
    %180 = memref.load %arg2[%c21] : memref<98xf32, #tpu.memory_space<smem>>
    %c0_117 = arith.constant 0 : index
    %c0_118 = arith.constant 0 : index
    %c3_119 = arith.constant 3 : index
    %c0_120 = arith.constant 0 : index
    %181 = vector.load %arg5[%c0_117, %c0_118, %c3_119, %c0_120] : memref<2x2x22x22xf32, #tpu.memory_space<vmem>>, vector<2x1x16x16xf32>
    %182 = vector.shape_cast %181 : vector<2x1x16x16xf32> to vector<2x16x16xf32>
    %183 = vector.broadcast %180 : f32 to vector<2x16x16xf32>
    %184 = arith.mulf %183, %182 : vector<2x16x16xf32>
    %185 = arith.addf %161, %184 : vector<2x16x16xf32>
    %c22 = arith.constant 22 : index
    %186 = memref.load %arg2[%c22] : memref<98xf32, #tpu.memory_space<smem>>
    %c0_121 = arith.constant 0 : index
    %c0_122 = arith.constant 0 : index
    %c3_123 = arith.constant 3 : index
    %c1_124 = arith.constant 1 : index
    %187 = vector.load %arg5[%c0_121, %c0_122, %c3_123, %c1_124] : memref<2x2x22x22xf32, #tpu.memory_space<vmem>>, vector<2x1x16x16xf32>
    %188 = vector.shape_cast %187 : vector<2x1x16x16xf32> to vector<2x16x16xf32>
    %189 = vector.broadcast %186 : f32 to vector<2x16x16xf32>
    %190 = arith.mulf %189, %188 : vector<2x16x16xf32>
    %191 = arith.addf %167, %190 : vector<2x16x16xf32>
    %c23 = arith.constant 23 : index
    %192 = memref.load %arg2[%c23] : memref<98xf32, #tpu.memory_space<smem>>
    %c0_125 = arith.constant 0 : index
    %c0_126 = arith.constant 0 : index
    %c3_127 = arith.constant 3 : index
    %c2_128 = arith.constant 2 : index
    %193 = vector.load %arg5[%c0_125, %c0_126, %c3_127, %c2_128] : memref<2x2x22x22xf32, #tpu.memory_space<vmem>>, vector<2x1x16x16xf32>
    %194 = vector.shape_cast %193 : vector<2x1x16x16xf32> to vector<2x16x16xf32>
    %195 = vector.broadcast %192 : f32 to vector<2x16x16xf32>
    %196 = arith.mulf %195, %194 : vector<2x16x16xf32>
    %197 = arith.addf %173, %196 : vector<2x16x16xf32>
    %c24 = arith.constant 24 : index
    %198 = memref.load %arg2[%c24] : memref<98xf32, #tpu.memory_space<smem>>
    %c0_129 = arith.constant 0 : index
    %c0_130 = arith.constant 0 : index
    %c3_131 = arith.constant 3 : index
    %c3_132 = arith.constant 3 : index
    %199 = vector.load %arg5[%c0_129, %c0_130, %c3_131, %c3_132] : memref<2x2x22x22xf32, #tpu.memory_space<vmem>>, vector<2x1x16x16xf32>
    %200 = vector.shape_cast %199 : vector<2x1x16x16xf32> to vector<2x16x16xf32>
    %201 = vector.broadcast %198 : f32 to vector<2x16x16xf32>
    %202 = arith.mulf %201, %200 : vector<2x16x16xf32>
    %203 = arith.addf %179, %202 : vector<2x16x16xf32>
    %c25 = arith.constant 25 : index
    %204 = memref.load %arg2[%c25] : memref<98xf32, #tpu.memory_space<smem>>
    %c0_133 = arith.constant 0 : index
    %c0_134 = arith.constant 0 : index
    %c3_135 = arith.constant 3 : index
    %c4_136 = arith.constant 4 : index
    %205 = vector.load %arg5[%c0_133, %c0_134, %c3_135, %c4_136] : memref<2x2x22x22xf32, #tpu.memory_space<vmem>>, vector<2x1x16x16xf32>
    %206 = vector.shape_cast %205 : vector<2x1x16x16xf32> to vector<2x16x16xf32>
    %207 = vector.broadcast %204 : f32 to vector<2x16x16xf32>
    %208 = arith.mulf %207, %206 : vector<2x16x16xf32>
    %209 = arith.addf %185, %208 : vector<2x16x16xf32>
    %c26 = arith.constant 26 : index
    %210 = memref.load %arg2[%c26] : memref<98xf32, #tpu.memory_space<smem>>
    %c0_137 = arith.constant 0 : index
    %c0_138 = arith.constant 0 : index
    %c3_139 = arith.constant 3 : index
    %c5_140 = arith.constant 5 : index
    %211 = vector.load %arg5[%c0_137, %c0_138, %c3_139, %c5_140] : memref<2x2x22x22xf32, #tpu.memory_space<vmem>>, vector<2x1x16x16xf32>
    %212 = vector.shape_cast %211 : vector<2x1x16x16xf32> to vector<2x16x16xf32>
    %213 = vector.broadcast %210 : f32 to vector<2x16x16xf32>
    %214 = arith.mulf %213, %212 : vector<2x16x16xf32>
    %215 = arith.addf %191, %214 : vector<2x16x16xf32>
    %c27 = arith.constant 27 : index
    %216 = memref.load %arg2[%c27] : memref<98xf32, #tpu.memory_space<smem>>
    %c0_141 = arith.constant 0 : index
    %c0_142 = arith.constant 0 : index
    %c3_143 = arith.constant 3 : index
    %c6_144 = arith.constant 6 : index
    %217 = vector.load %arg5[%c0_141, %c0_142, %c3_143, %c6_144] : memref<2x2x22x22xf32, #tpu.memory_space<vmem>>, vector<2x1x16x16xf32>
    %218 = vector.shape_cast %217 : vector<2x1x16x16xf32> to vector<2x16x16xf32>
    %219 = vector.broadcast %216 : f32 to vector<2x16x16xf32>
    %220 = arith.mulf %219, %218 : vector<2x16x16xf32>
    %221 = arith.addf %197, %220 : vector<2x16x16xf32>
    %c28 = arith.constant 28 : index
    %222 = memref.load %arg2[%c28] : memref<98xf32, #tpu.memory_space<smem>>
    %c0_145 = arith.constant 0 : index
    %c0_146 = arith.constant 0 : index
    %c4_147 = arith.constant 4 : index
    %c0_148 = arith.constant 0 : index
    %223 = vector.load %arg5[%c0_145, %c0_146, %c4_147, %c0_148] : memref<2x2x22x22xf32, #tpu.memory_space<vmem>>, vector<2x1x16x16xf32>
    %224 = vector.shape_cast %223 : vector<2x1x16x16xf32> to vector<2x16x16xf32>
    %225 = vector.broadcast %222 : f32 to vector<2x16x16xf32>
    %226 = arith.mulf %225, %224 : vector<2x16x16xf32>
    %227 = arith.addf %203, %226 : vector<2x16x16xf32>
    %c29 = arith.constant 29 : index
    %228 = memref.load %arg2[%c29] : memref<98xf32, #tpu.memory_space<smem>>
    %c0_149 = arith.constant 0 : index
    %c0_150 = arith.constant 0 : index
    %c4_151 = arith.constant 4 : index
    %c1_152 = arith.constant 1 : index
    %229 = vector.load %arg5[%c0_149, %c0_150, %c4_151, %c1_152] : memref<2x2x22x22xf32, #tpu.memory_space<vmem>>, vector<2x1x16x16xf32>
    %230 = vector.shape_cast %229 : vector<2x1x16x16xf32> to vector<2x16x16xf32>
    %231 = vector.broadcast %228 : f32 to vector<2x16x16xf32>
    %232 = arith.mulf %231, %230 : vector<2x16x16xf32>
    %233 = arith.addf %209, %232 : vector<2x16x16xf32>
    %c30 = arith.constant 30 : index
    %234 = memref.load %arg2[%c30] : memref<98xf32, #tpu.memory_space<smem>>
    %c0_153 = arith.constant 0 : index
    %c0_154 = arith.constant 0 : index
    %c4_155 = arith.constant 4 : index
    %c2_156 = arith.constant 2 : index
    %235 = vector.load %arg5[%c0_153, %c0_154, %c4_155, %c2_156] : memref<2x2x22x22xf32, #tpu.memory_space<vmem>>, vector<2x1x16x16xf32>
    %236 = vector.shape_cast %235 : vector<2x1x16x16xf32> to vector<2x16x16xf32>
    %237 = vector.broadcast %234 : f32 to vector<2x16x16xf32>
    %238 = arith.mulf %237, %236 : vector<2x16x16xf32>
    %239 = arith.addf %215, %238 : vector<2x16x16xf32>
    %c31 = arith.constant 31 : index
    %240 = memref.load %arg2[%c31] : memref<98xf32, #tpu.memory_space<smem>>
    %c0_157 = arith.constant 0 : index
    %c0_158 = arith.constant 0 : index
    %c4_159 = arith.constant 4 : index
    %c3_160 = arith.constant 3 : index
    %241 = vector.load %arg5[%c0_157, %c0_158, %c4_159, %c3_160] : memref<2x2x22x22xf32, #tpu.memory_space<vmem>>, vector<2x1x16x16xf32>
    %242 = vector.shape_cast %241 : vector<2x1x16x16xf32> to vector<2x16x16xf32>
    %243 = vector.broadcast %240 : f32 to vector<2x16x16xf32>
    %244 = arith.mulf %243, %242 : vector<2x16x16xf32>
    %245 = arith.addf %221, %244 : vector<2x16x16xf32>
    %c32 = arith.constant 32 : index
    %246 = memref.load %arg2[%c32] : memref<98xf32, #tpu.memory_space<smem>>
    %c0_161 = arith.constant 0 : index
    %c0_162 = arith.constant 0 : index
    %c4_163 = arith.constant 4 : index
    %c4_164 = arith.constant 4 : index
    %247 = vector.load %arg5[%c0_161, %c0_162, %c4_163, %c4_164] : memref<2x2x22x22xf32, #tpu.memory_space<vmem>>, vector<2x1x16x16xf32>
    %248 = vector.shape_cast %247 : vector<2x1x16x16xf32> to vector<2x16x16xf32>
    %249 = vector.broadcast %246 : f32 to vector<2x16x16xf32>
    %250 = arith.mulf %249, %248 : vector<2x16x16xf32>
    %251 = arith.addf %227, %250 : vector<2x16x16xf32>
    %c33 = arith.constant 33 : index
    %252 = memref.load %arg2[%c33] : memref<98xf32, #tpu.memory_space<smem>>
    %c0_165 = arith.constant 0 : index
    %c0_166 = arith.constant 0 : index
    %c4_167 = arith.constant 4 : index
    %c5_168 = arith.constant 5 : index
    %253 = vector.load %arg5[%c0_165, %c0_166, %c4_167, %c5_168] : memref<2x2x22x22xf32, #tpu.memory_space<vmem>>, vector<2x1x16x16xf32>
    %254 = vector.shape_cast %253 : vector<2x1x16x16xf32> to vector<2x16x16xf32>
    %255 = vector.broadcast %252 : f32 to vector<2x16x16xf32>
    %256 = arith.mulf %255, %254 : vector<2x16x16xf32>
    %257 = arith.addf %233, %256 : vector<2x16x16xf32>
    %c34 = arith.constant 34 : index
    %258 = memref.load %arg2[%c34] : memref<98xf32, #tpu.memory_space<smem>>
    %c0_169 = arith.constant 0 : index
    %c0_170 = arith.constant 0 : index
    %c4_171 = arith.constant 4 : index
    %c6_172 = arith.constant 6 : index
    %259 = vector.load %arg5[%c0_169, %c0_170, %c4_171, %c6_172] : memref<2x2x22x22xf32, #tpu.memory_space<vmem>>, vector<2x1x16x16xf32>
    %260 = vector.shape_cast %259 : vector<2x1x16x16xf32> to vector<2x16x16xf32>
    %261 = vector.broadcast %258 : f32 to vector<2x16x16xf32>
    %262 = arith.mulf %261, %260 : vector<2x16x16xf32>
    %263 = arith.addf %239, %262 : vector<2x16x16xf32>
    %c35 = arith.constant 35 : index
    %264 = memref.load %arg2[%c35] : memref<98xf32, #tpu.memory_space<smem>>
    %c0_173 = arith.constant 0 : index
    %c0_174 = arith.constant 0 : index
    %c5_175 = arith.constant 5 : index
    %c0_176 = arith.constant 0 : index
    %265 = vector.load %arg5[%c0_173, %c0_174, %c5_175, %c0_176] : memref<2x2x22x22xf32, #tpu.memory_space<vmem>>, vector<2x1x16x16xf32>
    %266 = vector.shape_cast %265 : vector<2x1x16x16xf32> to vector<2x16x16xf32>
    %267 = vector.broadcast %264 : f32 to vector<2x16x16xf32>
    %268 = arith.mulf %267, %266 : vector<2x16x16xf32>
    %269 = arith.addf %245, %268 : vector<2x16x16xf32>
    %c36 = arith.constant 36 : index
    %270 = memref.load %arg2[%c36] : memref<98xf32, #tpu.memory_space<smem>>
    %c0_177 = arith.constant 0 : index
    %c0_178 = arith.constant 0 : index
    %c5_179 = arith.constant 5 : index
    %c1_180 = arith.constant 1 : index
    %271 = vector.load %arg5[%c0_177, %c0_178, %c5_179, %c1_180] : memref<2x2x22x22xf32, #tpu.memory_space<vmem>>, vector<2x1x16x16xf32>
    %272 = vector.shape_cast %271 : vector<2x1x16x16xf32> to vector<2x16x16xf32>
    %273 = vector.broadcast %270 : f32 to vector<2x16x16xf32>
    %274 = arith.mulf %273, %272 : vector<2x16x16xf32>
    %275 = arith.addf %251, %274 : vector<2x16x16xf32>
    %c37 = arith.constant 37 : index
    %276 = memref.load %arg2[%c37] : memref<98xf32, #tpu.memory_space<smem>>
    %c0_181 = arith.constant 0 : index
    %c0_182 = arith.constant 0 : index
    %c5_183 = arith.constant 5 : index
    %c2_184 = arith.constant 2 : index
    %277 = vector.load %arg5[%c0_181, %c0_182, %c5_183, %c2_184] : memref<2x2x22x22xf32, #tpu.memory_space<vmem>>, vector<2x1x16x16xf32>
    %278 = vector.shape_cast %277 : vector<2x1x16x16xf32> to vector<2x16x16xf32>
    %279 = vector.broadcast %276 : f32 to vector<2x16x16xf32>
    %280 = arith.mulf %279, %278 : vector<2x16x16xf32>
    %281 = arith.addf %257, %280 : vector<2x16x16xf32>
    %c38 = arith.constant 38 : index
    %282 = memref.load %arg2[%c38] : memref<98xf32, #tpu.memory_space<smem>>
    %c0_185 = arith.constant 0 : index
    %c0_186 = arith.constant 0 : index
    %c5_187 = arith.constant 5 : index
    %c3_188 = arith.constant 3 : index
    %283 = vector.load %arg5[%c0_185, %c0_186, %c5_187, %c3_188] : memref<2x2x22x22xf32, #tpu.memory_space<vmem>>, vector<2x1x16x16xf32>
    %284 = vector.shape_cast %283 : vector<2x1x16x16xf32> to vector<2x16x16xf32>
    %285 = vector.broadcast %282 : f32 to vector<2x16x16xf32>
    %286 = arith.mulf %285, %284 : vector<2x16x16xf32>
    %287 = arith.addf %263, %286 : vector<2x16x16xf32>
    %c39 = arith.constant 39 : index
    %288 = memref.load %arg2[%c39] : memref<98xf32, #tpu.memory_space<smem>>
    %c0_189 = arith.constant 0 : index
    %c0_190 = arith.constant 0 : index
    %c5_191 = arith.constant 5 : index
    %c4_192 = arith.constant 4 : index
    %289 = vector.load %arg5[%c0_189, %c0_190, %c5_191, %c4_192] : memref<2x2x22x22xf32, #tpu.memory_space<vmem>>, vector<2x1x16x16xf32>
    %290 = vector.shape_cast %289 : vector<2x1x16x16xf32> to vector<2x16x16xf32>
    %291 = vector.broadcast %288 : f32 to vector<2x16x16xf32>
    %292 = arith.mulf %291, %290 : vector<2x16x16xf32>
    %293 = arith.addf %269, %292 : vector<2x16x16xf32>
    %c40 = arith.constant 40 : index
    %294 = memref.load %arg2[%c40] : memref<98xf32, #tpu.memory_space<smem>>
    %c0_193 = arith.constant 0 : index
    %c0_194 = arith.constant 0 : index
    %c5_195 = arith.constant 5 : index
    %c5_196 = arith.constant 5 : index
    %295 = vector.load %arg5[%c0_193, %c0_194, %c5_195, %c5_196] : memref<2x2x22x22xf32, #tpu.memory_space<vmem>>, vector<2x1x16x16xf32>
    %296 = vector.shape_cast %295 : vector<2x1x16x16xf32> to vector<2x16x16xf32>
    %297 = vector.broadcast %294 : f32 to vector<2x16x16xf32>
    %298 = arith.mulf %297, %296 : vector<2x16x16xf32>
    %299 = arith.addf %275, %298 : vector<2x16x16xf32>
    %c41 = arith.constant 41 : index
    %300 = memref.load %arg2[%c41] : memref<98xf32, #tpu.memory_space<smem>>
    %c0_197 = arith.constant 0 : index
    %c0_198 = arith.constant 0 : index
    %c5_199 = arith.constant 5 : index
    %c6_200 = arith.constant 6 : index
    %301 = vector.load %arg5[%c0_197, %c0_198, %c5_199, %c6_200] : memref<2x2x22x22xf32, #tpu.memory_space<vmem>>, vector<2x1x16x16xf32>
    %302 = vector.shape_cast %301 : vector<2x1x16x16xf32> to vector<2x16x16xf32>
    %303 = vector.broadcast %300 : f32 to vector<2x16x16xf32>
    %304 = arith.mulf %303, %302 : vector<2x16x16xf32>
    %305 = arith.addf %281, %304 : vector<2x16x16xf32>
    %c42 = arith.constant 42 : index
    %306 = memref.load %arg2[%c42] : memref<98xf32, #tpu.memory_space<smem>>
    %c0_201 = arith.constant 0 : index
    %c0_202 = arith.constant 0 : index
    %c6_203 = arith.constant 6 : index
    %c0_204 = arith.constant 0 : index
    %307 = vector.load %arg5[%c0_201, %c0_202, %c6_203, %c0_204] : memref<2x2x22x22xf32, #tpu.memory_space<vmem>>, vector<2x1x16x16xf32>
    %308 = vector.shape_cast %307 : vector<2x1x16x16xf32> to vector<2x16x16xf32>
    %309 = vector.broadcast %306 : f32 to vector<2x16x16xf32>
    %310 = arith.mulf %309, %308 : vector<2x16x16xf32>
    %311 = arith.addf %287, %310 : vector<2x16x16xf32>
    %c43 = arith.constant 43 : index
    %312 = memref.load %arg2[%c43] : memref<98xf32, #tpu.memory_space<smem>>
    %c0_205 = arith.constant 0 : index
    %c0_206 = arith.constant 0 : index
    %c6_207 = arith.constant 6 : index
    %c1_208 = arith.constant 1 : index
    %313 = vector.load %arg5[%c0_205, %c0_206, %c6_207, %c1_208] : memref<2x2x22x22xf32, #tpu.memory_space<vmem>>, vector<2x1x16x16xf32>
    %314 = vector.shape_cast %313 : vector<2x1x16x16xf32> to vector<2x16x16xf32>
    %315 = vector.broadcast %312 : f32 to vector<2x16x16xf32>
    %316 = arith.mulf %315, %314 : vector<2x16x16xf32>
    %317 = arith.addf %293, %316 : vector<2x16x16xf32>
    %c44 = arith.constant 44 : index
    %318 = memref.load %arg2[%c44] : memref<98xf32, #tpu.memory_space<smem>>
    %c0_209 = arith.constant 0 : index
    %c0_210 = arith.constant 0 : index
    %c6_211 = arith.constant 6 : index
    %c2_212 = arith.constant 2 : index
    %319 = vector.load %arg5[%c0_209, %c0_210, %c6_211, %c2_212] : memref<2x2x22x22xf32, #tpu.memory_space<vmem>>, vector<2x1x16x16xf32>
    %320 = vector.shape_cast %319 : vector<2x1x16x16xf32> to vector<2x16x16xf32>
    %321 = vector.broadcast %318 : f32 to vector<2x16x16xf32>
    %322 = arith.mulf %321, %320 : vector<2x16x16xf32>
    %323 = arith.addf %299, %322 : vector<2x16x16xf32>
    %c45 = arith.constant 45 : index
    %324 = memref.load %arg2[%c45] : memref<98xf32, #tpu.memory_space<smem>>
    %c0_213 = arith.constant 0 : index
    %c0_214 = arith.constant 0 : index
    %c6_215 = arith.constant 6 : index
    %c3_216 = arith.constant 3 : index
    %325 = vector.load %arg5[%c0_213, %c0_214, %c6_215, %c3_216] : memref<2x2x22x22xf32, #tpu.memory_space<vmem>>, vector<2x1x16x16xf32>
    %326 = vector.shape_cast %325 : vector<2x1x16x16xf32> to vector<2x16x16xf32>
    %327 = vector.broadcast %324 : f32 to vector<2x16x16xf32>
    %328 = arith.mulf %327, %326 : vector<2x16x16xf32>
    %329 = arith.addf %305, %328 : vector<2x16x16xf32>
    %c46 = arith.constant 46 : index
    %330 = memref.load %arg2[%c46] : memref<98xf32, #tpu.memory_space<smem>>
    %c0_217 = arith.constant 0 : index
    %c0_218 = arith.constant 0 : index
    %c6_219 = arith.constant 6 : index
    %c4_220 = arith.constant 4 : index
    %331 = vector.load %arg5[%c0_217, %c0_218, %c6_219, %c4_220] : memref<2x2x22x22xf32, #tpu.memory_space<vmem>>, vector<2x1x16x16xf32>
    %332 = vector.shape_cast %331 : vector<2x1x16x16xf32> to vector<2x16x16xf32>
    %333 = vector.broadcast %330 : f32 to vector<2x16x16xf32>
    %334 = arith.mulf %333, %332 : vector<2x16x16xf32>
    %335 = arith.addf %311, %334 : vector<2x16x16xf32>
    %c47 = arith.constant 47 : index
    %336 = memref.load %arg2[%c47] : memref<98xf32, #tpu.memory_space<smem>>
    %c0_221 = arith.constant 0 : index
    %c0_222 = arith.constant 0 : index
    %c6_223 = arith.constant 6 : index
    %c5_224 = arith.constant 5 : index
    %337 = vector.load %arg5[%c0_221, %c0_222, %c6_223, %c5_224] : memref<2x2x22x22xf32, #tpu.memory_space<vmem>>, vector<2x1x16x16xf32>
    %338 = vector.shape_cast %337 : vector<2x1x16x16xf32> to vector<2x16x16xf32>
    %339 = vector.broadcast %336 : f32 to vector<2x16x16xf32>
    %340 = arith.mulf %339, %338 : vector<2x16x16xf32>
    %341 = arith.addf %317, %340 : vector<2x16x16xf32>
    %c48 = arith.constant 48 : index
    %342 = memref.load %arg2[%c48] : memref<98xf32, #tpu.memory_space<smem>>
    %c0_225 = arith.constant 0 : index
    %c0_226 = arith.constant 0 : index
    %c6_227 = arith.constant 6 : index
    %c6_228 = arith.constant 6 : index
    %343 = vector.load %arg5[%c0_225, %c0_226, %c6_227, %c6_228] : memref<2x2x22x22xf32, #tpu.memory_space<vmem>>, vector<2x1x16x16xf32>
    %344 = vector.shape_cast %343 : vector<2x1x16x16xf32> to vector<2x16x16xf32>
    %345 = vector.broadcast %342 : f32 to vector<2x16x16xf32>
    %346 = arith.mulf %345, %344 : vector<2x16x16xf32>
    %347 = arith.addf %323, %346 : vector<2x16x16xf32>
    %c49 = arith.constant 49 : index
    %348 = memref.load %arg2[%c49] : memref<98xf32, #tpu.memory_space<smem>>
    %c0_229 = arith.constant 0 : index
    %c1_230 = arith.constant 1 : index
    %c0_231 = arith.constant 0 : index
    %c0_232 = arith.constant 0 : index
    %349 = vector.load %arg5[%c0_229, %c1_230, %c0_231, %c0_232] : memref<2x2x22x22xf32, #tpu.memory_space<vmem>>, vector<2x1x16x16xf32>
    %350 = vector.shape_cast %349 : vector<2x1x16x16xf32> to vector<2x16x16xf32>
    %351 = vector.broadcast %348 : f32 to vector<2x16x16xf32>
    %352 = arith.mulf %351, %350 : vector<2x16x16xf32>
    %353 = arith.addf %329, %352 : vector<2x16x16xf32>
    %c50 = arith.constant 50 : index
    %354 = memref.load %arg2[%c50] : memref<98xf32, #tpu.memory_space<smem>>
    %c0_233 = arith.constant 0 : index
    %c1_234 = arith.constant 1 : index
    %c0_235 = arith.constant 0 : index
    %c1_236 = arith.constant 1 : index
    %355 = vector.load %arg5[%c0_233, %c1_234, %c0_235, %c1_236] : memref<2x2x22x22xf32, #tpu.memory_space<vmem>>, vector<2x1x16x16xf32>
    %356 = vector.shape_cast %355 : vector<2x1x16x16xf32> to vector<2x16x16xf32>
    %357 = vector.broadcast %354 : f32 to vector<2x16x16xf32>
    %358 = arith.mulf %357, %356 : vector<2x16x16xf32>
    %359 = arith.addf %335, %358 : vector<2x16x16xf32>
    %c51 = arith.constant 51 : index
    %360 = memref.load %arg2[%c51] : memref<98xf32, #tpu.memory_space<smem>>
    %c0_237 = arith.constant 0 : index
    %c1_238 = arith.constant 1 : index
    %c0_239 = arith.constant 0 : index
    %c2_240 = arith.constant 2 : index
    %361 = vector.load %arg5[%c0_237, %c1_238, %c0_239, %c2_240] : memref<2x2x22x22xf32, #tpu.memory_space<vmem>>, vector<2x1x16x16xf32>
    %362 = vector.shape_cast %361 : vector<2x1x16x16xf32> to vector<2x16x16xf32>
    %363 = vector.broadcast %360 : f32 to vector<2x16x16xf32>
    %364 = arith.mulf %363, %362 : vector<2x16x16xf32>
    %365 = arith.addf %341, %364 : vector<2x16x16xf32>
    %c52 = arith.constant 52 : index
    %366 = memref.load %arg2[%c52] : memref<98xf32, #tpu.memory_space<smem>>
    %c0_241 = arith.constant 0 : index
    %c1_242 = arith.constant 1 : index
    %c0_243 = arith.constant 0 : index
    %c3_244 = arith.constant 3 : index
    %367 = vector.load %arg5[%c0_241, %c1_242, %c0_243, %c3_244] : memref<2x2x22x22xf32, #tpu.memory_space<vmem>>, vector<2x1x16x16xf32>
    %368 = vector.shape_cast %367 : vector<2x1x16x16xf32> to vector<2x16x16xf32>
    %369 = vector.broadcast %366 : f32 to vector<2x16x16xf32>
    %370 = arith.mulf %369, %368 : vector<2x16x16xf32>
    %371 = arith.addf %347, %370 : vector<2x16x16xf32>
    %c53 = arith.constant 53 : index
    %372 = memref.load %arg2[%c53] : memref<98xf32, #tpu.memory_space<smem>>
    %c0_245 = arith.constant 0 : index
    %c1_246 = arith.constant 1 : index
    %c0_247 = arith.constant 0 : index
    %c4_248 = arith.constant 4 : index
    %373 = vector.load %arg5[%c0_245, %c1_246, %c0_247, %c4_248] : memref<2x2x22x22xf32, #tpu.memory_space<vmem>>, vector<2x1x16x16xf32>
    %374 = vector.shape_cast %373 : vector<2x1x16x16xf32> to vector<2x16x16xf32>
    %375 = vector.broadcast %372 : f32 to vector<2x16x16xf32>
    %376 = arith.mulf %375, %374 : vector<2x16x16xf32>
    %377 = arith.addf %353, %376 : vector<2x16x16xf32>
    %c54 = arith.constant 54 : index
    %378 = memref.load %arg2[%c54] : memref<98xf32, #tpu.memory_space<smem>>
    %c0_249 = arith.constant 0 : index
    %c1_250 = arith.constant 1 : index
    %c0_251 = arith.constant 0 : index
    %c5_252 = arith.constant 5 : index
    %379 = vector.load %arg5[%c0_249, %c1_250, %c0_251, %c5_252] : memref<2x2x22x22xf32, #tpu.memory_space<vmem>>, vector<2x1x16x16xf32>
    %380 = vector.shape_cast %379 : vector<2x1x16x16xf32> to vector<2x16x16xf32>
    %381 = vector.broadcast %378 : f32 to vector<2x16x16xf32>
    %382 = arith.mulf %381, %380 : vector<2x16x16xf32>
    %383 = arith.addf %359, %382 : vector<2x16x16xf32>
    %c55 = arith.constant 55 : index
    %384 = memref.load %arg2[%c55] : memref<98xf32, #tpu.memory_space<smem>>
    %c0_253 = arith.constant 0 : index
    %c1_254 = arith.constant 1 : index
    %c0_255 = arith.constant 0 : index
    %c6_256 = arith.constant 6 : index
    %385 = vector.load %arg5[%c0_253, %c1_254, %c0_255, %c6_256] : memref<2x2x22x22xf32, #tpu.memory_space<vmem>>, vector<2x1x16x16xf32>
    %386 = vector.shape_cast %385 : vector<2x1x16x16xf32> to vector<2x16x16xf32>
    %387 = vector.broadcast %384 : f32 to vector<2x16x16xf32>
    %388 = arith.mulf %387, %386 : vector<2x16x16xf32>
    %389 = arith.addf %365, %388 : vector<2x16x16xf32>
    %c56 = arith.constant 56 : index
    %390 = memref.load %arg2[%c56] : memref<98xf32, #tpu.memory_space<smem>>
    %c0_257 = arith.constant 0 : index
    %c1_258 = arith.constant 1 : index
    %c1_259 = arith.constant 1 : index
    %c0_260 = arith.constant 0 : index
    %391 = vector.load %arg5[%c0_257, %c1_258, %c1_259, %c0_260] : memref<2x2x22x22xf32, #tpu.memory_space<vmem>>, vector<2x1x16x16xf32>
    %392 = vector.shape_cast %391 : vector<2x1x16x16xf32> to vector<2x16x16xf32>
    %393 = vector.broadcast %390 : f32 to vector<2x16x16xf32>
    %394 = arith.mulf %393, %392 : vector<2x16x16xf32>
    %395 = arith.addf %371, %394 : vector<2x16x16xf32>
    %c57 = arith.constant 57 : index
    %396 = memref.load %arg2[%c57] : memref<98xf32, #tpu.memory_space<smem>>
    %c0_261 = arith.constant 0 : index
    %c1_262 = arith.constant 1 : index
    %c1_263 = arith.constant 1 : index
    %c1_264 = arith.constant 1 : index
    %397 = vector.load %arg5[%c0_261, %c1_262, %c1_263, %c1_264] : memref<2x2x22x22xf32, #tpu.memory_space<vmem>>, vector<2x1x16x16xf32>
    %398 = vector.shape_cast %397 : vector<2x1x16x16xf32> to vector<2x16x16xf32>
    %399 = vector.broadcast %396 : f32 to vector<2x16x16xf32>
    %400 = arith.mulf %399, %398 : vector<2x16x16xf32>
    %401 = arith.addf %377, %400 : vector<2x16x16xf32>
    %c58 = arith.constant 58 : index
    %402 = memref.load %arg2[%c58] : memref<98xf32, #tpu.memory_space<smem>>
    %c0_265 = arith.constant 0 : index
    %c1_266 = arith.constant 1 : index
    %c1_267 = arith.constant 1 : index
    %c2_268 = arith.constant 2 : index
    %403 = vector.load %arg5[%c0_265, %c1_266, %c1_267, %c2_268] : memref<2x2x22x22xf32, #tpu.memory_space<vmem>>, vector<2x1x16x16xf32>
    %404 = vector.shape_cast %403 : vector<2x1x16x16xf32> to vector<2x16x16xf32>
    %405 = vector.broadcast %402 : f32 to vector<2x16x16xf32>
    %406 = arith.mulf %405, %404 : vector<2x16x16xf32>
    %407 = arith.addf %383, %406 : vector<2x16x16xf32>
    %c59 = arith.constant 59 : index
    %408 = memref.load %arg2[%c59] : memref<98xf32, #tpu.memory_space<smem>>
    %c0_269 = arith.constant 0 : index
    %c1_270 = arith.constant 1 : index
    %c1_271 = arith.constant 1 : index
    %c3_272 = arith.constant 3 : index
    %409 = vector.load %arg5[%c0_269, %c1_270, %c1_271, %c3_272] : memref<2x2x22x22xf32, #tpu.memory_space<vmem>>, vector<2x1x16x16xf32>
    %410 = vector.shape_cast %409 : vector<2x1x16x16xf32> to vector<2x16x16xf32>
    %411 = vector.broadcast %408 : f32 to vector<2x16x16xf32>
    %412 = arith.mulf %411, %410 : vector<2x16x16xf32>
    %413 = arith.addf %389, %412 : vector<2x16x16xf32>
    %c60 = arith.constant 60 : index
    %414 = memref.load %arg2[%c60] : memref<98xf32, #tpu.memory_space<smem>>
    %c0_273 = arith.constant 0 : index
    %c1_274 = arith.constant 1 : index
    %c1_275 = arith.constant 1 : index
    %c4_276 = arith.constant 4 : index
    %415 = vector.load %arg5[%c0_273, %c1_274, %c1_275, %c4_276] : memref<2x2x22x22xf32, #tpu.memory_space<vmem>>, vector<2x1x16x16xf32>
    %416 = vector.shape_cast %415 : vector<2x1x16x16xf32> to vector<2x16x16xf32>
    %417 = vector.broadcast %414 : f32 to vector<2x16x16xf32>
    %418 = arith.mulf %417, %416 : vector<2x16x16xf32>
    %419 = arith.addf %395, %418 : vector<2x16x16xf32>
    %c61 = arith.constant 61 : index
    %420 = memref.load %arg2[%c61] : memref<98xf32, #tpu.memory_space<smem>>
    %c0_277 = arith.constant 0 : index
    %c1_278 = arith.constant 1 : index
    %c1_279 = arith.constant 1 : index
    %c5_280 = arith.constant 5 : index
    %421 = vector.load %arg5[%c0_277, %c1_278, %c1_279, %c5_280] : memref<2x2x22x22xf32, #tpu.memory_space<vmem>>, vector<2x1x16x16xf32>
    %422 = vector.shape_cast %421 : vector<2x1x16x16xf32> to vector<2x16x16xf32>
    %423 = vector.broadcast %420 : f32 to vector<2x16x16xf32>
    %424 = arith.mulf %423, %422 : vector<2x16x16xf32>
    %425 = arith.addf %401, %424 : vector<2x16x16xf32>
    %c62 = arith.constant 62 : index
    %426 = memref.load %arg2[%c62] : memref<98xf32, #tpu.memory_space<smem>>
    %c0_281 = arith.constant 0 : index
    %c1_282 = arith.constant 1 : index
    %c1_283 = arith.constant 1 : index
    %c6_284 = arith.constant 6 : index
    %427 = vector.load %arg5[%c0_281, %c1_282, %c1_283, %c6_284] : memref<2x2x22x22xf32, #tpu.memory_space<vmem>>, vector<2x1x16x16xf32>
    %428 = vector.shape_cast %427 : vector<2x1x16x16xf32> to vector<2x16x16xf32>
    %429 = vector.broadcast %426 : f32 to vector<2x16x16xf32>
    %430 = arith.mulf %429, %428 : vector<2x16x16xf32>
    %431 = arith.addf %407, %430 : vector<2x16x16xf32>
    %c63 = arith.constant 63 : index
    %432 = memref.load %arg2[%c63] : memref<98xf32, #tpu.memory_space<smem>>
    %c0_285 = arith.constant 0 : index
    %c1_286 = arith.constant 1 : index
    %c2_287 = arith.constant 2 : index
    %c0_288 = arith.constant 0 : index
    %433 = vector.load %arg5[%c0_285, %c1_286, %c2_287, %c0_288] : memref<2x2x22x22xf32, #tpu.memory_space<vmem>>, vector<2x1x16x16xf32>
    %434 = vector.shape_cast %433 : vector<2x1x16x16xf32> to vector<2x16x16xf32>
    %435 = vector.broadcast %432 : f32 to vector<2x16x16xf32>
    %436 = arith.mulf %435, %434 : vector<2x16x16xf32>
    %437 = arith.addf %413, %436 : vector<2x16x16xf32>
    %c64 = arith.constant 64 : index
    %438 = memref.load %arg2[%c64] : memref<98xf32, #tpu.memory_space<smem>>
    %c0_289 = arith.constant 0 : index
    %c1_290 = arith.constant 1 : index
    %c2_291 = arith.constant 2 : index
    %c1_292 = arith.constant 1 : index
    %439 = vector.load %arg5[%c0_289, %c1_290, %c2_291, %c1_292] : memref<2x2x22x22xf32, #tpu.memory_space<vmem>>, vector<2x1x16x16xf32>
    %440 = vector.shape_cast %439 : vector<2x1x16x16xf32> to vector<2x16x16xf32>
    %441 = vector.broadcast %438 : f32 to vector<2x16x16xf32>
    %442 = arith.mulf %441, %440 : vector<2x16x16xf32>
    %443 = arith.addf %419, %442 : vector<2x16x16xf32>
    %c65 = arith.constant 65 : index
    %444 = memref.load %arg2[%c65] : memref<98xf32, #tpu.memory_space<smem>>
    %c0_293 = arith.constant 0 : index
    %c1_294 = arith.constant 1 : index
    %c2_295 = arith.constant 2 : index
    %c2_296 = arith.constant 2 : index
    %445 = vector.load %arg5[%c0_293, %c1_294, %c2_295, %c2_296] : memref<2x2x22x22xf32, #tpu.memory_space<vmem>>, vector<2x1x16x16xf32>
    %446 = vector.shape_cast %445 : vector<2x1x16x16xf32> to vector<2x16x16xf32>
    %447 = vector.broadcast %444 : f32 to vector<2x16x16xf32>
    %448 = arith.mulf %447, %446 : vector<2x16x16xf32>
    %449 = arith.addf %425, %448 : vector<2x16x16xf32>
    %c66 = arith.constant 66 : index
    %450 = memref.load %arg2[%c66] : memref<98xf32, #tpu.memory_space<smem>>
    %c0_297 = arith.constant 0 : index
    %c1_298 = arith.constant 1 : index
    %c2_299 = arith.constant 2 : index
    %c3_300 = arith.constant 3 : index
    %451 = vector.load %arg5[%c0_297, %c1_298, %c2_299, %c3_300] : memref<2x2x22x22xf32, #tpu.memory_space<vmem>>, vector<2x1x16x16xf32>
    %452 = vector.shape_cast %451 : vector<2x1x16x16xf32> to vector<2x16x16xf32>
    %453 = vector.broadcast %450 : f32 to vector<2x16x16xf32>
    %454 = arith.mulf %453, %452 : vector<2x16x16xf32>
    %455 = arith.addf %431, %454 : vector<2x16x16xf32>
    %c67 = arith.constant 67 : index
    %456 = memref.load %arg2[%c67] : memref<98xf32, #tpu.memory_space<smem>>
    %c0_301 = arith.constant 0 : index
    %c1_302 = arith.constant 1 : index
    %c2_303 = arith.constant 2 : index
    %c4_304 = arith.constant 4 : index
    %457 = vector.load %arg5[%c0_301, %c1_302, %c2_303, %c4_304] : memref<2x2x22x22xf32, #tpu.memory_space<vmem>>, vector<2x1x16x16xf32>
    %458 = vector.shape_cast %457 : vector<2x1x16x16xf32> to vector<2x16x16xf32>
    %459 = vector.broadcast %456 : f32 to vector<2x16x16xf32>
    %460 = arith.mulf %459, %458 : vector<2x16x16xf32>
    %461 = arith.addf %437, %460 : vector<2x16x16xf32>
    %c68 = arith.constant 68 : index
    %462 = memref.load %arg2[%c68] : memref<98xf32, #tpu.memory_space<smem>>
    %c0_305 = arith.constant 0 : index
    %c1_306 = arith.constant 1 : index
    %c2_307 = arith.constant 2 : index
    %c5_308 = arith.constant 5 : index
    %463 = vector.load %arg5[%c0_305, %c1_306, %c2_307, %c5_308] : memref<2x2x22x22xf32, #tpu.memory_space<vmem>>, vector<2x1x16x16xf32>
    %464 = vector.shape_cast %463 : vector<2x1x16x16xf32> to vector<2x16x16xf32>
    %465 = vector.broadcast %462 : f32 to vector<2x16x16xf32>
    %466 = arith.mulf %465, %464 : vector<2x16x16xf32>
    %467 = arith.addf %443, %466 : vector<2x16x16xf32>
    %c69 = arith.constant 69 : index
    %468 = memref.load %arg2[%c69] : memref<98xf32, #tpu.memory_space<smem>>
    %c0_309 = arith.constant 0 : index
    %c1_310 = arith.constant 1 : index
    %c2_311 = arith.constant 2 : index
    %c6_312 = arith.constant 6 : index
    %469 = vector.load %arg5[%c0_309, %c1_310, %c2_311, %c6_312] : memref<2x2x22x22xf32, #tpu.memory_space<vmem>>, vector<2x1x16x16xf32>
    %470 = vector.shape_cast %469 : vector<2x1x16x16xf32> to vector<2x16x16xf32>
    %471 = vector.broadcast %468 : f32 to vector<2x16x16xf32>
    %472 = arith.mulf %471, %470 : vector<2x16x16xf32>
    %473 = arith.addf %449, %472 : vector<2x16x16xf32>
    %c70 = arith.constant 70 : index
    %474 = memref.load %arg2[%c70] : memref<98xf32, #tpu.memory_space<smem>>
    %c0_313 = arith.constant 0 : index
    %c1_314 = arith.constant 1 : index
    %c3_315 = arith.constant 3 : index
    %c0_316 = arith.constant 0 : index
    %475 = vector.load %arg5[%c0_313, %c1_314, %c3_315, %c0_316] : memref<2x2x22x22xf32, #tpu.memory_space<vmem>>, vector<2x1x16x16xf32>
    %476 = vector.shape_cast %475 : vector<2x1x16x16xf32> to vector<2x16x16xf32>
    %477 = vector.broadcast %474 : f32 to vector<2x16x16xf32>
    %478 = arith.mulf %477, %476 : vector<2x16x16xf32>
    %479 = arith.addf %455, %478 : vector<2x16x16xf32>
    %c71 = arith.constant 71 : index
    %480 = memref.load %arg2[%c71] : memref<98xf32, #tpu.memory_space<smem>>
    %c0_317 = arith.constant 0 : index
    %c1_318 = arith.constant 1 : index
    %c3_319 = arith.constant 3 : index
    %c1_320 = arith.constant 1 : index
    %481 = vector.load %arg5[%c0_317, %c1_318, %c3_319, %c1_320] : memref<2x2x22x22xf32, #tpu.memory_space<vmem>>, vector<2x1x16x16xf32>
    %482 = vector.shape_cast %481 : vector<2x1x16x16xf32> to vector<2x16x16xf32>
    %483 = vector.broadcast %480 : f32 to vector<2x16x16xf32>
    %484 = arith.mulf %483, %482 : vector<2x16x16xf32>
    %485 = arith.addf %461, %484 : vector<2x16x16xf32>
    %c72 = arith.constant 72 : index
    %486 = memref.load %arg2[%c72] : memref<98xf32, #tpu.memory_space<smem>>
    %c0_321 = arith.constant 0 : index
    %c1_322 = arith.constant 1 : index
    %c3_323 = arith.constant 3 : index
    %c2_324 = arith.constant 2 : index
    %487 = vector.load %arg5[%c0_321, %c1_322, %c3_323, %c2_324] : memref<2x2x22x22xf32, #tpu.memory_space<vmem>>, vector<2x1x16x16xf32>
    %488 = vector.shape_cast %487 : vector<2x1x16x16xf32> to vector<2x16x16xf32>
    %489 = vector.broadcast %486 : f32 to vector<2x16x16xf32>
    %490 = arith.mulf %489, %488 : vector<2x16x16xf32>
    %491 = arith.addf %467, %490 : vector<2x16x16xf32>
    %c73 = arith.constant 73 : index
    %492 = memref.load %arg2[%c73] : memref<98xf32, #tpu.memory_space<smem>>
    %c0_325 = arith.constant 0 : index
    %c1_326 = arith.constant 1 : index
    %c3_327 = arith.constant 3 : index
    %c3_328 = arith.constant 3 : index
    %493 = vector.load %arg5[%c0_325, %c1_326, %c3_327, %c3_328] : memref<2x2x22x22xf32, #tpu.memory_space<vmem>>, vector<2x1x16x16xf32>
    %494 = vector.shape_cast %493 : vector<2x1x16x16xf32> to vector<2x16x16xf32>
    %495 = vector.broadcast %492 : f32 to vector<2x16x16xf32>
    %496 = arith.mulf %495, %494 : vector<2x16x16xf32>
    %497 = arith.addf %473, %496 : vector<2x16x16xf32>
    %c74 = arith.constant 74 : index
    %498 = memref.load %arg2[%c74] : memref<98xf32, #tpu.memory_space<smem>>
    %c0_329 = arith.constant 0 : index
    %c1_330 = arith.constant 1 : index
    %c3_331 = arith.constant 3 : index
    %c4_332 = arith.constant 4 : index
    %499 = vector.load %arg5[%c0_329, %c1_330, %c3_331, %c4_332] : memref<2x2x22x22xf32, #tpu.memory_space<vmem>>, vector<2x1x16x16xf32>
    %500 = vector.shape_cast %499 : vector<2x1x16x16xf32> to vector<2x16x16xf32>
    %501 = vector.broadcast %498 : f32 to vector<2x16x16xf32>
    %502 = arith.mulf %501, %500 : vector<2x16x16xf32>
    %503 = arith.addf %479, %502 : vector<2x16x16xf32>
    %c75 = arith.constant 75 : index
    %504 = memref.load %arg2[%c75] : memref<98xf32, #tpu.memory_space<smem>>
    %c0_333 = arith.constant 0 : index
    %c1_334 = arith.constant 1 : index
    %c3_335 = arith.constant 3 : index
    %c5_336 = arith.constant 5 : index
    %505 = vector.load %arg5[%c0_333, %c1_334, %c3_335, %c5_336] : memref<2x2x22x22xf32, #tpu.memory_space<vmem>>, vector<2x1x16x16xf32>
    %506 = vector.shape_cast %505 : vector<2x1x16x16xf32> to vector<2x16x16xf32>
    %507 = vector.broadcast %504 : f32 to vector<2x16x16xf32>
    %508 = arith.mulf %507, %506 : vector<2x16x16xf32>
    %509 = arith.addf %485, %508 : vector<2x16x16xf32>
    %c76 = arith.constant 76 : index
    %510 = memref.load %arg2[%c76] : memref<98xf32, #tpu.memory_space<smem>>
    %c0_337 = arith.constant 0 : index
    %c1_338 = arith.constant 1 : index
    %c3_339 = arith.constant 3 : index
    %c6_340 = arith.constant 6 : index
    %511 = vector.load %arg5[%c0_337, %c1_338, %c3_339, %c6_340] : memref<2x2x22x22xf32, #tpu.memory_space<vmem>>, vector<2x1x16x16xf32>
    %512 = vector.shape_cast %511 : vector<2x1x16x16xf32> to vector<2x16x16xf32>
    %513 = vector.broadcast %510 : f32 to vector<2x16x16xf32>
    %514 = arith.mulf %513, %512 : vector<2x16x16xf32>
    %515 = arith.addf %491, %514 : vector<2x16x16xf32>
    %c77 = arith.constant 77 : index
    %516 = memref.load %arg2[%c77] : memref<98xf32, #tpu.memory_space<smem>>
    %c0_341 = arith.constant 0 : index
    %c1_342 = arith.constant 1 : index
    %c4_343 = arith.constant 4 : index
    %c0_344 = arith.constant 0 : index
    %517 = vector.load %arg5[%c0_341, %c1_342, %c4_343, %c0_344] : memref<2x2x22x22xf32, #tpu.memory_space<vmem>>, vector<2x1x16x16xf32>
    %518 = vector.shape_cast %517 : vector<2x1x16x16xf32> to vector<2x16x16xf32>
    %519 = vector.broadcast %516 : f32 to vector<2x16x16xf32>
    %520 = arith.mulf %519, %518 : vector<2x16x16xf32>
    %521 = arith.addf %497, %520 : vector<2x16x16xf32>
    %c78 = arith.constant 78 : index
    %522 = memref.load %arg2[%c78] : memref<98xf32, #tpu.memory_space<smem>>
    %c0_345 = arith.constant 0 : index
    %c1_346 = arith.constant 1 : index
    %c4_347 = arith.constant 4 : index
    %c1_348 = arith.constant 1 : index
    %523 = vector.load %arg5[%c0_345, %c1_346, %c4_347, %c1_348] : memref<2x2x22x22xf32, #tpu.memory_space<vmem>>, vector<2x1x16x16xf32>
    %524 = vector.shape_cast %523 : vector<2x1x16x16xf32> to vector<2x16x16xf32>
    %525 = vector.broadcast %522 : f32 to vector<2x16x16xf32>
    %526 = arith.mulf %525, %524 : vector<2x16x16xf32>
    %527 = arith.addf %503, %526 : vector<2x16x16xf32>
    %c79 = arith.constant 79 : index
    %528 = memref.load %arg2[%c79] : memref<98xf32, #tpu.memory_space<smem>>
    %c0_349 = arith.constant 0 : index
    %c1_350 = arith.constant 1 : index
    %c4_351 = arith.constant 4 : index
    %c2_352 = arith.constant 2 : index
    %529 = vector.load %arg5[%c0_349, %c1_350, %c4_351, %c2_352] : memref<2x2x22x22xf32, #tpu.memory_space<vmem>>, vector<2x1x16x16xf32>
    %530 = vector.shape_cast %529 : vector<2x1x16x16xf32> to vector<2x16x16xf32>
    %531 = vector.broadcast %528 : f32 to vector<2x16x16xf32>
    %532 = arith.mulf %531, %530 : vector<2x16x16xf32>
    %533 = arith.addf %509, %532 : vector<2x16x16xf32>
    %c80 = arith.constant 80 : index
    %534 = memref.load %arg2[%c80] : memref<98xf32, #tpu.memory_space<smem>>
    %c0_353 = arith.constant 0 : index
    %c1_354 = arith.constant 1 : index
    %c4_355 = arith.constant 4 : index
    %c3_356 = arith.constant 3 : index
    %535 = vector.load %arg5[%c0_353, %c1_354, %c4_355, %c3_356] : memref<2x2x22x22xf32, #tpu.memory_space<vmem>>, vector<2x1x16x16xf32>
    %536 = vector.shape_cast %535 : vector<2x1x16x16xf32> to vector<2x16x16xf32>
    %537 = vector.broadcast %534 : f32 to vector<2x16x16xf32>
    %538 = arith.mulf %537, %536 : vector<2x16x16xf32>
    %539 = arith.addf %515, %538 : vector<2x16x16xf32>
    %c81 = arith.constant 81 : index
    %540 = memref.load %arg2[%c81] : memref<98xf32, #tpu.memory_space<smem>>
    %c0_357 = arith.constant 0 : index
    %c1_358 = arith.constant 1 : index
    %c4_359 = arith.constant 4 : index
    %c4_360 = arith.constant 4 : index
    %541 = vector.load %arg5[%c0_357, %c1_358, %c4_359, %c4_360] : memref<2x2x22x22xf32, #tpu.memory_space<vmem>>, vector<2x1x16x16xf32>
    %542 = vector.shape_cast %541 : vector<2x1x16x16xf32> to vector<2x16x16xf32>
    %543 = vector.broadcast %540 : f32 to vector<2x16x16xf32>
    %544 = arith.mulf %543, %542 : vector<2x16x16xf32>
    %545 = arith.addf %521, %544 : vector<2x16x16xf32>
    %c82 = arith.constant 82 : index
    %546 = memref.load %arg2[%c82] : memref<98xf32, #tpu.memory_space<smem>>
    %c0_361 = arith.constant 0 : index
    %c1_362 = arith.constant 1 : index
    %c4_363 = arith.constant 4 : index
    %c5_364 = arith.constant 5 : index
    %547 = vector.load %arg5[%c0_361, %c1_362, %c4_363, %c5_364] : memref<2x2x22x22xf32, #tpu.memory_space<vmem>>, vector<2x1x16x16xf32>
    %548 = vector.shape_cast %547 : vector<2x1x16x16xf32> to vector<2x16x16xf32>
    %549 = vector.broadcast %546 : f32 to vector<2x16x16xf32>
    %550 = arith.mulf %549, %548 : vector<2x16x16xf32>
    %551 = arith.addf %527, %550 : vector<2x16x16xf32>
    %c83 = arith.constant 83 : index
    %552 = memref.load %arg2[%c83] : memref<98xf32, #tpu.memory_space<smem>>
    %c0_365 = arith.constant 0 : index
    %c1_366 = arith.constant 1 : index
    %c4_367 = arith.constant 4 : index
    %c6_368 = arith.constant 6 : index
    %553 = vector.load %arg5[%c0_365, %c1_366, %c4_367, %c6_368] : memref<2x2x22x22xf32, #tpu.memory_space<vmem>>, vector<2x1x16x16xf32>
    %554 = vector.shape_cast %553 : vector<2x1x16x16xf32> to vector<2x16x16xf32>
    %555 = vector.broadcast %552 : f32 to vector<2x16x16xf32>
    %556 = arith.mulf %555, %554 : vector<2x16x16xf32>
    %557 = arith.addf %533, %556 : vector<2x16x16xf32>
    %c84 = arith.constant 84 : index
    %558 = memref.load %arg2[%c84] : memref<98xf32, #tpu.memory_space<smem>>
    %c0_369 = arith.constant 0 : index
    %c1_370 = arith.constant 1 : index
    %c5_371 = arith.constant 5 : index
    %c0_372 = arith.constant 0 : index
    %559 = vector.load %arg5[%c0_369, %c1_370, %c5_371, %c0_372] : memref<2x2x22x22xf32, #tpu.memory_space<vmem>>, vector<2x1x16x16xf32>
    %560 = vector.shape_cast %559 : vector<2x1x16x16xf32> to vector<2x16x16xf32>
    %561 = vector.broadcast %558 : f32 to vector<2x16x16xf32>
    %562 = arith.mulf %561, %560 : vector<2x16x16xf32>
    %563 = arith.addf %539, %562 : vector<2x16x16xf32>
    %c85 = arith.constant 85 : index
    %564 = memref.load %arg2[%c85] : memref<98xf32, #tpu.memory_space<smem>>
    %c0_373 = arith.constant 0 : index
    %c1_374 = arith.constant 1 : index
    %c5_375 = arith.constant 5 : index
    %c1_376 = arith.constant 1 : index
    %565 = vector.load %arg5[%c0_373, %c1_374, %c5_375, %c1_376] : memref<2x2x22x22xf32, #tpu.memory_space<vmem>>, vector<2x1x16x16xf32>
    %566 = vector.shape_cast %565 : vector<2x1x16x16xf32> to vector<2x16x16xf32>
    %567 = vector.broadcast %564 : f32 to vector<2x16x16xf32>
    %568 = arith.mulf %567, %566 : vector<2x16x16xf32>
    %569 = arith.addf %545, %568 : vector<2x16x16xf32>
    %c86 = arith.constant 86 : index
    %570 = memref.load %arg2[%c86] : memref<98xf32, #tpu.memory_space<smem>>
    %c0_377 = arith.constant 0 : index
    %c1_378 = arith.constant 1 : index
    %c5_379 = arith.constant 5 : index
    %c2_380 = arith.constant 2 : index
    %571 = vector.load %arg5[%c0_377, %c1_378, %c5_379, %c2_380] : memref<2x2x22x22xf32, #tpu.memory_space<vmem>>, vector<2x1x16x16xf32>
    %572 = vector.shape_cast %571 : vector<2x1x16x16xf32> to vector<2x16x16xf32>
    %573 = vector.broadcast %570 : f32 to vector<2x16x16xf32>
    %574 = arith.mulf %573, %572 : vector<2x16x16xf32>
    %575 = arith.addf %551, %574 : vector<2x16x16xf32>
    %c87 = arith.constant 87 : index
    %576 = memref.load %arg2[%c87] : memref<98xf32, #tpu.memory_space<smem>>
    %c0_381 = arith.constant 0 : index
    %c1_382 = arith.constant 1 : index
    %c5_383 = arith.constant 5 : index
    %c3_384 = arith.constant 3 : index
    %577 = vector.load %arg5[%c0_381, %c1_382, %c5_383, %c3_384] : memref<2x2x22x22xf32, #tpu.memory_space<vmem>>, vector<2x1x16x16xf32>
    %578 = vector.shape_cast %577 : vector<2x1x16x16xf32> to vector<2x16x16xf32>
    %579 = vector.broadcast %576 : f32 to vector<2x16x16xf32>
    %580 = arith.mulf %579, %578 : vector<2x16x16xf32>
    %581 = arith.addf %557, %580 : vector<2x16x16xf32>
    %c88 = arith.constant 88 : index
    %582 = memref.load %arg2[%c88] : memref<98xf32, #tpu.memory_space<smem>>
    %c0_385 = arith.constant 0 : index
    %c1_386 = arith.constant 1 : index
    %c5_387 = arith.constant 5 : index
    %c4_388 = arith.constant 4 : index
    %583 = vector.load %arg5[%c0_385, %c1_386, %c5_387, %c4_388] : memref<2x2x22x22xf32, #tpu.memory_space<vmem>>, vector<2x1x16x16xf32>
    %584 = vector.shape_cast %583 : vector<2x1x16x16xf32> to vector<2x16x16xf32>
    %585 = vector.broadcast %582 : f32 to vector<2x16x16xf32>
    %586 = arith.mulf %585, %584 : vector<2x16x16xf32>
    %587 = arith.addf %563, %586 : vector<2x16x16xf32>
    %c89 = arith.constant 89 : index
    %588 = memref.load %arg2[%c89] : memref<98xf32, #tpu.memory_space<smem>>
    %c0_389 = arith.constant 0 : index
    %c1_390 = arith.constant 1 : index
    %c5_391 = arith.constant 5 : index
    %c5_392 = arith.constant 5 : index
    %589 = vector.load %arg5[%c0_389, %c1_390, %c5_391, %c5_392] : memref<2x2x22x22xf32, #tpu.memory_space<vmem>>, vector<2x1x16x16xf32>
    %590 = vector.shape_cast %589 : vector<2x1x16x16xf32> to vector<2x16x16xf32>
    %591 = vector.broadcast %588 : f32 to vector<2x16x16xf32>
    %592 = arith.mulf %591, %590 : vector<2x16x16xf32>
    %593 = arith.addf %569, %592 : vector<2x16x16xf32>
    %c90 = arith.constant 90 : index
    %594 = memref.load %arg2[%c90] : memref<98xf32, #tpu.memory_space<smem>>
    %c0_393 = arith.constant 0 : index
    %c1_394 = arith.constant 1 : index
    %c5_395 = arith.constant 5 : index
    %c6_396 = arith.constant 6 : index
    %595 = vector.load %arg5[%c0_393, %c1_394, %c5_395, %c6_396] : memref<2x2x22x22xf32, #tpu.memory_space<vmem>>, vector<2x1x16x16xf32>
    %596 = vector.shape_cast %595 : vector<2x1x16x16xf32> to vector<2x16x16xf32>
    %597 = vector.broadcast %594 : f32 to vector<2x16x16xf32>
    %598 = arith.mulf %597, %596 : vector<2x16x16xf32>
    %599 = arith.addf %575, %598 : vector<2x16x16xf32>
    %c91 = arith.constant 91 : index
    %600 = memref.load %arg2[%c91] : memref<98xf32, #tpu.memory_space<smem>>
    %c0_397 = arith.constant 0 : index
    %c1_398 = arith.constant 1 : index
    %c6_399 = arith.constant 6 : index
    %c0_400 = arith.constant 0 : index
    %601 = vector.load %arg5[%c0_397, %c1_398, %c6_399, %c0_400] : memref<2x2x22x22xf32, #tpu.memory_space<vmem>>, vector<2x1x16x16xf32>
    %602 = vector.shape_cast %601 : vector<2x1x16x16xf32> to vector<2x16x16xf32>
    %603 = vector.broadcast %600 : f32 to vector<2x16x16xf32>
    %604 = arith.mulf %603, %602 : vector<2x16x16xf32>
    %605 = arith.addf %581, %604 : vector<2x16x16xf32>
    %c92 = arith.constant 92 : index
    %606 = memref.load %arg2[%c92] : memref<98xf32, #tpu.memory_space<smem>>
    %c0_401 = arith.constant 0 : index
    %c1_402 = arith.constant 1 : index
    %c6_403 = arith.constant 6 : index
    %c1_404 = arith.constant 1 : index
    %607 = vector.load %arg5[%c0_401, %c1_402, %c6_403, %c1_404] : memref<2x2x22x22xf32, #tpu.memory_space<vmem>>, vector<2x1x16x16xf32>
    %608 = vector.shape_cast %607 : vector<2x1x16x16xf32> to vector<2x16x16xf32>
    %609 = vector.broadcast %606 : f32 to vector<2x16x16xf32>
    %610 = arith.mulf %609, %608 : vector<2x16x16xf32>
    %611 = arith.addf %587, %610 : vector<2x16x16xf32>
    %c93 = arith.constant 93 : index
    %612 = memref.load %arg2[%c93] : memref<98xf32, #tpu.memory_space<smem>>
    %c0_405 = arith.constant 0 : index
    %c1_406 = arith.constant 1 : index
    %c6_407 = arith.constant 6 : index
    %c2_408 = arith.constant 2 : index
    %613 = vector.load %arg5[%c0_405, %c1_406, %c6_407, %c2_408] : memref<2x2x22x22xf32, #tpu.memory_space<vmem>>, vector<2x1x16x16xf32>
    %614 = vector.shape_cast %613 : vector<2x1x16x16xf32> to vector<2x16x16xf32>
    %615 = vector.broadcast %612 : f32 to vector<2x16x16xf32>
    %616 = arith.mulf %615, %614 : vector<2x16x16xf32>
    %617 = arith.addf %593, %616 : vector<2x16x16xf32>
    %c94 = arith.constant 94 : index
    %618 = memref.load %arg2[%c94] : memref<98xf32, #tpu.memory_space<smem>>
    %c0_409 = arith.constant 0 : index
    %c1_410 = arith.constant 1 : index
    %c6_411 = arith.constant 6 : index
    %c3_412 = arith.constant 3 : index
    %619 = vector.load %arg5[%c0_409, %c1_410, %c6_411, %c3_412] : memref<2x2x22x22xf32, #tpu.memory_space<vmem>>, vector<2x1x16x16xf32>
    %620 = vector.shape_cast %619 : vector<2x1x16x16xf32> to vector<2x16x16xf32>
    %621 = vector.broadcast %618 : f32 to vector<2x16x16xf32>
    %622 = arith.mulf %621, %620 : vector<2x16x16xf32>
    %623 = arith.addf %599, %622 : vector<2x16x16xf32>
    %c95 = arith.constant 95 : index
    %624 = memref.load %arg2[%c95] : memref<98xf32, #tpu.memory_space<smem>>
    %c0_413 = arith.constant 0 : index
    %c1_414 = arith.constant 1 : index
    %c6_415 = arith.constant 6 : index
    %c4_416 = arith.constant 4 : index
    %625 = vector.load %arg5[%c0_413, %c1_414, %c6_415, %c4_416] : memref<2x2x22x22xf32, #tpu.memory_space<vmem>>, vector<2x1x16x16xf32>
    %626 = vector.shape_cast %625 : vector<2x1x16x16xf32> to vector<2x16x16xf32>
    %627 = vector.broadcast %624 : f32 to vector<2x16x16xf32>
    %628 = arith.mulf %627, %626 : vector<2x16x16xf32>
    %629 = arith.addf %605, %628 : vector<2x16x16xf32>
    %c96 = arith.constant 96 : index
    %630 = memref.load %arg2[%c96] : memref<98xf32, #tpu.memory_space<smem>>
    %c0_417 = arith.constant 0 : index
    %c1_418 = arith.constant 1 : index
    %c6_419 = arith.constant 6 : index
    %c5_420 = arith.constant 5 : index
    %631 = vector.load %arg5[%c0_417, %c1_418, %c6_419, %c5_420] : memref<2x2x22x22xf32, #tpu.memory_space<vmem>>, vector<2x1x16x16xf32>
    %632 = vector.shape_cast %631 : vector<2x1x16x16xf32> to vector<2x16x16xf32>
    %633 = vector.broadcast %630 : f32 to vector<2x16x16xf32>
    %634 = arith.mulf %633, %632 : vector<2x16x16xf32>
    %635 = arith.addf %611, %634 : vector<2x16x16xf32>
    %c97 = arith.constant 97 : index
    %636 = memref.load %arg2[%c97] : memref<98xf32, #tpu.memory_space<smem>>
    %c0_421 = arith.constant 0 : index
    %c1_422 = arith.constant 1 : index
    %c6_423 = arith.constant 6 : index
    %c6_424 = arith.constant 6 : index
    %637 = vector.load %arg5[%c0_421, %c1_422, %c6_423, %c6_424] : memref<2x2x22x22xf32, #tpu.memory_space<vmem>>, vector<2x1x16x16xf32>
    %638 = vector.shape_cast %637 : vector<2x1x16x16xf32> to vector<2x16x16xf32>
    %639 = vector.broadcast %636 : f32 to vector<2x16x16xf32>
    %640 = arith.mulf %639, %638 : vector<2x16x16xf32>
    %641 = arith.addf %617, %640 : vector<2x16x16xf32>
    %642 = arith.addf %635, %641 : vector<2x16x16xf32>
    %643 = arith.addf %623, %629 : vector<2x16x16xf32>
    %644 = arith.addf %642, %643 : vector<2x16x16xf32>
    %c0_425 = arith.constant 0 : index
    %645 = memref.load %arg3[%c0_425] : memref<1xf32, #tpu.memory_space<smem>>
    %646 = vector.broadcast %645 : f32 to vector<2x16x16xf32>
    %647 = arith.addf %644, %646 : vector<2x16x16xf32>
    %648 = arith.negf %647 : vector<2x16x16xf32>
    %649 = math.exp %648 : vector<2x16x16xf32>
    %cst_426 = arith.constant 1.000000e+00 : f32
    %650 = vector.broadcast %cst_426 : f32 to vector<2x16x16xf32>
    %651 = arith.addf %650, %649 : vector<2x16x16xf32>
    %652 = arith.divf %650, %651 : vector<2x16x16xf32>
    %c0_427 = arith.constant 0 : index
    %c0_428 = arith.constant 0 : index
    %c0_429 = arith.constant 0 : index
    %c0_430 = arith.constant 0 : index
    %653 = vector.load %arg4[%c0_427, %c0_428, %c0_429, %c0_430] : memref<2x1x16x16xf32, #tpu.memory_space<vmem>>, vector<2x1x16x16xf32>
    %654 = vector.shape_cast %653 : vector<2x1x16x16xf32> to vector<2x16x16xf32>
    %655 = vector.shape_cast %652 : vector<2x16x16xf32> to vector<2x1x16x16xf32>
    tpu.vector_store %arg4[%c0_427, %c0_428, %c0_429, %c0_430], %655 {strides = array<i32>} : memref<2x1x16x16xf32, #tpu.memory_space<vmem>>, vector<2x1x16x16xf32>,
    return
  }
  func.func @transform_0(%arg0: i32) -> (i32, i32, i32, i32) {
    %c0_i32 = arith.constant 0 : i32
    %c0_i32_0 = arith.constant 0 : i32
    %c0_i32_1 = arith.constant 0 : i32
    %c0_i32_2 = arith.constant 0 : i32
    return %arg0, %c0_i32, %c0_i32_0, %c0_i32_1 : i32, i32, i32, i32
  }
  func.func @transform_1(%arg0: i32) -> i32 {
    %c0_i32 = arith.constant 0 : i32
    %c0_i32_0 = arith.constant 0 : i32
    return %c0_i32 : i32
  }
  func.func @transform_2(%arg0: i32) -> i32 {
    %c0_i32 = arith.constant 0 : i32
    %c0_i32_0 = arith.constant 0 : i32
    return %c0_i32 : i32
  }
  func.func @transform_3(%arg0: i32) -> (i32, i32, i32, i32) {
    %c0_i32 = arith.constant 0 : i32
    %c0_i32_0 = arith.constant 0 : i32
    %c0_i32_1 = arith.constant 0 : i32
    %c0_i32_2 = arith.constant 0 : i32
    return %arg0, %c0_i32, %c0_i32_0, %c0_i32_1 : i32, i32, i32, i32
  }
}

</mosaic_0001>

<bundles_post_ra>
// kernel: tpu_custom_call.1
= control target key start
LH: loop header
LB: loop body
LE: loop exit
PB: predicated region body
PF: predicated region fallthrough
CT: control target
= control target key end

     0   :  { %9 = vsyncpa [#allocation5], 0  ;;  %s4848_s0 = inlined_call_operand.hbm [shape: f32[2,3,16,16], index: 0, kind: input, shape index: {}]   ;;  %s4849_s1 = inlined_call_operand.vmem [shape: f32[98], index: 1, kind: input, shape index: {}]   ;;  %s4850_s2 = inlined_call_operand.<no memory space> [shape: f32[1], index: 2, kind: input, shape index: {}]   ;;  %s4851_s3 = inlined_call_operand.hbm [shape: f32[2,1,16,16], index: 3, kind: output, shape index: {}]  }
   0x1   :  { %10 = vsyncpa [#allocation7], 0 }
   0x2   :  { %11 = vsyncpa [#allocation6], 0  ;;  %s16_s14 = sshll.u32 %s4848_s0, 4  ;;  %s3009_s15 = smov [#allocation4]   ;;  %s17_s14 = int_to_ptr.hbm [resolvable:$true] %s16_s14 }
   0x3   :  { %s18_s16 = sshll.u32 %s3009_s15, 4  ;;  %s30_s19 = sshll.u32 %s4849_s1, 4  ;;  %s19_s16 = int_to_ptr.vmem [resolvable:$true] %s18_s16  ;;  %s31_s19 = int_to_ptr.vmem [resolvable:$true] %s30_s19 }
   0x4   :  { %s3010_s20 = smov 128   ;;  %s3011_s21 = smov 8  }
   0x5   :  { %24 = dma.hbm_to_vmem [thread:$0]  %s17_s14, 1536, %s19_s16, [#allocation5], %s3010_s20, %s3010_s20, %s3011_s21  }
   0x6   :  { %s3012_s22 = smov [#allocation8]  }
   0x7   :  { %33 = dma.vmem_to_smem %s31_s19, 16, %s3012_s22, [#allocation7]  }
   0x8   :  { %3003 = dma.done.wait [#allocation5], 1536  }
   0x9   :  { %3004 = vsyncadd [#allocation5], 4294965760 }
   0xa   :  { %3005 = dma.done.wait [#allocation7], 16  }
   0xb   :  { %3006 = vsyncadd [#allocation7], 4294967280 }
   0xc   :  { %44 = sfence }
   0xd   :  { %v52_v0 = vld [vmem:[#allocation4 + $0x38] sm:$0xff]  ;;  %v54_v1 = vld [vmem:[#allocation4 + $0x48] sm:$0xff]  ;;  %v51_v6 = vld [vmem:[#allocation4 + $0x30] sm:$0xff]  ;;  %s3013_s0 = smov 3   ;;  %vm141_vm9 = vcmask 179200   ;;  %vm144_vm11 = vcmask 177152  }
   0xe   :  { %v56_v2 = vld [vmem:[#allocation4 + $0x58] sm:$0xff]  ;;  %v60_v3 = vmul.f32 0.299, %v52_v0  ;;  %v64_v4 = vmul.f32 0.587, %v54_v1  ;;  %v53_v7 = vld [vmem:[#allocation4 + $0x40] sm:$0xff] }
   0xf   :  { %v72_v5 = vmul.f32 0.114, %v56_v2  ;;  %v55_v8 = vld [vmem:[#allocation4 + $0x50] sm:$0xff]  ;;  %v59_v10 = vmul.f32 0.299, %v51_v6  ;;  %v45_v13 = vld [vmem:[#allocation4] sm:$0xff] }
  0x10   :  { %v68_v9 = vadd.f32 %v64_v4, %v60_v3  ;;  %v63_v11 = vmul.f32 0.587, %v53_v7  ;;  %v71_v12 = vmul.f32 0.114, %v55_v8  ;;  %v47_v14 = vld [vmem:[#allocation4 + $0x10] sm:$0xff]  ;;  %v49_v15 = vld [vmem:[#allocation4 + $0x20] sm:$0xff] }
  0x11   :  { %v57_v18 = vmul.f32 0.299, %v45_v13  ;;  %v61_v19 = vmul.f32 0.587, %v47_v14  ;;  %v46_v20 = vld [vmem:[#allocation4 + $0x8] sm:$0xff]  ;;  %v48_v2 = vld [vmem:[#allocation4 + $0x18] sm:$0xff] }
  0x12   :  { %v76_v16 = vadd.f32 %v72_v5, %v68_v9  ;;  %v67_v17 = vadd.f32 %v63_v11, %v59_v10  ;;  %v69_v21 = vmul.f32 0.114, %v49_v15  ;;  %v3053_v25 = vmul.f32 0.299, %v46_v20  ;;  %s2715_s1 = sld [smem:[#allocation8 + $0x4]]  ;;  %s3015_s23 = smov 124  }
  0x13   :  { %v65_v29 = vadd.f32 %v61_v19, %v57_v18  ;;  %v62_v14 = vmul.f32 0.587, %v48_v2  ;;  %vm171_vm14 = vcmask 154648   ;;  %s2716_s24 = sld [smem:[#allocation8 + $0x5]]  ;;  %s3016_s29 = smov 127  }
  0x14   :  { %v80_v22 = vmul.f32 0.8, %v76_v16  ;;  %v2869_v23 = vand.u32 2147483647, %v76_v16  ;;  %v2871_v24 = vcvt.f32.s32 %v76_v16  ;;  %v2874_v26 = vand.u32 2147483648, %v76_v16  ;;  %s2717_s25 = sld [smem:[#allocation8 + $0x6]] }
  0x15   :  { %v108_v27 = vmul.f32 1.2, %v76_v16  ;;  %v75_v28 = vadd.f32 %v71_v12, %v67_v17  ;;  %v3079_v1 = vadd.f32 %v69_v21, %v65_v29  ;;  %s2718_s26 = sld [smem:[#allocation8 + $0x7]]  ;;  %s3017_s6 = smov 123  }
  0x16   :  { %v2837_v30 = vand.u32 2147483647, %v80_v22  ;;  %v2839_v31 = vcvt.f32.s32 %v80_v22  ;;  %v2842_v32 = vand.u32 2147483648, %v80_v22  ;;  %vm3055_vm0 = vcmp.lt.f32.partialorder %v2869_v23, 8388608.0  ;;  %s2719_s27 = sld [smem:[#allocation8 + $0x8]]  ;;  %s3018_s10 = smov 2  }
  0x17   :  { %v2872_v34 = vcvt.s32.f32 %v2871_v24  ;;  %v2901_v35 = vand.u32 2147483647, %v108_v27  ;;  %v2903_v36 = vcvt.f32.s32 %v108_v27  ;;  %v2906_v37 = vand.u32 2147483648, %v108_v27  ;;  %s2720_s28 = sld [smem:[#allocation8 + $0x9]]  ;;  %s3019_s13 = smov 126  }
  0x18   :  { %vm3059_vm1 = vcmp.lt.f32.partialorder %v2837_v30, 8388608.0  ;;  %v2840_v39 = vcvt.s32.f32 %v2839_v31  ;;  %v79_v40 = vmul.f32 0.8, %v75_v28  ;;  %v2861_v41 = vand.u32 2147483647, %v75_v28  ;;  %s2721_s30 = sld [smem:[#allocation8 + $0xa]] }
  0x19   :  { %v2873_v42 = vand.u32 2147483647, %v2872_v34  ;;  %vm3063_vm2 = vcmp.lt.f32.partialorder %v2901_v35, 8388608.0  ;;  %v2904_v44 = vcvt.s32.f32 %v2903_v36  ;;  %v2863_v45 = vcvt.f32.s32 %v75_v28  ;;  %v50_v36 = vld [vmem:[#allocation4 + $0x28] sm:$0xff]  ;;  %s2722_s4 = sld [smem:[#allocation8 + $0xb]]  ;;  %s3020_s18 = smov 122  }
  0x1a   :  { %v2841_v46 = vand.u32 2147483647, %v2840_v39  ;;  %v2829_v47 = vand.u32 2147483647, %v79_v40  ;;  %v2831_v48 = vcvt.f32.s32 %v79_v40  ;;  %v2834_v49 = vand.u32 2147483648, %v79_v40  ;;  %s2723_s5 = sld [smem:[#allocation8 + $0xc]] }
  0x1b   :  { %v2875_v50 = vor.u32 %v2874_v26, %v2873_v42  ;;  %v2905_v51 = vand.u32 2147483647, %v2904_v44  ;;  %vm3067_vm3 = vcmp.lt.f32.partialorder %v2861_v41, 8388608.0  ;;  %v2864_v53 = vcvt.s32.f32 %v2863_v45  ;;  %s2724_s7 = sld [smem:[#allocation8 + $0xd]]  ;;  %s3021_s19 = smov 1  }
  0x1c   :  { %v2843_v54 = vor.u32 %v2842_v32, %v2841_v46  ;;  %vm3071_vm4 = vcmp.lt.f32.partialorder %v2829_v47, 8388608.0  ;;  %v2832_v56 = vcvt.s32.f32 %v2831_v48  ;;  %v2866_v57 = vand.u32 2147483648, %v75_v28  ;;  %s2725_s8 = sld [smem:[#allocation8 + $0xe]] }
  0x1d   :  { %v2876_v58 = vsel %vm3055_vm0, %v2875_v50, %v76_v16  ;;  %v2907_v59 = vor.u32 %v2906_v37, %v2905_v51  ;;  %v2865_v60 = vand.u32 2147483647, %v2864_v53  ;;  %v107_v61 = vmul.f32 1.2, %v75_v28  ;;  %s2726_s9 = sld [smem:[#allocation8 + $0xf]] }
  0x1e   :  { %v2844_v62 = vsel %vm3059_vm1, %v2843_v54, %v80_v22  ;;  %v100_v63 = vmax.f32 %v2876_v58, 0.0  ;;  %v2833_v0 = vand.u32 2147483647, %v2832_v56  ;;  %v77_v21 = vmul.f32 0.8, %v3079_v1  ;;  %s2727_s11 = sld [smem:[#allocation8 + $0x10]] }
  0x1f   :  { %v88_v3 = vmax.f32 %v2844_v62, 0.0  ;;  %v2908_v4 = vsel %vm3063_vm2, %v2907_v59, %v108_v27  ;;  %v2867_v5 = vor.u32 %v2866_v57, %v2865_v60  ;;  %v2893_v6 = vand.u32 2147483647, %v107_v61  ;;  %s2728_s12 = sld [smem:[#allocation8 + $0x11]] }
  0x20   :  { %v104_v7 = vmin.f32 %v100_v63, 255.0  ;;  %v116_v8 = vmax.f32 %v2908_v4, 0.0  ;;  %v2835_v9 = vor.u32 %v2834_v49, %v2833_v0  ;;  %v2895_v10 = vcvt.f32.s32 %v107_v61  ;;  %s2729_s14 = sld [smem:[#allocation8 + $0x12]] }
  0x21   :  { %v92_v11 = vmin.f32 %v88_v3, 255.0  ;;  %v2868_v12 = vsel %vm3067_vm3, %v2867_v5, %v75_v28  ;;  %v2898_v13 = vand.u32 2147483648, %v107_v61  ;;  %v2845_v22 = vand.u32 2147483647, %v3079_v1  ;;  %s2730_s15 = sld [smem:[#allocation8 + $0x13]] }
  0x22   :  { %v120_v15 = vmin.f32 %v116_v8, 255.0  ;;  %v2836_v16 = vsel %vm3071_vm4, %v2835_v9, %v79_v40  ;;  %v99_v17 = vmax.f32 %v2868_v12, 0.0  ;;  %v2896_v18 = vcvt.s32.f32 %v2895_v10  ;;  %s2731_s16 = sld [smem:[#allocation8 + $0x14]] }
  0x23   :  { %v136_v19 = vmax.f32 %v92_v11, %v104_v7  ;;  %v87_v20 = vmax.f32 %v2836_v16, 0.0  ;;  %vm3089_vm5 = vcmp.lt.f32.partialorder %v2893_v6, 8388608.0  ;;  %v2847_v27 = vcvt.f32.s32 %v3079_v1  ;;  %s2732_s17 = sld [smem:[#allocation8 + $0x15]] }
  0x24   :  { %v103_v23 = vmin.f32 %v99_v17, 255.0  ;;  %v2897_v26 = vand.u32 2147483647, %v2896_v18  ;;  %v2815_v30 = vcvt.f32.s32 %v77_v21  ;;  %v2850_v31 = vand.u32 2147483648, %v3079_v1  ;;  %s2733_s22 = sld [smem:[#allocation8 + $0x16]] }
  0x25   :  { %v140_v28 = vmax.f32 %v136_v19, %v120_v15  ;;  %v91_v29 = vmin.f32 %v87_v20, 255.0  ;;  %v2813_v33 = vand.u32 2147483647, %v77_v21  ;;  %v2818_v34 = vand.u32 2147483648, %v77_v21 }
  0x26   :  { %v2899_v32 = vor.u32 %v2898_v13, %v2897_v26  ;;  %v2848_v35 = vcvt.s32.f32 %v2847_v27  ;;  %v2816_v39 = vcvt.s32.f32 %v2815_v30  ;;  %vm3096_vm6 = vcmp.lt.f32.partialorder %v2845_v22, 8388608.0 }
  0x27   :  { %186 = vrot.lane.b32.xlu1 %v140_v28, %s3013_s0  ;;  %v135_v37 = vmax.f32 %v91_v29, %v103_v23  ;;  %v123_v38 = vadd.f32 %v103_v23, %v91_v29  ;;  %v105_v43 = vmul.f32 1.2, %v3079_v1  ;;  %v124_v44 = vadd.f32 %v104_v7, %v92_v11 }
  0x28   :  { %v2900_v41 = vsel %vm3089_vm5, %v2899_v32, %v107_v61  ;;  %v2849_v42 = vand.u32 2147483647, %v2848_v35  ;;  %v2817_v46 = vand.u32 2147483647, %v2816_v39  ;;  %v66_v47 = vadd.f32 %v62_v14, %v3053_v25 }
  0x29   :  { %v115_v45 = vmax.f32 %v2900_v41, 0.0  ;;  %v70_v48 = vmul.f32 0.114, %v50_v36  ;;  %vm2814_vm7 = vcmp.lt.f32.partialorder %v2813_v33, 8388608.0  ;;  %v2877_v50 = vand.u32 2147483647, %v105_v43 }
  0x2a   :  { %v2851_v49 = vor.u32 %v2850_v31, %v2849_v42  ;;  %v2879_v51 = vcvt.f32.s32 %v105_v43  ;;  %v2819_v53 = vor.u32 %v2818_v34, %v2817_v46  ;;  %v2882_v57 = vand.u32 2147483648, %v105_v43 }
  0x2b   :  { %v119_v52 = vmin.f32 %v115_v45, 255.0  ;;  %v74_v54 = vadd.f32 %v70_v48, %v66_v47  ;;  %v128_v58 = vadd.f32 %v124_v44, %v120_v15  ;;  %vm3111_vm8 = vcmp.lt.f32.partialorder %v2877_v50, 8388608.0 }
  0x2c   :  { %v2852_v55 = vsel %vm3096_vm6, %v2851_v49, %v3079_v1  ;;  %v2880_v56 = vcvt.s32.f32 %v2879_v51  ;;  %v2820_v61 = vsel %vm2814_vm7, %v2819_v53, %v77_v21  ;;  %v3014_v27 = vmov 0.0  }
  0x2d   :  { %v139_v59 = vmax.f32 %v135_v37, %v119_v52  ;;  %v127_v60 = vadd.f32 %v123_v38, %v119_v52  ;;  %v3107_v62 = vmax.f32 %v2852_v55, 0.0  ;;  %v3109_v25 = vmax.f32 %v2820_v61, 0.0  ;;  %153 = vst.msk [vmem:[#allocation2 + $0x50] sm:$0xff] %vm141_vm9, %v3014_v27 }
  0x2e   :  { %v2881_v0 = vand.u32 2147483647, %v2880_v56  ;;  %v2855_v2 = vcvt.f32.s32 %v74_v54  ;;  %v78_v4 = vmul.f32 0.8, %v74_v54  ;;  %v2858_v5 = vand.u32 2147483648, %v74_v54  ;;  %142 = vst.msk [vmem:[#allocation2] sm:$0xff] %vm141_vm9, %v3014_v27 }
  0x2f   :  { %184 = vrot.lane.b32.xlu0 %v139_v59, %s3013_s0  ;;  %v131_v3 = vmul.f32 0.33333334, %v127_v60  ;;  %v101_v1 = vmin.f32 %v3107_v62, 255.0  ;;  %v89_v6 = vmin.f32 %v3109_v25, 255.0  ;;  %v2853_v8 = vand.u32 2147483647, %v74_v54 }
  0x30   :  { %v2883_v7 = vor.u32 %v2882_v57, %v2881_v0  ;;  %v2856_v9 = vcvt.s32.f32 %v2855_v2  ;;  %v132_v10 = vmul.f32 0.33333334, %v128_v58  ;;  %v2823_v11 = vcvt.f32.s32 %v78_v4  ;;  %154 = vst.msk [vmem:[#allocation2 + $0x58] sm:$0x3f] %vm144_vm11, %v3014_v27 }
  0x31   :  { %163 = vrot.lane.b32.xlu1 %v131_v3, %s3013_s0  ;;  %v106_v12 = vmul.f32 1.2, %v74_v54  ;;  %v2821_v14 = vand.u32 2147483647, %v78_v4  ;;  %v2826_v15 = vand.u32 2147483648, %v78_v4  ;;  %v121_v18 = vadd.f32 %v101_v1, %v89_v6  ;;  %143 = vst.msk [vmem:[#allocation2 + $0x8] sm:$0xff] %vm141_vm9, %v3014_v27 }
  0x32   :  { %v2884_v13 = vsel %vm3111_vm8, %v2883_v7, %v105_v43  ;;  %v2857_v16 = vand.u32 2147483647, %v2856_v9  ;;  %v2824_v19 = vcvt.s32.f32 %v2823_v11  ;;  %vm3123_vm10 = vcmp.lt.f32.partialorder %v2853_v8, 8388608.0  ;;  %145 = vst.msk [vmem:[#allocation2 + $0x10] sm:$0x3f] %vm144_vm11, %v3014_v27 }
  0x33   :  { %v113_v17 = vmax.f32 %v2884_v13, 0.0  ;;  %v2885_v22 = vand.u32 2147483647, %v106_v12  ;;  %v2887_v23 = vcvt.f32.s32 %v106_v12  ;;  %vm3128_vm12 = vcmp.lt.f32.partialorder %v2821_v14, 8388608.0  ;;  %146 = vst.msk [vmem:[#allocation2 + $0x18] sm:$0xff] %vm141_vm9, %v3014_v27 }
  0x34   :  { %v2859_v21 = vor.u32 %v2858_v5, %v2857_v16  ;;  %v2825_v26 = vand.u32 2147483647, %v2824_v19  ;;  %v2890_v31 = vand.u32 2147483648, %v106_v12  ;;  %147 = vst.msk [vmem:[#allocation2 + $0x20] sm:$0xff] %vm141_vm9, %v3014_v27  ;;  %v133_v48 = vmax.f32 %v89_v6, %v101_v1 }
  0x35   :  { %v117_v24 = vmin.f32 %v113_v17, 255.0  ;;  %v2888_v30 = vcvt.s32.f32 %v2887_v23  ;;  %vm2886_vm13 = vcmp.lt.f32.partialorder %v2885_v22, 8388608.0  ;;  %148 = vst.msk [vmem:[#allocation2 + $0x28] sm:$0x3f] %vm144_vm11, %v3014_v27  ;;  %v242_v55 = vstv %s2715_s1  ;;  %s2734_s1 = sld [smem:[#allocation8 + $0x17]] }
  0x36   :  { %v2860_v29 = vsel %vm3123_vm10, %v2859_v21, %v74_v54  ;;  %v2827_v33 = vor.u32 %v2826_v15, %v2825_v26  ;;  %149 = vst.msk [vmem:[#allocation2 + $0x30] sm:$0xff] %vm141_vm9, %v3014_v27  ;;  %v268_v2 = vstv %s2716_s24  ;;  %v350_v20 = vstv %s2719_s27  ;;  %s2735_s24 = sld [smem:[#allocation8 + $0x18]] }
  0x37   :  { %v125_v32 = vadd.f32 %v121_v18, %v117_v24  ;;  %v98_v34 = vmax.f32 %v2860_v29, 0.0  ;;  %v2889_v35 = vand.u32 2147483647, %v2888_v30  ;;  %150 = vst.msk [vmem:[#allocation2 + $0x38] sm:$0xff] %vm141_vm9, %v3014_v27  ;;  %v137_v49 = vmax.f32 %v133_v48, %v117_v24  ;;  %s2737_s27 = sld [smem:[#allocation8 + $0x1a]] }
  0x38   :  { %v2828_v37 = vsel %vm3128_vm12, %v2827_v33, %v78_v4  ;;  %151 = vst.msk [vmem:[#allocation2 + $0x40] sm:$0x3f] %vm144_vm11, %v3014_v27  ;;  %v294_v4 = vstv %s2717_s25  ;;  %v376_v24 = vstv %s2720_s28  ;;  %v402_v33 = vstv %s2721_s30  ;;  %s3022_s25 = smov 125   ;;  %s2738_s28 = sld [smem:[#allocation8 + $0x1b]] }
  0x39   :  { %v129_v36 = vmul.f32 0.33333334, %v125_v32  ;;  %165 = vrot.lane.b32.xlu1 %v132_v10, %s3013_s0  ;;  %v86_v38 = vmax.f32 %v2828_v37, 0.0  ;;  %v102_v39 = vmin.f32 %v98_v34, 255.0  ;;  %v2891_v40 = vor.u32 %v2890_v31, %v2889_v35  ;;  %152 = vst.msk [vmem:[#allocation2 + $0x48] sm:$0xff] %vm141_vm9, %v3014_v27  ;;  %180 = vrot.lane.b32.xlu2 %v137_v49, %s3013_s0  ;;  %s2743_s30 = sld [smem:[#allocation8 + $0x20]] }
  0x3a   :  { %v480_v49 = vstv %s2724_s7  ;;  %s2746_s7 = sld [smem:[#allocation8 + $0x23]]  ;;  %vm2687_vm2 = vcmask 130048  }
  0x3b   :  { %159 = vrot.lane.b32.xlu0 %v129_v36, %s3013_s0  ;;  %v90_v41 = vmin.f32 %v86_v38, 255.0  ;;  %v2892_v42 = vsel %vm2886_vm13, %v2891_v40, %v106_v12  ;;  %v324_v12 = vstv %s2718_s26  ;;  %v428_v38 = vstv %s2722_s4  ;;  %s2736_s26 = sld [smem:[#allocation8 + $0x19]] }
  0x3c   :  { %v114_v43 = vmax.f32 %v2892_v42, 0.0  ;;  %s2744_s4 = sld [smem:[#allocation8 + $0x21]] }
  0x3d   :  { %v122_v44 = vadd.f32 %v102_v39, %v90_v41  ;;  %v134_v50 = vmax.f32 %v90_v41, %v102_v39  ;;  %v454_v41 = vstv %s2723_s5  ;;  %s2745_s5 = sld [smem:[#allocation8 + $0x22]] }
  0x3e   :  { %v118_v45 = vmin.f32 %v114_v43, 255.0 }
  0x40   :  { %v126_v46 = vadd.f32 %v122_v44, %v118_v45  ;;  %v138_v51 = vmax.f32 %v134_v50, %v118_v45 }
  0x42   :  { %v130_v47 = vmul.f32 0.33333334, %v126_v46  ;;  %182 = vrot.lane.b32.xlu2 %v138_v51, %s3013_s0 }
  0x44   :  { %161 = vrot.lane.b32.xlu0 %v130_v47, %s3013_s0 }
  0x93   :  { %v181_v23 = vpop.permute.xlu2 %180 }
  0x94   :  { %193 = vst.msk [vmem:[#allocation2 + $0x1b] sm:$0xff] %vm171_vm14, %v181_v23 }
  0x99   :  { %v187_v52 = vpop.permute.xlu1 %186 }
  0x9a   :  { %196 = vst.msk [vmem:[#allocation2 + $0x53] sm:$0xff] %vm171_vm14, %v187_v52 }
  0x9c   :  { %v183_v29 = vpop.permute.xlu2 %182 }
  0x9d   :  { %194 = vst.msk [vmem:[#allocation2 + $0x23] sm:$0xff] %vm171_vm14, %v183_v29  ;;  %v614_v29 = vstv %s2729_s14  ;;  %s2739_s14 = sld [smem:[#allocation8 + $0x1c]] }
  0xa1   :  { %v185_v53 = vpop.permute.xlu0 %184 }
  0xa2   :  { %195 = vst.msk [vmem:[#allocation2 + $0x4b] sm:$0xff] %vm171_vm14, %v185_v53 }
  0xa3   :  { %v164_v54 = vpop.permute.xlu1 %163 }
  0xa4   :  { %174 = vst.msk [vmem:[#allocation2 + $0x33] sm:$0xff] %vm171_vm14, %v164_v54 }
  0xab   :  { %v166_v56 = vpop.permute.xlu1 %165  ;;  %v3157_v57 = vld [vmem:[#allocation2 + $0x30] sm:$0xff] }
  0xac   :  { %175 = vst.msk [vmem:[#allocation2 + $0x3b] sm:$0xff] %vm171_vm14, %v166_v56  ;;  %v245_v58 = vmul.f32 %v242_v55, %v3157_v57  ;;  %v271_v5 = vmul.f32 %v268_v2, %v3157_v57  ;;  %v3192_v13 = vld [vmem:[#allocation2 + $0x31] sm:$0xff]  ;;  %v297_v16 = vmul.f32 %v294_v4, %v3157_v57  ;;  %v510_v56 = vstv %s2725_s8  ;;  %s2747_s8 = sld [smem:[#allocation8 + $0x24]] }
  0xad   :  { %v160_v59 = vpop.permute.xlu0 %159  ;;  %v327_v15 = vmul.f32 %v324_v12, %v3192_v13  ;;  %v353_v26 = vmul.f32 %v350_v20, %v3192_v13  ;;  %v405_v35 = vmul.f32 %v402_v33, %v3192_v13  ;;  %v379_v36 = vmul.f32 %v376_v24, %v3192_v13 }
  0xae   :  { %172 = vst.msk [vmem:[#allocation2 + $0x3] sm:$0xff] %vm171_vm14, %v160_v59  ;;  %255 = vrot.lane.b32.xlu1 %v245_v58, %s3015_s23  ;;  %v431_v42 = vmul.f32 %v428_v38, %v3192_v13  ;;  %v483_v51 = vmul.f32 %v480_v49, %v3192_v13  ;;  %v457_v52 = vmul.f32 %v454_v41, %v3192_v13 }
  0xb3   :  { %v3168_v25 = vld [vmem:[#allocation2 + $0x38] sm:$0xff] }
  0xb4   :  { %v246_v63 = vmul.f32 %v242_v55, %v3168_v25  ;;  %v298_v9 = vmul.f32 %v294_v4, %v3168_v25  ;;  %v272_v10 = vmul.f32 %v268_v2, %v3168_v25  ;;  %v3200_v17 = vld [vmem:[#allocation2 + $0x39] sm:$0xff] }
  0xb5   :  { %v3163_v60 = vld [vmem:[#allocation2] sm:$0xff]  ;;  %v328_v19 = vmul.f32 %v324_v12, %v3200_v17  ;;  %v380_v31 = vmul.f32 %v376_v24, %v3200_v17  ;;  %v354_v32 = vmul.f32 %v350_v20, %v3200_v17  ;;  %v406_v37 = vmul.f32 %v402_v33, %v3200_v17 }
  0xb6   :  { %v243_v61 = vmul.f32 %v242_v55, %v3163_v60  ;;  %v162_v62 = vpop.permute.xlu0 %161  ;;  %v295_v6 = vmul.f32 %v294_v4, %v3163_v60  ;;  %v269_v7 = vmul.f32 %v268_v2, %v3163_v60  ;;  %v3190_v11 = vld [vmem:[#allocation2 + $0x1] sm:$0xff]  ;;  %v458_v46 = vmul.f32 %v454_v41, %v3200_v17 }
  0xb7   :  { %173 = vst.msk [vmem:[#allocation2 + $0xb] sm:$0xff] %vm171_vm14, %v162_v62  ;;  %v325_v14 = vmul.f32 %v324_v12, %v3190_v11  ;;  %v377_v27 = vmul.f32 %v376_v24, %v3190_v11  ;;  %v351_v28 = vmul.f32 %v350_v20, %v3190_v11  ;;  %v403_v34 = vmul.f32 %v402_v33, %v3190_v11  ;;  %v3268_v62 = vld [vmem:[#allocation2 + $0x32] sm:$0xff] }
  0xb8   :  { %251 = vrot.lane.b32.xlu2 %v243_v61, %s3015_s23  ;;  %v455_v43 = vmul.f32 %v454_v41, %v3190_v11  ;;  %v429_v44 = vmul.f32 %v428_v38, %v3190_v11  ;;  %v432_v47 = vmul.f32 %v428_v38, %v3200_v17  ;;  %v481_v50 = vmul.f32 %v480_v49, %v3190_v11 }
  0xbe   :  { %v3171_v0 = vld [vmem:[#allocation2 + $0x8] sm:$0xff] }
  0xbf   :  { %v270_v3 = vmul.f32 %v268_v2, %v3171_v0  ;;  %v244_v1 = vmul.f32 %v242_v55, %v3171_v0  ;;  %v296_v8 = vmul.f32 %v294_v4, %v3171_v0  ;;  %v3202_v18 = vld [vmem:[#allocation2 + $0x9] sm:$0xff]  ;;  %v484_v55 = vmul.f32 %v480_v49, %v3200_v17 }
  0xc0   :  { %257 = vrot.lane.b32.xlu2 %v246_v63, %s3015_s23  ;;  %v352_v21 = vmul.f32 %v350_v20, %v3202_v18  ;;  %v326_v22 = vmul.f32 %v324_v12, %v3202_v18  ;;  %v378_v30 = vmul.f32 %v376_v24, %v3202_v18  ;;  %v430_v39 = vmul.f32 %v428_v38, %v3202_v18  ;;  %v3258_v54 = vld [vmem:[#allocation2 + $0xa] sm:$0xff]  ;;  %v3270_v63 = vld [vmem:[#allocation2 + $0x2] sm:$0xff] }
  0xc1   :  { %279 = vrot.lane.b32.xlu1 %v270_v3, %s3015_s23  ;;  %253 = vrot.lane.b32.xlu0 %v244_v1, %s3015_s23  ;;  %v404_v40 = vmul.f32 %v402_v33, %v3202_v18  ;;  %v456_v45 = vmul.f32 %v454_v41, %v3202_v18  ;;  %v512_v58 = vmul.f32 %v510_v56, %v3258_v54  ;;  %v536_v2 = vstv %s2726_s9  ;;  %s197_s9 = sld [smem:[#allocation8]] }
  0xc2   :  { %v482_v59 = vmul.f32 %v480_v49, %v3202_v18  ;;  %v513_v3 = vmul.f32 %v510_v56, %v3268_v62  ;;  %v537_v1 = vmul.f32 %v536_v2, %v3270_v63  ;;  %v511_v4 = vmul.f32 %v510_v56, %v3270_v63 }
  0xc3   :  { %v562_v12 = vstv %s2727_s11  ;;  %v539_v17 = vmul.f32 %v536_v2, %v3268_v62  ;;  %s2712_s11 = sld [smem:[#allocation8 + $0x1]] }
  0xc4   :  { %v564_v24 = vmul.f32 %v562_v12, %v3258_v54 }
  0xc8   :  { %281 = vrot.lane.b32.xlu2 %v271_v5, %s3015_s23 }
  0xc9   :  { %303 = vrot.lane.b32.xlu1 %v295_v6, %s3015_s23  ;;  %277 = vrot.lane.b32.xlu0 %v269_v7, %s3015_s23  ;;  %v3282_v7 = vld [vmem:[#allocation2 + $0x3a] sm:$0xff] }
  0xd0   :  { %305 = vrot.lane.b32.xlu2 %v296_v8, %s3015_s23  ;;  %v538_v8 = vmul.f32 %v536_v2, %v3258_v54 }
  0xd1   :  { %309 = vrot.lane.b32.xlu1 %v298_v9, %s3015_s23  ;;  %283 = vrot.lane.b32.xlu0 %v272_v10, %s3015_s23  ;;  %v540_v9 = vmul.f32 %v536_v2, %v3282_v7  ;;  %v514_v10 = vmul.f32 %v510_v56, %v3282_v7  ;;  %v3368_v2 = vld [vmem:[#allocation2 + $0x3] sm:$0xff] }
  0xd8   :  { %333 = vrot.lane.b32.xlu2 %v325_v14, %s3013_s0 }
  0xd9   :  { %337 = vrot.lane.b32.xlu1 %v327_v15, %s3013_s0  ;;  %307 = vrot.lane.b32.xlu0 %v297_v16, %s3015_s23  ;;  %v563_v15 = vmul.f32 %v562_v12, %v3270_v63  ;;  %v565_v16 = vmul.f32 %v562_v12, %v3268_v62 }
  0xe0   :  { %339 = vrot.lane.b32.xlu2 %v328_v19, %s3013_s0 }
  0xe1   :  { %361 = vrot.lane.b32.xlu1 %v352_v21, %s3016_s29  ;;  %335 = vrot.lane.b32.xlu0 %v326_v22, %s3013_s0  ;;  %v566_v21 = vmul.f32 %v562_v12, %v3282_v7  ;;  %v588_v22 = vstv %s2728_s12  ;;  %s2748_s12 = sld [smem:[#allocation8 + $0x25]] }
  0xe2   :  { %v590_v23 = vmul.f32 %v588_v22, %v3258_v54  ;;  %v592_v38 = vmul.f32 %v588_v22, %v3282_v7 }
  0xe8   :  { %363 = vrot.lane.b32.xlu2 %v353_v26, %s3016_s29 }
  0xe9   :  { %385 = vrot.lane.b32.xlu1 %v377_v27, %s3016_s29  ;;  %359 = vrot.lane.b32.xlu0 %v351_v28, %s3016_s29 }
  0xf0   :  { %387 = vrot.lane.b32.xlu2 %v378_v30, %s3016_s29  ;;  %v591_v30 = vmul.f32 %v588_v22, %v3268_v62 }
  0xf1   :  { %391 = vrot.lane.b32.xlu1 %v380_v31, %s3016_s29  ;;  %365 = vrot.lane.b32.xlu0 %v354_v32, %s3016_s29  ;;  %v615_v31 = vmul.f32 %v614_v29, %v3270_v63  ;;  %v589_v32 = vmul.f32 %v588_v22, %v3270_v63 }
  0xf8   :  { %411 = vrot.lane.b32.xlu2 %v403_v34, %s3016_s29 }
  0xf9   :  { %415 = vrot.lane.b32.xlu1 %v405_v35, %s3016_s29  ;;  %389 = vrot.lane.b32.xlu0 %v379_v36, %s3016_s29  ;;  %v616_v36 = vmul.f32 %v614_v29, %v3258_v54 }
 0x100   :  { %417 = vrot.lane.b32.xlu2 %v406_v37, %s3016_s29  ;;  %v618_v37 = vmul.f32 %v614_v29, %v3282_v7 }
 0x101   :  { %439 = vrot.lane.b32.xlu1 %v430_v39, %s3016_s29  ;;  %413 = vrot.lane.b32.xlu0 %v404_v40, %s3016_s29  ;;  %v640_v40 = vstv %s2730_s15  ;;  %s2740_s15 = sld [smem:[#allocation8 + $0x1d]] }
 0x108   :  { %441 = vrot.lane.b32.xlu2 %v431_v42, %s3016_s29 }
 0x109   :  { %463 = vrot.lane.b32.xlu1 %v455_v43, %s3017_s6  ;;  %437 = vrot.lane.b32.xlu0 %v429_v44, %s3016_s29  ;;  %v641_v43 = vmul.f32 %v640_v40, %v3270_v63  ;;  %v643_v44 = vmul.f32 %v640_v40, %v3268_v62 }
 0x110   :  { %465 = vrot.lane.b32.xlu2 %v456_v45, %s3017_s6  ;;  %v617_v45 = vmul.f32 %v614_v29, %v3268_v62 }
 0x111   :  { %469 = vrot.lane.b32.xlu1 %v458_v46, %s3017_s6  ;;  %443 = vrot.lane.b32.xlu0 %v432_v47, %s3016_s29 }
 0x112   :  { %v3248_v48 = vpop.permute.xlu2 %251 }
 0x118   :  { %489 = vrot.lane.b32.xlu2 %v481_v50, %s3017_s6  ;;  %v644_v50 = vmul.f32 %v640_v40, %v3282_v7 }
 0x119   :  { %493 = vrot.lane.b32.xlu1 %v483_v51, %s3017_s6  ;;  %467 = vrot.lane.b32.xlu0 %v457_v52, %s3017_s6  ;;  %v666_v51 = vstv %s2731_s16  ;;  %s2749_s16 = sld [smem:[#allocation8 + $0x26]] }
 0x11a   :  { %v3256_v53 = vpop.permute.xlu2 %257  ;;  %v668_v52 = vmul.f32 %v666_v51, %v3258_v54 }
 0x120   :  { %495 = vrot.lane.b32.xlu2 %v484_v55, %s3017_s6  ;;  %v3278_v5 = vpop.permute.xlu1 %255  ;;  %v642_v55 = vmul.f32 %v640_v40, %v3258_v54 }
 0x121   :  { %521 = vrot.lane.b32.xlu1 %v512_v58, %s3018_s10  ;;  %491 = vrot.lane.b32.xlu0 %v482_v59, %s3017_s6 }
 0x122   :  { %v3266_v61 = vpop.permute.xlu2 %281 }
 0x128   :  { %523 = vrot.lane.b32.xlu2 %v513_v3, %s3018_s10  ;;  %v696_v3 = vstv %s2732_s17  ;;  %s2713_s17 = sld [smem:[#allocation8 + $0x2]] }
 0x129   :  { %545 = vrot.lane.b32.xlu1 %v537_v1, %s3018_s10  ;;  %519 = vrot.lane.b32.xlu0 %v511_v4, %s3018_s10  ;;  %v669_v1 = vmul.f32 %v666_v51, %v3268_v62  ;;  %v697_v54 = vmul.f32 %v696_v3, %v3368_v2  ;;  %v667_v4 = vmul.f32 %v666_v51, %v3270_v63  ;;  %v3384_v62 = vld [vmem:[#allocation2 + $0x3b] sm:$0xff] }
 0x12a   :  { %v3280_v6 = vpop.permute.xlu2 %305  ;;  %v700_v63 = vmul.f32 %v696_v3, %v3384_v62 }
 0x12b   :  { %4872 = vst [vmem:[#allocation13_spill] sm:$0xff] %v3280_v6 }
 0x130   :  { %547 = vrot.lane.b32.xlu2 %v538_v8, %s3018_s10 }
 0x131   :  { %551 = vrot.lane.b32.xlu1 %v540_v9, %s3018_s10  ;;  %525 = vrot.lane.b32.xlu0 %v514_v10, %s3018_s10  ;;  %v3378_v9 = vld [vmem:[#allocation2 + $0xb] sm:$0xff] }
 0x132   :  { %v3290_v11 = vpop.permute.xlu2 %333 }
 0x133   :  { %4873 = vst [vmem:[#allocation14_spill] sm:$0xff] %v3290_v11  ;;  %v3292_v13 = vpop.permute.xlu1 %279  ;;  %v3294_v14 = vpop.permute.xlu0 %253 }
 0x134   :  { %4874 = vst [vmem:[#allocation15_spill] sm:$0xff] %v3292_v13 }
 0x138   :  { %571 = vrot.lane.b32.xlu2 %v563_v15, %s3019_s13  ;;  %v698_v15 = vmul.f32 %v696_v3, %v3378_v9 }
 0x139   :  { %575 = vrot.lane.b32.xlu1 %v565_v16, %s3019_s13  ;;  %549 = vrot.lane.b32.xlu0 %v539_v17, %s3018_s10  ;;  %v670_v16 = vmul.f32 %v666_v51, %v3282_v7  ;;  %v774_v51 = vstv %s2735_s24  ;;  %s3646_s24 = sld [smem:[#allocation8 + $0x1e]] }
 0x13a   :  { %v3302_v18 = vpop.permute.xlu2 %339 }
 0x13b   :  { %4875 = vst [vmem:[#allocation16_spill] sm:$0xff] %v3302_v18  ;;  %v3304_v19 = vpop.permute.xlu1 %303  ;;  %v3306_v20 = vpop.permute.xlu0 %277  ;;  %v3514_v18 = vld [vmem:[#allocation2 + $0xc] sm:$0xff] }
 0x13c   :  { %4876 = vst [vmem:[#allocation17_spill] sm:$0xff] %v3304_v19  ;;  %v3552_v19 = vld [vmem:[#allocation2 + $0x35] sm:$0xff] }
 0x140   :  { %577 = vrot.lane.b32.xlu2 %v566_v21, %s3019_s13  ;;  %v722_v21 = vstv %s2733_s22  ;;  %s3626_s22 = sld [smem:[#allocation8 + $0x3]] }
 0x141   :  { %599 = vrot.lane.b32.xlu1 %v590_v23, %s3019_s13  ;;  %573 = vrot.lane.b32.xlu0 %v564_v24, %s3019_s13  ;;  %v3398_v24 = vld [vmem:[#allocation2 + $0x33] sm:$0xff]  ;;  %v723_v29 = vmul.f32 %v722_v21, %v3368_v2 }
 0x142   :  { %v3314_v26 = vpop.permute.xlu2 %363  ;;  %v725_v7 = vmul.f32 %v722_v21, %v3398_v24 }
 0x143   :  { %v3316_v27 = vpop.permute.xlu1 %309  ;;  %v3318_v28 = vpop.permute.xlu0 %283 }
 0x144   :  { %4877 = vst [vmem:[#allocation18_spill] sm:$0xff] %v3316_v27 }
 0x148   :  { %601 = vrot.lane.b32.xlu2 %v591_v30, %s3019_s13  ;;  %v699_v30 = vmul.f32 %v696_v3, %v3398_v24 }
 0x149   :  { %623 = vrot.lane.b32.xlu1 %v615_v31, %s3019_s13  ;;  %597 = vrot.lane.b32.xlu0 %v589_v32, %s3019_s13 }
 0x14a   :  { %v3326_v33 = vpop.permute.xlu2 %387 }
 0x14b   :  { %4878 = vst [vmem:[#allocation19_spill] sm:$0xff] %v3326_v33  ;;  %v3328_v34 = vpop.permute.xlu1 %337  ;;  %v3330_v35 = vpop.permute.xlu0 %307 }
 0x14c   :  { %4879 = vst [vmem:[#allocation20_spill] sm:$0xff] %v3328_v34 }
 0x150   :  { %625 = vrot.lane.b32.xlu2 %v616_v36, %s3019_s13 }
 0x151   :  { %629 = vrot.lane.b32.xlu1 %v618_v37, %s3019_s13  ;;  %603 = vrot.lane.b32.xlu0 %v592_v38, %s3019_s13  ;;  %v726_v37 = vmul.f32 %v722_v21, %v3384_v62  ;;  %v748_v38 = vstv %s2734_s1  ;;  %s2750_s1 = sld [smem:[#allocation8 + $0x27]] }
 0x152   :  { %v3338_v39 = vpop.permute.xlu2 %411  ;;  %v750_v40 = vmul.f32 %v748_v38, %v3378_v9  ;;  %v749_v3 = vmul.f32 %v748_v38, %v3368_v2 }
 0x153   :  { %4880 = vst [vmem:[#allocation21_spill] sm:$0xff] %v3338_v39  ;;  %v3340_v41 = vpop.permute.xlu1 %361  ;;  %v3342_v42 = vpop.permute.xlu0 %335  ;;  %v1004_v39 = vstv %s2746_s7  ;;  %s2756_s7 = sld [smem:[#allocation8 + $0x2d]] }
 0x158   :  { %649 = vrot.lane.b32.xlu2 %v641_v43, %s3019_s13  ;;  %v724_v43 = vmul.f32 %v722_v21, %v3378_v9 }
 0x159   :  { %653 = vrot.lane.b32.xlu1 %v643_v44, %s3019_s13  ;;  %627 = vrot.lane.b32.xlu0 %v617_v45, %s3019_s13 }
 0x15a   :  { %v3350_v46 = vpop.permute.xlu2 %417 }
 0x15b   :  { %4881 = vst [vmem:[#allocation22_spill] sm:$0xff] %v3350_v46  ;;  %v3352_v47 = vpop.permute.xlu1 %385  ;;  %v3354_v49 = vpop.permute.xlu0 %359 }
 0x160   :  { %655 = vrot.lane.b32.xlu2 %v644_v50, %s3019_s13 }
 0x161   :  { %677 = vrot.lane.b32.xlu1 %v668_v52, %s3020_s18  ;;  %651 = vrot.lane.b32.xlu0 %v642_v55, %s3019_s13  ;;  %v751_v52 = vmul.f32 %v748_v38, %v3398_v24  ;;  %v775_v55 = vmul.f32 %v774_v51, %v3368_v2 }
 0x162   :  { %v3362_v56 = vpop.permute.xlu2 %441 }
 0x163   :  { %4882 = vst [vmem:[#allocation23_spill] sm:$0xff] %v3362_v56  ;;  %v3364_v58 = vpop.permute.xlu1 %391  ;;  %v3366_v59 = vpop.permute.xlu0 %365 }
 0x168   :  { %679 = vrot.lane.b32.xlu2 %v669_v1, %s3020_s18 }
 0x169   :  { %705 = vrot.lane.b32.xlu1 %v697_v54, %s3021_s19  ;;  %675 = vrot.lane.b32.xlu0 %v667_v4, %s3020_s18 }
 0x16a   :  { %v3376_v8 = vpop.permute.xlu2 %465 }
 0x16b   :  { %v3380_v10 = vpop.permute.xlu1 %415  ;;  %v3382_v12 = vpop.permute.xlu0 %389 }
 0x170   :  { %707 = vrot.lane.b32.xlu2 %v698_v15, %s3021_s19  ;;  %v776_v15 = vmul.f32 %v774_v51, %v3378_v9 }
 0x171   :  { %711 = vrot.lane.b32.xlu1 %v700_v63, %s3021_s19  ;;  %681 = vrot.lane.b32.xlu0 %v670_v16, %s3020_s18  ;;  %v778_v63 = vmul.f32 %v774_v51, %v3384_v62  ;;  %v752_v16 = vmul.f32 %v748_v38, %v3384_v62  ;;  %v777_v38 = vmul.f32 %v774_v51, %v3398_v24 }
 0x172   :  { %v3392_v17 = vpop.permute.xlu2 %489 }
 0x173   :  { %v3394_v22 = vpop.permute.xlu1 %439  ;;  %v3396_v23 = vpop.permute.xlu0 %413 }
 0x174   :  { %4883 = vst [vmem:[#allocation24_spill] sm:$0xff] %v3396_v23 }
 0x178   :  { %731 = vrot.lane.b32.xlu2 %v723_v29, %s3021_s19  ;;  %v800_v29 = vstv %s2736_s26  ;;  %s3670_s26 = sld [smem:[#allocation8 + $0x28]] }
 0x179   :  { %735 = vrot.lane.b32.xlu1 %v725_v7, %s3021_s19  ;;  %709 = vrot.lane.b32.xlu0 %v699_v30, %s3021_s19  ;;  %v802_v51 = vmul.f32 %v800_v29, %v3378_v9 }
 0x17a   :  { %v3406_v31 = vpop.permute.xlu2 %495 }
 0x17b   :  { %v3408_v32 = vpop.permute.xlu1 %463  ;;  %v3410_v36 = vpop.permute.xlu0 %437 }
 0x17c   :  { %4884 = vst [vmem:[#allocation25_spill] sm:$0xff] %v3410_v36 }
 0x180   :  { %737 = vrot.lane.b32.xlu2 %v726_v37, %s3021_s19  ;;  %v801_v37 = vmul.f32 %v800_v29, %v3368_v2 }
 0x181   :  { %759 = vrot.lane.b32.xlu1 %v750_v40, %s3021_s19  ;;  %733 = vrot.lane.b32.xlu0 %v724_v43, %s3021_s19  ;;  %v803_v40 = vmul.f32 %v800_v29, %v3398_v24 }
 0x182   :  { %v3418_v44 = vpop.permute.xlu2 %523 }
 0x183   :  { %v3420_v45 = vpop.permute.xlu1 %469  ;;  %v3422_v50 = vpop.permute.xlu0 %443 }
 0x184   :  { %4885 = vst [vmem:[#allocation26_spill] sm:$0xff] %v3422_v50 }
 0x188   :  { %761 = vrot.lane.b32.xlu2 %v751_v52, %s3021_s19 }
 0x189   :  { %783 = vrot.lane.b32.xlu1 %v775_v55, %s3022_s25  ;;  %757 = vrot.lane.b32.xlu0 %v749_v3, %s3021_s19  ;;  %v804_v3 = vmul.f32 %v800_v29, %v3384_v62 }
 0x18a   :  { %v3430_v1 = vpop.permute.xlu2 %547 }
 0x18b   :  { %v3432_v54 = vpop.permute.xlu1 %493  ;;  %v3434_v4 = vpop.permute.xlu0 %467 }
 0x190   :  { %785 = vrot.lane.b32.xlu2 %v776_v15, %s3022_s25  ;;  %v826_v15 = vstv %s2737_s27  ;;  %s3699_s27 = sld [smem:[#allocation8 + $0x1f]] }
 0x191   :  { %789 = vrot.lane.b32.xlu1 %v778_v63, %s3022_s25  ;;  %763 = vrot.lane.b32.xlu0 %v752_v16, %s3021_s19  ;;  %v828_v63 = vmul.f32 %v826_v15, %v3378_v9  ;;  %v829_v56 = vmul.f32 %v826_v15, %v3398_v24  ;;  %v827_v34 = vmul.f32 %v826_v15, %v3368_v2 }
 0x192   :  { %v3442_v21 = vpop.permute.xlu2 %571 }
 0x193   :  { %v3444_v7 = vpop.permute.xlu1 %521  ;;  %v3446_v30 = vpop.permute.xlu0 %491 }
 0x194   :  { %4886 = vst [vmem:[#allocation27_spill] sm:$0xff] %v3444_v7 }
 0x195   :  { %4887 = vst [vmem:[#allocation28_spill] sm:$0xff] %v3446_v30  ;;  %v1030_v30 = vstv %s2747_s8  ;;  %s2757_s8 = sld [smem:[#allocation8 + $0x2e]] }
 0x198   :  { %809 = vrot.lane.b32.xlu2 %v801_v37, %s3022_s25 }
 0x199   :  { %813 = vrot.lane.b32.xlu1 %v803_v40, %s3022_s25  ;;  %787 = vrot.lane.b32.xlu0 %v777_v38, %s3022_s25  ;;  %v852_v38 = vstv %s2738_s28  ;;  %s3746_s28 = sld [smem:[#allocation8 + $0x29]] }
 0x19a   :  { %v3454_v43 = vpop.permute.xlu2 %577 }
 0x19b   :  { %v3456_v52 = vpop.permute.xlu1 %545  ;;  %v3458_v55 = vpop.permute.xlu0 %519 }
 0x19c   :  { %4888 = vst [vmem:[#allocation29_spill] sm:$0xff] %v3456_v52 }
 0x19d   :  { %4889 = vst [vmem:[#allocation30_spill] sm:$0xff] %v3458_v55 }
 0x1a0   :  { %815 = vrot.lane.b32.xlu2 %v804_v3, %s3022_s25  ;;  %v853_v3 = vmul.f32 %v852_v38, %v3368_v2  ;;  %v3492_v2 = vld [vmem:[#allocation2 + $0x4] sm:$0xff] }
 0x1a1   :  { %837 = vrot.lane.b32.xlu1 %v828_v63, %s3022_s25  ;;  %811 = vrot.lane.b32.xlu0 %v802_v51, %s3022_s25 }
 0x1a2   :  { %v3466_v16 = vpop.permute.xlu2 %601 }
 0x1a3   :  { %4890 = vst [vmem:[#allocation31_spill] sm:$0xff] %v3466_v16  ;;  %v3468_v37 = vpop.permute.xlu1 %551  ;;  %v3470_v40 = vpop.permute.xlu0 %525 }
 0x1a4   :  { %4891 = vst [vmem:[#allocation32_spill] sm:$0xff] %v3468_v37  ;;  %v830_v37 = vmul.f32 %v826_v15, %v3384_v62  ;;  %v855_v15 = vmul.f32 %v852_v38, %v3398_v24 }
 0x1a5   :  { %4892 = vst [vmem:[#allocation33_spill] sm:$0xff] %v3470_v40  ;;  %v854_v40 = vmul.f32 %v852_v38, %v3378_v9  ;;  %v3498_v9 = vld [vmem:[#allocation2 + $0x34] sm:$0xff] }
 0x1a8   :  { %839 = vrot.lane.b32.xlu2 %v829_v56, %s3022_s25  ;;  %v856_v56 = vmul.f32 %v852_v38, %v3384_v62 }
 0x1a9   :  { %861 = vrot.lane.b32.xlu1 %v853_v3, %s3022_s25  ;;  %835 = vrot.lane.b32.xlu0 %v827_v34, %s3022_s25  ;;  %v922_v3 = vstv %s2743_s30  ;;  %s2753_s30 = sld [smem:[#allocation8 + $0x2a]] }
 0x1aa   :  { %v3478_v29 = vpop.permute.xlu2 %625  ;;  %v925_v62 = vmul.f32 %v922_v3, %v3498_v9  ;;  %v924_v38 = vmul.f32 %v922_v3, %v3514_v18 }
 0x1ab   :  { %4893 = vst [vmem:[#allocation34_spill] sm:$0xff] %v3478_v29  ;;  %v3480_v63 = vpop.permute.xlu1 %575  ;;  %v3482_v51 = vpop.permute.xlu0 %549  ;;  %v3566_v29 = vld [vmem:[#allocation2 + $0xd] sm:$0xff] }
 0x1ac   :  { %4894 = vst [vmem:[#allocation35_spill] sm:$0xff] %v3480_v63  ;;  %v1033_v63 = vmul.f32 %v1030_v30, %v3552_v19 }
 0x1ad   :  { %4895 = vst [vmem:[#allocation36_spill] sm:$0xff] %v3482_v51 }
 0x1b0   :  { %863 = vrot.lane.b32.xlu2 %v854_v40, %s3022_s25  ;;  %v923_v40 = vmul.f32 %v922_v3, %v3492_v2 }
 0x1b1   :  { %867 = vrot.lane.b32.xlu1 %v856_v56, %s3022_s25  ;;  %841 = vrot.lane.b32.xlu0 %v830_v37, %s3022_s25  ;;  %v3508_v56 = vld [vmem:[#allocation2 + $0x3c] sm:$0xff] }
 0x1b2   :  { %v3490_v34 = vpop.permute.xlu2 %649 }
 0x1b3   :  { %4896 = vst [vmem:[#allocation37_spill] sm:$0xff] %v3490_v34  ;;  %v3494_v50 = vpop.permute.xlu1 %599  ;;  %v3496_v51 = vpop.permute.xlu0 %573  ;;  %v948_v34 = vstv %s2744_s4  ;;  %s2754_s4 = sld [smem:[#allocation8 + $0x2b]] }
 0x1b4   :  { %4897 = vst [vmem:[#allocation38_spill] sm:$0xff] %v3494_v50  ;;  %v950_v24 = vmul.f32 %v948_v34, %v3514_v18  ;;  %v951_v55 = vmul.f32 %v948_v34, %v3498_v9  ;;  %v949_v52 = vmul.f32 %v948_v34, %v3492_v2  ;;  %v952_v36 = vmul.f32 %v948_v34, %v3508_v56 }
 0x1b5   :  { %v1007_v34 = vmul.f32 %v1004_v39, %v3552_v19 }
 0x1b8   :  { %931 = vrot.lane.b32.xlu2 %v923_v40, %s3015_s23  ;;  %v926_v40 = vmul.f32 %v922_v3, %v3508_v56 }
 0x1b9   :  { %935 = vrot.lane.b32.xlu1 %v925_v62, %s3015_s23  ;;  %865 = vrot.lane.b32.xlu0 %v855_v15, %s3022_s25 }
 0x1ba   :  { %v3506_v37 = vpop.permute.xlu2 %655 }
 0x1bb   :  { %4898 = vst [vmem:[#allocation39_spill] sm:$0xff] %v3506_v37  ;;  %v3510_v46 = vpop.permute.xlu1 %623  ;;  %v3512_v27 = vpop.permute.xlu0 %597 }
 0x1bc   :  { %4899 = vst [vmem:[#allocation40_spill] sm:$0xff] %v3510_v46  ;;  %v974_v46 = vstv %s2745_s5  ;;  %s2755_s5 = sld [smem:[#allocation8 + $0x2c]] }
 0x1c0   :  { %937 = vrot.lane.b32.xlu2 %v926_v40, %s3015_s23  ;;  %v975_v40 = vmul.f32 %v974_v46, %v3492_v2 }
 0x1c1   :  { %959 = vrot.lane.b32.xlu1 %v950_v24, %s3015_s23  ;;  %933 = vrot.lane.b32.xlu0 %v924_v38, %s3015_s23 }
 0x1c2   :  { %v3522_v62 = vpop.permute.xlu2 %679 }
 0x1c3   :  { %4900 = vst [vmem:[#allocation41_spill] sm:$0xff] %v3522_v62  ;;  %v3524_v15 = vpop.permute.xlu1 %629  ;;  %v3526_v37 = vpop.permute.xlu0 %603  ;;  %v3582_v62 = vstv %s2712_s11  ;;  %s2759_s11 = sld [smem:[#allocation8 + $0x30]] }
 0x1c4   :  { %4901 = vst [vmem:[#allocation42_spill] sm:$0xff] %v3524_v15  ;;  %v976_v15 = vmul.f32 %v974_v46, %v3514_v18 }
 0x1c8   :  { %961 = vrot.lane.b32.xlu2 %v951_v55, %s3015_s23  ;;  %v978_v55 = vmul.f32 %v974_v46, %v3508_v56 }
 0x1c9   :  { %983 = vrot.lane.b32.xlu1 %v975_v40, %s3015_s23  ;;  %957 = vrot.lane.b32.xlu0 %v949_v52, %s3015_s23  ;;  %v3548_v40 = vld [vmem:[#allocation2 + $0x5] sm:$0xff] }
 0x1ca   :  { %v3534_v3 = vpop.permute.xlu2 %707 }
 0x1cb   :  { %4902 = vst [vmem:[#allocation43_spill] sm:$0xff] %v3534_v3  ;;  %v3536_v24 = vpop.permute.xlu1 %653  ;;  %v3538_v38 = vpop.permute.xlu0 %627 }
 0x1cc   :  { %4903 = vst [vmem:[#allocation44_spill] sm:$0xff] %v3536_v24 }
 0x1d0   :  { %985 = vrot.lane.b32.xlu2 %v976_v15, %s3015_s23  ;;  %v1005_v15 = vmul.f32 %v1004_v39, %v3548_v40 }
 0x1d1   :  { %989 = vrot.lane.b32.xlu1 %v978_v55, %s3015_s23  ;;  %963 = vrot.lane.b32.xlu0 %v952_v36, %s3015_s23  ;;  %v977_v36 = vmul.f32 %v974_v46, %v3498_v9 }
 0x1d2   :  { %v3546_v52 = vpop.permute.xlu2 %731 }
 0x1d3   :  { %4904 = vst [vmem:[#allocation45_spill] sm:$0xff] %v3546_v52  ;;  %v678_v24 = vpop.permute.xlu1 %677  ;;  %v3550_v3 = vpop.permute.xlu0 %651  ;;  %v3562_v52 = vld [vmem:[#allocation2 + $0x3d] sm:$0xff] }
 0x1d4   :  { %4905 = vst [vmem:[#allocation46_spill] sm:$0xff] %v3550_v3  ;;  %v1008_v46 = vmul.f32 %v1004_v39, %v3562_v52 }
 0x1d8   :  { %1013 = vrot.lane.b32.xlu2 %v1005_v15, %s3013_s0  ;;  %v3568_v15 = vstv %s197_s9  ;;  %s2758_s9 = sld [smem:[#allocation8 + $0x2f]] }
 0x1d9   :  { %1017 = vrot.lane.b32.xlu1 %v1007_v34, %s3013_s0  ;;  %987 = vrot.lane.b32.xlu0 %v977_v36, %s3015_s23  ;;  %v204_v34 = vmul.f32 %v3568_v15, %v3171_v0  ;;  %v1032_v36 = vmul.f32 %v1030_v30, %v3566_v29 }
 0x1da   :  { %v3560_v55 = vpop.permute.xlu2 %737 }
 0x1db   :  { %4906 = vst [vmem:[#allocation47_spill] sm:$0xff] %v3560_v55  ;;  %v706_v11 = vpop.permute.xlu1 %705  ;;  %v3564_v50 = vpop.permute.xlu0 %675  ;;  %v1006_v55 = vmul.f32 %v1004_v39, %v3566_v29  ;;  %v264_v7 = vadd.f32 %v3294_v14, %v204_v34  ;;  %v1056_v39 = vstv %s2748_s12  ;;  %v213_v14 = vmul.f32 %v3582_v62, %v3163_v60  ;;  %s2760_s12 = sld [smem:[#allocation8 + $0x31]] }
 0x1dc   :  { %v3596_v34 = vstv %s2739_s14  ;;  %s2761_s14 = sld [smem:[#allocation8 + $0x32]] }
 0x1dd   :  { %v372_v33 = vadd.f32 %v3340_v41, %v264_v7  ;;  %v1057_v41 = vmul.f32 %v1056_v39, %v3548_v40  ;;  %v1031_v7 = vmul.f32 %v1030_v30, %v3548_v40 }
 0x1df   :  { %v476_v6 = vadd.f32 %v3376_v8, %v372_v33 }
 0x1e0   :  { %1019 = vrot.lane.b32.xlu2 %v1008_v46, %s3013_s0 }
 0x1e1   :  { %1041 = vrot.lane.b32.xlu1 %v1032_v36, %s3016_s29  ;;  %1015 = vrot.lane.b32.xlu0 %v1006_v55, %s3013_s0  ;;  %v584_v55 = vadd.f32 %v3496_v51, %v476_v6  ;;  %v289_v36 = vadd.f32 %v3306_v20, %v213_v14  ;;  %v216_v14 = vmul.f32 %v3582_v62, %v3168_v25 }
 0x1e2   :  { %v3579_v23 = vpop.permute.xlu2 %761 }
 0x1e3   :  { %4907 = vst [vmem:[#allocation48_spill] sm:$0xff] %v3579_v23  ;;  %v3584_v13 = vpop.permute.xlu1 %711  ;;  %v3586_v46 = vpop.permute.xlu0 %681  ;;  %v688_v33 = vadd.f32 %v678_v24, %v584_v55  ;;  %v397_v6 = vadd.f32 %v3352_v47, %v289_v36  ;;  %v1058_v24 = vmul.f32 %v1056_v39, %v3566_v29  ;;  %v1060_v55 = vmul.f32 %v1056_v39, %v3562_v52 }
 0x1e4   :  { %v292_v36 = vadd.f32 %v3318_v28, %v216_v14 }
 0x1e5   :  { %v501_v3 = vadd.f32 %v3392_v17, %v397_v6  ;;  %v203_v17 = vmul.f32 %v3568_v15, %v3163_v60 }
 0x1e7   :  { %v609_v47 = vadd.f32 %v3512_v27, %v501_v3  ;;  %v1082_v27 = vstv %s2749_s16  ;;  %v263_v3 = vadd.f32 %v3248_v48, %v203_v17  ;;  %v3639_v48 = vstv %s2713_s17  ;;  %s2763_s16 = sld [smem:[#allocation8 + $0x34]] }
 0x1e8   :  { %1043 = vrot.lane.b32.xlu2 %v1033_v63, %s3016_s29  ;;  %v884_v63 = vmul.f32 %v3596_v34, %v3514_v18  ;;  %v1083_v14 = vmul.f32 %v1082_v27, %v3548_v40  ;;  %s2764_s17 = sld [smem:[#allocation8 + $0x35]] }
 0x1e9   :  { %1065 = vrot.lane.b32.xlu1 %v1057_v41, %s3016_s29  ;;  %1039 = vrot.lane.b32.xlu0 %v1031_v7, %s3016_s29  ;;  %v1034_v41 = vmul.f32 %v1030_v30, %v3562_v52  ;;  %v3618_v7 = vstv %s2740_s15  ;;  %v400_v30 = vadd.f32 %v3364_v58, %v292_v36  ;;  %v225_v58 = vmul.f32 %v3639_v48, %v3157_v57  ;;  %s2762_s15 = sld [smem:[#allocation8 + $0x33]] }
 0x1ea   :  { %v786_v8 = vpop.permute.xlu2 %785 }
 0x1eb   :  { %v796_v51 = vadd.f32 %v786_v8, %v688_v33  ;;  %v3604_v23 = vpop.permute.xlu1 %735  ;;  %v3606_v16 = vpop.permute.xlu0 %709  ;;  %v717_v33 = vadd.f32 %v706_v11, %v609_v47  ;;  %v371_v11 = vadd.f32 %v3354_v49, %v263_v3  ;;  %v1085_v49 = vmul.f32 %v1082_v27, %v3552_v19 }
 0x1ec   :  { %v317_v17 = vadd.f32 %v3330_v35, %v225_v58  ;;  %v3664_v35 = vstv %s3626_s22  ;;  %s2765_s22 = sld [smem:[#allocation8 + $0x36]] }
 0x1ed   :  { %v3609_v20 = vadd.f32 %v884_v63, %v796_v51  ;;  %v893_v51 = vmul.f32 %v3618_v7, %v3492_v2  ;;  %v504_v63 = vadd.f32 %v3406_v31, %v400_v30  ;;  %v475_v47 = vadd.f32 %v3408_v32, %v371_v11 }
 0x1ee   :  { %v1059_v31 = vmul.f32 %v1056_v39, %v3552_v19  ;;  %v425_v39 = vadd.f32 %v3380_v10, %v317_v17  ;;  %v3668_v30 = vstv %s2750_s1  ;;  %v234_v11 = vmul.f32 %v3664_v35, %v3171_v0  ;;  %s2766_s1 = sld [smem:[#allocation8 + $0x37]] }
 0x1ef   :  { %v583_v36 = vadd.f32 %v3442_v21, %v475_v47 }
 0x1f0   :  { %1067 = vrot.lane.b32.xlu2 %v1058_v24, %s3016_s29  ;;  %v533_v10 = vadd.f32 %v3418_v44, %v425_v39  ;;  %v1110_v44 = vmul.f32 %v3668_v30, %v3566_v29 }
 0x1f1   :  { %1071 = vrot.lane.b32.xlu1 %v1060_v55, %s3016_s29  ;;  %1045 = vrot.lane.b32.xlu0 %v1034_v41, %s3016_s29  ;;  %v612_v55 = vadd.f32 %v3526_v37, %v504_v63  ;;  %v206_v41 = vmul.f32 %v3568_v15, %v3168_v25  ;;  %v687_v25 = vadd.f32 %v3564_v50, %v583_v36 }
 0x1f2   :  { %v810_v8 = vpop.permute.xlu2 %809  ;;  %v1086_v63 = vmul.f32 %v1082_v27, %v3562_v52  ;;  %v637_v58 = vadd.f32 %v3538_v38, %v533_v10  ;;  %v4911_v10 = vld [vmem:[#allocation31_spill] sm:$0xff] }
 0x1f3   :  { %v821_v6 = vadd.f32 %v810_v8, %v717_v33  ;;  %v3631_v60 = vpop.permute.xlu1 %759  ;;  %v3633_v28 = vpop.permute.xlu0 %733  ;;  %v720_v32 = vadd.f32 %v3584_v13, %v612_v55  ;;  %v896_v33 = vmul.f32 %v3618_v7, %v3508_v56  ;;  %v266_v8 = vadd.f32 %v3256_v53, %v206_v41 }
 0x1f4   :  { %v3686_v55 = vstv %s3646_s24  ;;  %v745_v41 = vadd.f32 %v3604_v23, %v637_v58  ;;  %v4913_v58 = vld [vmem:[#allocation13_spill] sm:$0xff]  ;;  %s2771_s24 = sld [smem:[#allocation8 + $0x3c]] }
 0x1f5   :  { %v3637_v24 = vadd.f32 %v893_v51, %v821_v6  ;;  %v883_v6 = vmul.f32 %v3596_v34, %v3492_v2  ;;  %v374_v53 = vadd.f32 %v3366_v59, %v266_v8  ;;  %v205_v59 = vmul.f32 %v3568_v15, %v3157_v57 }
 0x1f7   :  { %v265_v15 = vadd.f32 %v3278_v5, %v205_v59  ;;  %v3713_v5 = vstv %s3670_s26  ;;  %s2772_s26 = sld [smem:[#allocation8 + $0x3d]] }
 0x1f8   :  { %1091 = vrot.lane.b32.xlu2 %v1083_v14, %s3016_s29  ;;  %v478_v14 = vadd.f32 %v3420_v45, %v374_v53  ;;  %v346_v45 = vadd.f32 %v3342_v42, %v234_v11  ;;  %v1135_v53 = vmul.f32 %v3713_v5, %v3548_v40 }
 0x1f9   :  { %1095 = vrot.lane.b32.xlu1 %v1085_v49, %s3016_s29  ;;  %1069 = vrot.lane.b32.xlu0 %v1059_v31, %s3016_s29  ;;  %v1084_v49 = vmul.f32 %v1082_v27, %v3566_v29  ;;  %v215_v31 = vmul.f32 %v3582_v62, %v3157_v57  ;;  %v905_v27 = vmul.f32 %v3686_v55, %v3498_v9 }
 0x1fa   :  { %v816_v37 = vpop.permute.xlu2 %815  ;;  %v586_v38 = vadd.f32 %v3454_v43, %v478_v14  ;;  %v450_v42 = vadd.f32 %v3394_v22, %v346_v45  ;;  %v373_v23 = vadd.f32 %v3314_v26, %v265_v15  ;;  %v3741_v14 = vstv %s3699_s27  ;;  %s2773_s27 = sld [smem:[#allocation8 + $0x3e]] }
 0x1fb   :  { %v824_v3 = vadd.f32 %v816_v37, %v720_v32  ;;  %v784_v21 = vpop.permute.xlu1 %783  ;;  %v3666_v13 = vpop.permute.xlu0 %757  ;;  %v291_v57 = vadd.f32 %v3266_v61, %v215_v31  ;;  %v895_v15 = vmul.f32 %v3618_v7, %v3498_v9 }
 0x1fc   :  { %v795_v51 = vadd.f32 %v784_v21, %v687_v25  ;;  %v690_v43 = vadd.f32 %v3586_v46, %v586_v38  ;;  %v558_v39 = vadd.f32 %v3430_v1, %v450_v42  ;;  %v1111_v46 = vmul.f32 %v3668_v30, %v3552_v19 }
 0x1fd   :  { %v3676_v50 = vadd.f32 %v896_v33, %v824_v3  ;;  %v886_v33 = vmul.f32 %v3596_v34, %v3508_v56  ;;  %v399_v8 = vadd.f32 %v3382_v12, %v291_v57  ;;  %v477_v25 = vadd.f32 %v3434_v4, %v373_v23  ;;  %v4910_v3 = vld [vmem:[#allocation46_spill] sm:$0xff]  ;;  %v4916_v57 = vld [vmem:[#allocation19_spill] sm:$0xff] }
 0x1fe   :  { %v3683_v47 = vadd.f32 %v883_v6, %v795_v51  ;;  %v662_v21 = vadd.f32 %v4910_v3, %v558_v39  ;;  %v224_v12 = vmul.f32 %v3639_v48, %v3171_v0  ;;  %v214_v1 = vmul.f32 %v3582_v62, %v3171_v0  ;;  %v4912_v51 = vld [vmem:[#allocation35_spill] sm:$0xff] }
 0x1ff   :  { %4908 = vst [vmem:[#allocation49_spill] sm:$0xff] %v3676_v50  ;;  %v503_v26 = vadd.f32 %v3432_v54, %v399_v8  ;;  %v1109_v54 = vmul.f32 %v3668_v30, %v3548_v40  ;;  %v585_v11 = vadd.f32 %v4912_v51, %v477_v25  ;;  %v4914_v62 = vld [vmem:[#allocation15_spill] sm:$0xff]  ;;  %v1138_v25 = vmul.f32 %v3713_v5, %v3562_v52 }
 0x200   :  { %1097 = vrot.lane.b32.xlu2 %v1086_v63, %s3016_s29  ;;  %v770_v63 = vadd.f32 %v3631_v60, %v662_v21  ;;  %v316_v59 = vadd.f32 %v4913_v58, %v224_v12  ;;  %v4919_v8 = vld [vmem:[#allocation27_spill] sm:$0xff]  ;;  %v1112_v3 = vmul.f32 %v3668_v30, %v3562_v52  ;;  %v2940_v21 = vld [vmem:[#allocation2] sm:$0xff] }
 0x201   :  { %1119 = vrot.lane.b32.xlu1 %v1110_v44, %s3016_s29  ;;  %1093 = vrot.lane.b32.xlu0 %v1084_v49, %s3016_s29  ;;  %v611_v4 = vadd.f32 %v4911_v10, %v503_v26  ;;  %v290_v44 = vadd.f32 %v4914_v62, %v214_v1  ;;  %v4915_v49 = vld [vmem:[#allocation41_spill] sm:$0xff]  ;;  %v233_v12 = vmul.f32 %v2940_v21, %v3664_v35  ;;  %v4922_v10 = vld [vmem:[#allocation38_spill] sm:$0xff] }
 0x202   :  { %v840_v17 = vpop.permute.xlu2 %839  ;;  %v689_v31 = vadd.f32 %v4915_v49, %v585_v11  ;;  %v223_v1 = vmul.f32 %v2940_v21, %v3639_v48  ;;  %v1160_v11 = vstv %s3746_s28  ;;  %s2774_s28 = sld [smem:[#allocation8 + $0x3f]] }
 0x203   :  { %v849_v36 = vadd.f32 %v840_v17, %v745_v41  ;;  %v790_v32 = vpop.permute.xlu1 %789  ;;  %v3710_v37 = vpop.permute.xlu0 %763  ;;  %v719_v45 = vadd.f32 %v3606_v16, %v611_v4  ;;  %v885_v17 = vmul.f32 %v3596_v34, %v3498_v9  ;;  %v398_v42 = vadd.f32 %v4916_v57, %v290_v44 }
 0x204   :  { %v798_v61 = vadd.f32 %v790_v32, %v690_v43  ;;  %v4917_v43 = vld [vmem:[#allocation24_spill] sm:$0xff]  ;;  %v1136_v16 = vmul.f32 %v3713_v5, %v3566_v29 }
 0x205   :  { %v3719_v22 = vadd.f32 %v905_v27, %v849_v36  ;;  %v914_v27 = vmul.f32 %v3741_v14, %v3514_v18  ;;  %v424_v36 = vadd.f32 %v4917_v43, %v316_v59  ;;  %v4924_v59 = vld [vmem:[#allocation17_spill] sm:$0xff] }
 0x206   :  { %v3726_v6 = vadd.f32 %v886_v33, %v798_v61  ;;  %v4920_v61 = vld [vmem:[#allocation28_spill] sm:$0xff]  ;;  %v315_v30 = vadd.f32 %v4924_v59, %v223_v1  ;;  %v4928_v43 = vld [vmem:[#allocation29_spill] sm:$0xff]  ;;  %v903_v59 = vmul.f32 %v3686_v55, %v3492_v2 }
 0x207   :  { %4909 = vst [vmem:[#allocation50_spill] sm:$0xff] %v3719_v22  ;;  %v532_v39 = vadd.f32 %v4919_v8, %v424_v36  ;;  %v2941_v8 = vld [vmem:[#allocation2 + $0x38] sm:$0xff] }
 0x208   :  { %1121 = vrot.lane.b32.xlu2 %v1111_v46, %s3016_s29  ;;  %v502_v46 = vadd.f32 %v4920_v61, %v398_v42  ;;  %v1161_v42 = vmul.f32 %v1160_v11, %v3548_v40  ;;  %v226_v40 = vmul.f32 %v2941_v8, %v3639_v48  ;;  %v4930_v61 = vld [vmem:[#allocation37_spill] sm:$0xff] }
 0x209   :  { %1143 = vrot.lane.b32.xlu1 %v1135_v53, %s3017_s6  ;;  %1117 = vrot.lane.b32.xlu0 %v1109_v54, %s3016_s29  ;;  %v4921_v53 = vld [vmem:[#allocation34_spill] sm:$0xff] }
 0x20a   :  { %v864_v0 = vpop.permute.xlu2 %863  ;;  %v636_v54 = vadd.f32 %v4921_v53, %v532_v39  ;;  %v610_v4 = vadd.f32 %v4922_v10, %v502_v46  ;;  %v236_v39 = vmul.f32 %v2941_v8, %v3664_v35  ;;  %v4933_v53 = vld [vmem:[#allocation18_spill] sm:$0xff] }
 0x20b   :  { %v874_v38 = vadd.f32 %v864_v0, %v770_v63  ;;  %v814_v41 = vpop.permute.xlu1 %813  ;;  %v788_v60 = vpop.permute.xlu0 %787  ;;  %v4923_v63 = vld [vmem:[#allocation14_spill] sm:$0xff]  ;;  %v4925_v0 = vld [vmem:[#allocation43_spill] sm:$0xff] }
 0x20c   :  { %v823_v23 = vadd.f32 %v814_v41, %v719_v45  ;;  %v797_v32 = vadd.f32 %v788_v60, %v689_v31  ;;  %v345_v58 = vadd.f32 %v4923_v63, %v233_v12  ;;  %v718_v62 = vadd.f32 %v4925_v0, %v610_v4  ;;  %v4926_v41 = vld [vmem:[#allocation21_spill] sm:$0xff]  ;;  %v4932_v12 = vld [vmem:[#allocation16_spill] sm:$0xff] }
 0x20d   :  { %v3761_v33 = vadd.f32 %v914_v27, %v874_v38  ;;  %v744_v44 = vadd.f32 %v3633_v28, %v636_v54  ;;  %v904_v45 = vmul.f32 %v3686_v55, %v3514_v18  ;;  %v894_v38 = vmul.f32 %v3618_v7, %v3514_v18  ;;  %v4929_v28 = vld [vmem:[#allocation30_spill] sm:$0xff] }
 0x20e   :  { %v3765_v34 = vadd.f32 %v895_v15, %v823_v23  ;;  %v3767_v26 = vadd.f32 %v885_v17, %v797_v32  ;;  %v423_v60 = vadd.f32 %v4926_v41, %v315_v30  ;;  %v4927_v15 = vld [vmem:[#allocation25_spill] sm:$0xff]  ;;  %v1163_v18 = vmul.f32 %v1160_v11, %v3552_v19  ;;  %v4935_v30 = vld [vmem:[#allocation22_spill] sm:$0xff] }
 0x20f   :  { %4918 = vst [vmem:[#allocation46_spill] sm:$0xff] %v3761_v33  ;;  %v449_v17 = vadd.f32 %v4927_v15, %v345_v58  ;;  %v1137_v7 = vmul.f32 %v3713_v5, %v3552_v19  ;;  %v348_v1 = vadd.f32 %v4932_v12, %v236_v39  ;;  %v318_v54 = vadd.f32 %v4933_v53, %v226_v40  ;;  %v4934_v19 = vld [vmem:[#allocation45_spill] sm:$0xff]  ;;  %v4944_v39 = vld [vmem:[#allocation47_spill] sm:$0xff] }
 0x210   :  { %1145 = vrot.lane.b32.xlu2 %v1136_v16, %s3017_s6  ;;  %v531_v23 = vadd.f32 %v4929_v28, %v423_v60  ;;  %v1190_v63 = vstv %s2753_s30  ;;  %v913_v58 = vmul.f32 %v3741_v14, %v3492_v2  ;;  %v4938_v60 = vld [vmem:[#allocation33_spill] sm:$0xff]  ;;  %s2775_s30 = sld [smem:[#allocation8 + $0x40]] }
 0x211   :  { %1149 = vrot.lane.b32.xlu1 %v1138_v25, %s3017_s6  ;;  %1123 = vrot.lane.b32.xlu0 %v1112_v3, %s3016_s29  ;;  %v557_v36 = vadd.f32 %v4928_v43, %v449_v17  ;;  %v4931_v25 = vld [vmem:[#allocation40_spill] sm:$0xff]  ;;  %v426_v0 = vadd.f32 %v4935_v30, %v318_v54  ;;  %v3849_v54 = vld [vmem:[#allocation2 + $0x6] sm:$0xff] }
 0x212   :  { %v3780_v51 = vpop.permute.xlu2 %931  ;;  %v635_v3 = vadd.f32 %v4931_v25, %v531_v23  ;;  %v916_v25 = vmul.f32 %v3741_v14, %v3508_v56  ;;  %v4949_v30 = vld [vmem:[#allocation44_spill] sm:$0xff] }
 0x213   :  { %v838_v49 = vpop.permute.xlu1 %837  ;;  %v812_v31 = vpop.permute.xlu0 %811  ;;  %v661_v46 = vadd.f32 %v4930_v61, %v557_v36  ;;  %v534_v15 = vadd.f32 %v4938_v60, %v426_v0  ;;  %v4941_v36 = vld [vmem:[#allocation39_spill] sm:$0xff] }
 0x214   :  { %v848_v27 = vadd.f32 %v838_v49, %v744_v44  ;;  %v822_v57 = vadd.f32 %v812_v31, %v718_v62  ;;  %v743_v5 = vadd.f32 %v4934_v19, %v635_v3  ;;  %v4936_v62 = vld [vmem:[#allocation26_spill] sm:$0xff]  ;;  %v4945_v3 = vld [vmem:[#allocation23_spill] sm:$0xff]  ;;  %v906_v19 = vmul.f32 %v3686_v55, %v3508_v56  ;;  %v4950_v55 = vld [vmem:[#allocation48_spill] sm:$0xff] }
 0x215   :  { %v769_v10 = vadd.f32 %v3666_v13, %v661_v46  ;;  %v452_v44 = vadd.f32 %v4936_v62, %v348_v1  ;;  %v1164_v13 = vmul.f32 %v1160_v11, %v3562_v52  ;;  %v4942_v52 = vld [vmem:[#allocation42_spill] sm:$0xff]  ;;  %v1216_v46 = vstv %s2754_s4  ;;  %s2776_s4 = sld [smem:[#allocation8 + $0x41]] }
 0x216   :  { %v3796_v32 = vadd.f32 %v904_v45, %v848_v27  ;;  %v3798_v16 = vadd.f32 %v894_v38, %v822_v57  ;;  %v3822_v45 = vld [vmem:[#allocation2 + $0xe] sm:$0xff]  ;;  %v4937_v38 = vld [vmem:[#allocation32_spill] sm:$0xff]  ;;  %v1162_v57 = vmul.f32 %v1160_v11, %v3566_v29  ;;  %v638_v23 = vadd.f32 %v4942_v52, %v534_v15 }
 0x217   :  { %v560_v41 = vadd.f32 %v4937_v38, %v452_v44  ;;  %v1192_v2 = vmul.f32 %v1190_v63, %v3822_v45  ;;  %v3844_v29 = vld [vmem:[#allocation2 + $0x36] sm:$0xff]  ;;  %v915_v38 = vmul.f32 %v3741_v14, %v3498_v9 }
 0x218   :  { %1169 = vrot.lane.b32.xlu2 %v1161_v42, %s3017_s6  ;;  %v2942_v42 = vld [vmem:[#allocation2 + $0x30] sm:$0xff]  ;;  %v746_v40 = vadd.f32 %v4944_v39, %v638_v23 }
 0x219   :  { %1173 = vrot.lane.b32.xlu1 %v1163_v18, %s3017_s6  ;;  %1147 = vrot.lane.b32.xlu0 %v1137_v7, %s3017_s6  ;;  %v235_v43 = vmul.f32 %v2942_v42, %v3664_v35  ;;  %v664_v28 = vadd.f32 %v4941_v36, %v560_v41  ;;  %v4943_v7 = vld [vmem:[#allocation20_spill] sm:$0xff]  ;;  %v1218_v41 = vmul.f32 %v1216_v46, %v3822_v45  ;;  %v1242_v42 = vstv %s2755_s5  ;;  %s2777_s5 = sld [smem:[#allocation8 + $0x42]] }
 0x21a   :  { %v3810_v21 = vpop.permute.xlu2 %937  ;;  %v1243_v14 = vmul.f32 %v1242_v42, %v3849_v54  ;;  %v1245_v36 = vmul.f32 %v1242_v42, %v3844_v29 }
 0x21b   :  { %v862_v4 = vpop.permute.xlu1 %861  ;;  %v836_v48 = vpop.permute.xlu0 %835  ;;  %v347_v8 = vadd.f32 %v4943_v7, %v235_v43  ;;  %v772_v61 = vadd.f32 %v3710_v37, %v664_v28  ;;  %v4946_v37 = vld [vmem:[#allocation36_spill] sm:$0xff]  ;;  %v1268_v7 = vstv %s2756_s7  ;;  %s2767_s7 = sld [smem:[#allocation8 + $0x38]] }
 0x21c   :  { %v873_v49 = vadd.f32 %v862_v4, %v769_v10  ;;  %v847_v31 = vadd.f32 %v836_v48, %v743_v5  ;;  %v1193_v5 = vmul.f32 %v1190_v63, %v3844_v29  ;;  %v1270_v39 = vmul.f32 %v1268_v7, %v3822_v45 }
 0x21d   :  { %v451_v12 = vadd.f32 %v4945_v3, %v347_v8 }
 0x21e   :  { %v3827_v17 = vadd.f32 %v913_v58, %v873_v49  ;;  %v3829_v27 = vadd.f32 %v903_v59, %v847_v31  ;;  %v1217_v58 = vmul.f32 %v1216_v46, %v3849_v54  ;;  %v1191_v59 = vmul.f32 %v1190_v63, %v3849_v54 }
 0x21f   :  { %v559_v10 = vadd.f32 %v4946_v37, %v451_v12  ;;  %v1269_v12 = vmul.f32 %v1268_v7, %v3849_v54 }
 0x220   :  { %4939 = vst [vmem:[#allocation31_spill] sm:$0xff] %v3827_v17  ;;  %1175 = vrot.lane.b32.xlu2 %v1164_v13, %s3017_s6  ;;  %v3870_v13 = vld [vmem:[#allocation2 + $0x3e] sm:$0xff]  ;;  %v1762_v17 = vstv %s2777_s5  ;;  %s2793_s5 = sld [smem:[#allocation8 + $0x52]] }
 0x221   :  { %4940 = vst [vmem:[#allocation35_spill] sm:$0xff] %v3829_v27  ;;  %1201 = vrot.lane.b32.xlu1 %v1192_v2, %s3018_s10  ;;  %1171 = vrot.lane.b32.xlu0 %v1162_v57, %s3017_s6  ;;  %v663_v0 = vadd.f32 %v4949_v30, %v559_v10  ;;  %v1220_v15 = vmul.f32 %v1216_v46, %v3870_v13 }
 0x222   :  { %v3839_v18 = vpop.permute.xlu2 %961  ;;  %v1194_v2 = vmul.f32 %v1190_v63, %v3870_v13  ;;  %v1219_v63 = vmul.f32 %v1216_v46, %v3844_v29  ;;  %v1246_v8 = vmul.f32 %v1242_v42, %v3870_v13  ;;  %v1294_v46 = vstv %s2757_s8  ;;  %s2778_s8 = sld [smem:[#allocation8 + $0x43]] }
 0x223   :  { %v868_v11 = vpop.permute.xlu1 %867  ;;  %v842_v35 = vpop.permute.xlu0 %841  ;;  %v771_v62 = vadd.f32 %v4950_v55, %v663_v0  ;;  %v1295_v3 = vmul.f32 %v1294_v46, %v3849_v54  ;;  %v1298_v37 = vmul.f32 %v1294_v46, %v3870_v13  ;;  %v1272_v10 = vmul.f32 %v1268_v7, %v3870_v13 }
 0x224   :  { %v876_v1 = vadd.f32 %v868_v11, %v772_v61  ;;  %v850_v53 = vadd.f32 %v842_v35, %v746_v40  ;;  %v1244_v40 = vmul.f32 %v1242_v42, %v3822_v45 }
 0x226   :  { %v3855_v4 = vadd.f32 %v916_v25, %v876_v1  ;;  %v3857_v48 = vadd.f32 %v906_v19, %v850_v53  ;;  %v1271_v25 = vmul.f32 %v1268_v7, %v3844_v29 }
 0x228   :  { %4947 = vst [vmem:[#allocation13_spill] sm:$0xff] %v3855_v4  ;;  %1203 = vrot.lane.b32.xlu2 %v1193_v5, %s3018_s10  ;;  %v1296_v5 = vmul.f32 %v1294_v46, %v3822_v45 }
 0x229   :  { %4948 = vst [vmem:[#allocation15_spill] sm:$0xff] %v3857_v48  ;;  %1225 = vrot.lane.b32.xlu1 %v1217_v58, %s3018_s10  ;;  %1199 = vrot.lane.b32.xlu0 %v1191_v59, %s3018_s10  ;;  %v1320_v59 = vstv %s2758_s9  ;;  %v1602_v48 = vstv %s2771_s24  ;;  %s2779_s9 = sld [smem:[#allocation8 + $0x44]] }
 0x22a   :  { %v3865_v56 = vpop.permute.xlu2 %985  ;;  %v1321_v55 = vmul.f32 %v1320_v59, %v3849_v54  ;;  %s2785_s24 = sld [smem:[#allocation8 + $0x4a]] }
 0x22b   :  { %v3868_v44 = vpop.permute.xlu1 %935  ;;  %v866_v49 = vpop.permute.xlu0 %865 }
 0x22c   :  { %v875_v31 = vadd.f32 %v866_v49, %v771_v62  ;;  %v1323_v62 = vmul.f32 %v1320_v59, %v3844_v29  ;;  %v1297_v49 = vmul.f32 %v1294_v46, %v3844_v29 }
 0x22e   :  { %v3875_v60 = vadd.f32 %v915_v38, %v875_v31 }
 0x230   :  { %4951 = vst [vmem:[#allocation41_spill] sm:$0xff] %v3875_v60  ;;  %1227 = vrot.lane.b32.xlu2 %v1218_v41, %s3018_s10 }
 0x231   :  { %1231 = vrot.lane.b32.xlu1 %v1220_v15, %s3018_s10  ;;  %1205 = vrot.lane.b32.xlu0 %v1194_v2, %s3018_s10  ;;  %v1346_v15 = vstv %s2759_s11  ;;  %v1324_v2 = vmul.f32 %v1320_v59, %v3870_v13  ;;  %s2768_s11 = sld [smem:[#allocation8 + $0x39]] }
 0x232   :  { %v3882_v57 = vpop.permute.xlu2 %1013  ;;  %v1348_v42 = vmul.f32 %v1346_v15, %v3822_v45 }
 0x233   :  { %4952 = vst [vmem:[#allocation19_spill] sm:$0xff] %v3882_v57  ;;  %v3884_v43 = vpop.permute.xlu1 %959  ;;  %v3886_v9 = vpop.permute.xlu0 %933 }
 0x238   :  { %1251 = vrot.lane.b32.xlu2 %v1243_v14, %s3019_s13  ;;  %v1322_v14 = vmul.f32 %v1320_v59, %v3822_v45  ;;  %v1347_v45 = vmul.f32 %v1346_v15, %v3849_v54 }
 0x239   :  { %1255 = vrot.lane.b32.xlu1 %v1245_v36, %s3019_s13  ;;  %1229 = vrot.lane.b32.xlu0 %v1219_v63, %s3018_s10 }
 0x23a   :  { %v3894_v28 = vpop.permute.xlu2 %1019 }
 0x23b   :  { %4953 = vst [vmem:[#allocation24_spill] sm:$0xff] %v3894_v28  ;;  %v3896_v52 = vpop.permute.xlu1 %983  ;;  %v3898_v23 = vpop.permute.xlu0 %957 }
 0x23c   :  { %4954 = vst [vmem:[#allocation27_spill] sm:$0xff] %v3896_v52  ;;  %v1736_v52 = vstv %s2776_s4  ;;  %s2792_s4 = sld [smem:[#allocation8 + $0x51]] }
 0x240   :  { %1257 = vrot.lane.b32.xlu2 %v1246_v8, %s3019_s13  ;;  %v3960_v8 = vld [vmem:[#allocation2 + $0x18] sm:$0xff] }
 0x241   :  { %1279 = vrot.lane.b32.xlu1 %v1270_v39, %s3019_s13  ;;  %1253 = vrot.lane.b32.xlu0 %v1244_v40, %s3019_s13  ;;  %v1349_v39 = vmul.f32 %v1346_v15, %v3844_v29  ;;  %v1376_v40 = vstv %s2760_s12  ;;  %v3976_v29 = vld [vmem:[#allocation2 + $0x50] sm:$0xff]  ;;  %s4262_s12 = sld [smem:[#allocation8 + $0x45]] }
 0x242   :  { %v3906_v61 = vpop.permute.xlu2 %1043  ;;  %v1377_v46 = vmul.f32 %v1376_v40, %v3960_v8  ;;  %v1380_v54 = vmul.f32 %v1376_v40, %v3976_v29 }
 0x243   :  { %v3908_v11 = vpop.permute.xlu1 %989  ;;  %v3910_v35 = vpop.permute.xlu0 %963 }
 0x244   :  { %4955 = vst [vmem:[#allocation28_spill] sm:$0xff] %v3908_v11 }
 0x245   :  { %4956 = vst [vmem:[#allocation34_spill] sm:$0xff] %v3910_v35  ;;  %v4160_v35 = vld [vmem:[#allocation2 + $0x22] sm:$0xff] }
 0x248   :  { %1281 = vrot.lane.b32.xlu2 %v1271_v25, %s3019_s13 }
 0x249   :  { %1303 = vrot.lane.b32.xlu1 %v1295_v3, %s3019_s13  ;;  %1277 = vrot.lane.b32.xlu0 %v1269_v12, %s3019_s13  ;;  %v3970_v3 = vld [vmem:[#allocation2 + $0x20] sm:$0xff] }
 0x24a   :  { %v3918_v1 = vpop.permute.xlu2 %1067 }
 0x24b   :  { %v3920_v53 = vpop.permute.xlu1 %1017  ;;  %v3922_v19 = vpop.permute.xlu0 %987 }
 0x24c   :  { %4957 = vst [vmem:[#allocation38_spill] sm:$0xff] %v3920_v53 }
 0x24d   :  { %4958 = vst [vmem:[#allocation14_spill] sm:$0xff] %v3922_v19  ;;  %v1506_v19 = vstv %s2765_s22  ;;  %s2783_s22 = sld [smem:[#allocation8 + $0x48]] }
 0x24e   :  { %v1507_v11 = vmul.f32 %v1506_v19, %v3960_v8 }
 0x250   :  { %1305 = vrot.lane.b32.xlu2 %v1296_v5, %s3019_s13 }
 0x251   :  { %1309 = vrot.lane.b32.xlu1 %v1298_v37, %s3019_s13  ;;  %1283 = vrot.lane.b32.xlu0 %v1272_v10, %s3019_s13  ;;  %v1378_v37 = vmul.f32 %v1376_v40, %v3970_v3  ;;  %v1350_v10 = vmul.f32 %v1346_v15, %v3870_v13 }
 0x252   :  { %v3930_v58 = vpop.permute.xlu2 %1091 }
 0x253   :  { %4959 = vst [vmem:[#allocation17_spill] sm:$0xff] %v3930_v58  ;;  %v3932_v30 = vpop.permute.xlu1 %1041  ;;  %v3934_v0 = vpop.permute.xlu0 %1015 }
 0x254   :  { %4960 = vst [vmem:[#allocation43_spill] sm:$0xff] %v3934_v0 }
 0x258   :  { %1329 = vrot.lane.b32.xlu2 %v1321_v55, %s3019_s13 }
 0x259   :  { %1333 = vrot.lane.b32.xlu1 %v1323_v62, %s3019_s13  ;;  %1307 = vrot.lane.b32.xlu0 %v1297_v49, %s3019_s13  ;;  %v1402_v49 = vstv %s2761_s14  ;;  %s4271_s14 = sld [smem:[#allocation8 + $0x3a]] }
 0x25a   :  { %v3942_v31 = vpop.permute.xlu2 %1097 }
 0x25b   :  { %4961 = vst [vmem:[#allocation21_spill] sm:$0xff] %v3942_v31  ;;  %v3944_v38 = vpop.permute.xlu1 %1065  ;;  %v3946_v41 = vpop.permute.xlu0 %1039 }
 0x260   :  { %1335 = vrot.lane.b32.xlu2 %v1324_v2, %s3019_s13  ;;  %v3990_v2 = vld [vmem:[#allocation2 + $0x48] sm:$0xff] }
 0x261   :  { %1357 = vrot.lane.b32.xlu1 %v1348_v42, %s3020_s18  ;;  %1331 = vrot.lane.b32.xlu0 %v1322_v14, %s3019_s13  ;;  %v1403_v42 = vmul.f32 %v1402_v49, %v3960_v8  ;;  %v1405_v13 = vmul.f32 %v1402_v49, %v3990_v2  ;;  %v1379_v15 = vmul.f32 %v1376_v40, %v3990_v2 }
 0x262   :  { %v3954_v36 = vpop.permute.xlu2 %1121  ;;  %v1404_v40 = vmul.f32 %v1402_v49, %v3970_v3  ;;  %v1509_v31 = vmul.f32 %v1506_v19, %v3990_v2 }
 0x263   :  { %4962 = vst [vmem:[#allocation25_spill] sm:$0xff] %v3954_v36  ;;  %v3956_v63 = vpop.permute.xlu1 %1071  ;;  %v3958_v7 = vpop.permute.xlu0 %1045 }
 0x264   :  { %4963 = vst [vmem:[#allocation29_spill] sm:$0xff] %v3956_v63  ;;  %v1684_v63 = vstv %s2774_s28  ;;  %s2789_s28 = sld [smem:[#allocation8 + $0x4e]] }
 0x268   :  { %1359 = vrot.lane.b32.xlu2 %v1349_v39, %s3020_s18 }
 0x269   :  { %1385 = vrot.lane.b32.xlu1 %v1377_v46, %s3021_s19  ;;  %1355 = vrot.lane.b32.xlu0 %v1347_v45, %s3020_s18  ;;  %v1406_v45 = vmul.f32 %v1402_v49, %v3976_v29 }
 0x26a   :  { %v3968_v25 = vpop.permute.xlu2 %1145 }
 0x26b   :  { %v3972_v12 = vpop.permute.xlu1 %1095  ;;  %v3974_v5 = vpop.permute.xlu0 %1069 }
 0x26c   :  { %4964 = vst [vmem:[#allocation30_spill] sm:$0xff] %v3972_v12 }
 0x270   :  { %1387 = vrot.lane.b32.xlu2 %v1378_v37, %s3021_s19  ;;  %v1428_v37 = vstv %s2762_s15  ;;  %s4319_s15 = sld [smem:[#allocation8 + $0x3b]] }
 0x271   :  { %1391 = vrot.lane.b32.xlu1 %v1380_v54, %s3021_s19  ;;  %1361 = vrot.lane.b32.xlu0 %v1350_v10, %s3020_s18  ;;  %v1430_v54 = vmul.f32 %v1428_v37, %v3970_v3  ;;  %v1429_v0 = vmul.f32 %v1428_v37, %v3960_v8  ;;  %v1432_v36 = vmul.f32 %v1428_v37, %v3976_v29 }
 0x272   :  { %v3984_v59 = vpop.permute.xlu2 %1169 }
 0x273   :  { %v3986_v55 = vpop.permute.xlu1 %1119  ;;  %v3988_v62 = vpop.permute.xlu0 %1093 }
 0x274   :  { %4965 = vst [vmem:[#allocation37_spill] sm:$0xff] %v3986_v55  ;;  %v1454_v55 = vstv %s2763_s16  ;;  %s4342_s16 = sld [smem:[#allocation8 + $0x46]] }
 0x275   :  { %v1456_v33 = vmul.f32 %v1454_v55, %v3970_v3 }
 0x278   :  { %1411 = vrot.lane.b32.xlu2 %v1403_v42, %s3021_s19 }
 0x279   :  { %1415 = vrot.lane.b32.xlu1 %v1405_v13, %s3021_s19  ;;  %1389 = vrot.lane.b32.xlu0 %v1379_v15, %s3021_s19  ;;  %v1431_v15 = vmul.f32 %v1428_v37, %v3990_v2  ;;  %v1457_v37 = vmul.f32 %v1454_v55, %v3990_v2 }
 0x27a   :  { %v3998_v14 = vpop.permute.xlu2 %1175 }
 0x27b   :  { %4966 = vst [vmem:[#allocation40_spill] sm:$0xff] %v3998_v14  ;;  %v4000_v39 = vpop.permute.xlu1 %1143  ;;  %v4002_v46 = vpop.permute.xlu0 %1117  ;;  %v1628_v14 = vstv %s2772_s26  ;;  %s2787_s26 = sld [smem:[#allocation8 + $0x4c]] }
 0x27c   :  { %4967 = vst [vmem:[#allocation16_spill] sm:$0xff] %v4002_v46  ;;  %v4146_v46 = vld [vmem:[#allocation2 + $0x4a] sm:$0xff] }
 0x280   :  { %1417 = vrot.lane.b32.xlu2 %v1406_v45, %s3021_s19  ;;  %v1455_v45 = vmul.f32 %v1454_v55, %v3960_v8 }
 0x281   :  { %1439 = vrot.lane.b32.xlu1 %v1430_v54, %s3021_s19  ;;  %1413 = vrot.lane.b32.xlu0 %v1404_v40, %s3021_s19 }
 0x282   :  { %v4010_v10 = vpop.permute.xlu2 %1203 }
 0x283   :  { %4968 = vst [vmem:[#allocation18_spill] sm:$0xff] %v4010_v10  ;;  %v4012_v42 = vpop.permute.xlu1 %1149  ;;  %v4014_v13 = vpop.permute.xlu0 %1123  ;;  %v1480_v10 = vstv %s2764_s17  ;;  %s4396_s17 = sld [smem:[#allocation8 + $0x47]] }
 0x284   :  { %4969 = vst [vmem:[#allocation45_spill] sm:$0xff] %v4014_v13  ;;  %v1481_v53 = vmul.f32 %v1480_v10, %v3960_v8  ;;  %v1484_v12 = vmul.f32 %v1480_v10, %v3976_v29  ;;  %v1532_v13 = vstv %s2766_s1  ;;  %s2784_s1 = sld [smem:[#allocation8 + $0x49]] }
 0x288   :  { %1441 = vrot.lane.b32.xlu2 %v1431_v15, %s3021_s19  ;;  %v1458_v15 = vmul.f32 %v1454_v55, %v3976_v29  ;;  %v1482_v55 = vmul.f32 %v1480_v10, %v3970_v3 }
 0x289   :  { %1463 = vrot.lane.b32.xlu1 %v1455_v45, %s3022_s25  ;;  %1437 = vrot.lane.b32.xlu0 %v1429_v0, %s3021_s19 }
 0x28a   :  { %v4022_v49 = vpop.permute.xlu2 %1227 }
 0x28b   :  { %4970 = vst [vmem:[#allocation22_spill] sm:$0xff] %v4022_v49  ;;  %v4024_v54 = vpop.permute.xlu1 %1173  ;;  %v4026_v40 = vpop.permute.xlu0 %1147 }
 0x290   :  { %1465 = vrot.lane.b32.xlu2 %v1456_v33, %s3022_s25  ;;  %v1483_v33 = vmul.f32 %v1480_v10, %v3990_v2 }
 0x291   :  { %1469 = vrot.lane.b32.xlu1 %v1458_v15, %s3022_s25  ;;  %1443 = vrot.lane.b32.xlu0 %v1432_v36, %s3021_s19 }
 0x292   :  { %v4034_v0 = vpop.permute.xlu2 %1251 }
 0x293   :  { %v4036_v45 = vpop.permute.xlu1 %1201  ;;  %v4038_v49 = vpop.permute.xlu0 %1171 }
 0x298   :  { %1489 = vrot.lane.b32.xlu2 %v1481_v53, %s3022_s25  ;;  %v1508_v53 = vmul.f32 %v1506_v19, %v3970_v3 }
 0x299   :  { %1493 = vrot.lane.b32.xlu1 %v1483_v33, %s3022_s25  ;;  %1467 = vrot.lane.b32.xlu0 %v1457_v37, %s3022_s25 }
 0x29a   :  { %v4046_v36 = vpop.permute.xlu2 %1257 }
 0x29b   :  { %v4048_v15 = vpop.permute.xlu1 %1225  ;;  %v4050_v60 = vpop.permute.xlu0 %1199 }
 0x29c   :  { %4971 = vst [vmem:[#allocation26_spill] sm:$0xff] %v4048_v15 }
 0x29d   :  { %4972 = vst [vmem:[#allocation32_spill] sm:$0xff] %v4050_v60  ;;  %v1654_v60 = vstv %s2773_s27  ;;  %s2788_s27 = sld [smem:[#allocation8 + $0x4d]] }
 0x2a0   :  { %1495 = vrot.lane.b32.xlu2 %v1484_v12, %s3022_s25  ;;  %v1533_v12 = vmul.f32 %v1532_v13, %v3960_v8  ;;  %v4084_v8 = vld [vmem:[#allocation2 + $0x19] sm:$0xff] }
 0x2a1   :  { %1517 = vrot.lane.b32.xlu1 %v1508_v53, %s3022_s25  ;;  %1491 = vrot.lane.b32.xlu0 %v1482_v55, %s3022_s25  ;;  %v1629_v15 = vmul.f32 %v1628_v14, %v4084_v8 }
 0x2a2   :  { %v4058_v33 = vpop.permute.xlu2 %1281 }
 0x2a3   :  { %v4060_v37 = vpop.permute.xlu1 %1231  ;;  %v4062_v22 = vpop.permute.xlu0 %1205 }
 0x2a4   :  { %4973 = vst [vmem:[#allocation33_spill] sm:$0xff] %v4060_v37  ;;  %v1510_v37 = vmul.f32 %v1506_v19, %v3976_v29 }
 0x2a5   :  { %4974 = vst [vmem:[#allocation39_spill] sm:$0xff] %v4062_v22  ;;  %v1534_v22 = vmul.f32 %v1532_v13, %v3970_v3  ;;  %v4090_v3 = vld [vmem:[#allocation2 + $0x49] sm:$0xff] }
 0x2a6   :  { %v1605_v19 = vmul.f32 %v1602_v48, %v4090_v3 }
 0x2a8   :  { %1519 = vrot.lane.b32.xlu2 %v1509_v31, %s3022_s25  ;;  %v1536_v31 = vmul.f32 %v1532_v13, %v3976_v29  ;;  %v1535_v29 = vmul.f32 %v1532_v13, %v3990_v2 }
 0x2a9   :  { %1541 = vrot.lane.b32.xlu1 %v1533_v12, %s3022_s25  ;;  %1515 = vrot.lane.b32.xlu0 %v1507_v11, %s3022_s25 }
 0x2aa   :  { %v4070_v10 = vpop.permute.xlu2 %1305 }
 0x2ab   :  { %v4072_v53 = vpop.permute.xlu1 %1255  ;;  %v4074_v55 = vpop.permute.xlu0 %1229 }
 0x2ac   :  { %4975 = vst [vmem:[#allocation42_spill] sm:$0xff] %v4074_v55 }
 0x2b0   :  { %1543 = vrot.lane.b32.xlu2 %v1534_v22, %s3022_s25  ;;  %v1603_v22 = vmul.f32 %v1602_v48, %v4084_v8 }
 0x2b1   :  { %1547 = vrot.lane.b32.xlu1 %v1536_v31, %s3022_s25  ;;  %1521 = vrot.lane.b32.xlu0 %v1510_v37, %s3022_s25  ;;  %v4100_v31 = vld [vmem:[#allocation2 + $0x51] sm:$0xff] }
 0x2b2   :  { %v4082_v11 = vpop.permute.xlu2 %1329 }
 0x2b3   :  { %4976 = vst [vmem:[#allocation20_spill] sm:$0xff] %v4082_v11  ;;  %v4086_v12 = vpop.permute.xlu1 %1279  ;;  %v4088_v55 = vpop.permute.xlu0 %1253  ;;  %v4106_v11 = vld [vmem:[#allocation2 + $0x21] sm:$0xff] }
 0x2b4   :  { %v1630_v2 = vmul.f32 %v1628_v14, %v4106_v11  ;;  %v1604_v13 = vmul.f32 %v1602_v48, %v4106_v11 }
 0x2b8   :  { %1611 = vrot.lane.b32.xlu2 %v1603_v22, %s3015_s23  ;;  %v1606_v22 = vmul.f32 %v1602_v48, %v4100_v31 }
 0x2b9   :  { %1615 = vrot.lane.b32.xlu1 %v1605_v19, %s3015_s23  ;;  %1545 = vrot.lane.b32.xlu0 %v1535_v29, %s3022_s25 }
 0x2ba   :  { %v4098_v37 = vpop.permute.xlu2 %1335 }
 0x2bb   :  { %4977 = vst [vmem:[#allocation47_spill] sm:$0xff] %v4098_v37  ;;  %v4102_v28 = vpop.permute.xlu1 %1303  ;;  %v4104_v4 = vpop.permute.xlu0 %1277 }
 0x2bc   :  { %4978 = vst [vmem:[#allocation23_spill] sm:$0xff] %v4102_v28  ;;  %v1631_v28 = vmul.f32 %v1628_v14, %v4090_v3 }
 0x2bd   :  { %4979 = vst [vmem:[#allocation36_spill] sm:$0xff] %v4104_v4 }
 0x2c0   :  { %1617 = vrot.lane.b32.xlu2 %v1606_v22, %s3015_s23  ;;  %v1655_v22 = vmul.f32 %v1654_v60, %v4084_v8 }
 0x2c1   :  { %1639 = vrot.lane.b32.xlu1 %v1630_v2, %s3015_s23  ;;  %1613 = vrot.lane.b32.xlu0 %v1604_v13, %s3015_s23 }
 0x2c2   :  { %v4114_v19 = vpop.permute.xlu2 %1359 }
 0x2c3   :  { %v4116_v29 = vpop.permute.xlu1 %1309  ;;  %v4118_v37 = vpop.permute.xlu0 %1283 }
 0x2c4   :  { %4980 = vst [vmem:[#allocation44_spill] sm:$0xff] %v4116_v29  ;;  %v1656_v29 = vmul.f32 %v1654_v60, %v4106_v11 }
 0x2c5   :  { %4981 = vst [vmem:[#allocation48_spill] sm:$0xff] %v4118_v37  ;;  %v1632_v37 = vmul.f32 %v1628_v14, %v4100_v31  ;;  %v1687_v14 = vmul.f32 %v1684_v63, %v4146_v46 }
 0x2c8   :  { %1641 = vrot.lane.b32.xlu2 %v1631_v28, %s3015_s23  ;;  %v1658_v28 = vmul.f32 %v1654_v60, %v4100_v31 }
 0x2c9   :  { %1663 = vrot.lane.b32.xlu1 %v1655_v22, %s3015_s23  ;;  %1637 = vrot.lane.b32.xlu0 %v1629_v15, %s3015_s23  ;;  %v4140_v22 = vld [vmem:[#allocation2 + $0x1a] sm:$0xff] }
 0x2ca   :  { %v4126_v48 = vpop.permute.xlu2 %1387  ;;  %v1763_v4 = vmul.f32 %v1762_v17, %v4140_v22 }
 0x2cb   :  { %4982 = vst [vmem:[#allocation51_spill] sm:$0xff] %v4126_v48  ;;  %v4128_v2 = vpop.permute.xlu1 %1333  ;;  %v4130_v13 = vpop.permute.xlu0 %1307 }
 0x2cc   :  { %4983 = vst [vmem:[#allocation52_spill] sm:$0xff] %v4128_v2 }
 0x2cd   :  { %4984 = vst [vmem:[#allocation53_spill] sm:$0xff] %v4130_v13 }
 0x2d0   :  { %1665 = vrot.lane.b32.xlu2 %v1656_v29, %s3015_s23  ;;  %v1685_v29 = vmul.f32 %v1684_v63, %v4140_v22 }
 0x2d1   :  { %1669 = vrot.lane.b32.xlu1 %v1658_v28, %s3015_s23  ;;  %1643 = vrot.lane.b32.xlu0 %v1632_v37, %s3015_s23  ;;  %v1657_v37 = vmul.f32 %v1654_v60, %v4090_v3 }
 0x2d2   :  { %v4138_v15 = vpop.permute.xlu2 %1411 }
 0x2d3   :  { %4985 = vst [vmem:[#allocation54_spill] sm:$0xff] %v4138_v15  ;;  %v4142_v2 = vpop.permute.xlu1 %1357  ;;  %v4144_v13 = vpop.permute.xlu0 %1331  ;;  %v4156_v15 = vld [vmem:[#allocation2 + $0x52] sm:$0xff] }
 0x2d4   :  { %4986 = vst [vmem:[#allocation55_spill] sm:$0xff] %v4144_v13  ;;  %v1688_v50 = vmul.f32 %v1684_v63, %v4156_v15 }
 0x2d8   :  { %1693 = vrot.lane.b32.xlu2 %v1685_v29, %s3013_s0  ;;  %v1710_v29 = vstv %s2775_s30  ;;  %s2790_s30 = sld [smem:[#allocation8 + $0x4f]] }
 0x2d9   :  { %1697 = vrot.lane.b32.xlu1 %v1687_v14, %s3013_s0  ;;  %1667 = vrot.lane.b32.xlu0 %v1657_v37, %s3015_s23  ;;  %v1712_v60 = vmul.f32 %v1710_v29, %v4160_v35  ;;  %v1686_v14 = vmul.f32 %v1684_v63, %v4160_v35  ;;  %v1713_v48 = vmul.f32 %v1710_v29, %v4146_v46 }
 0x2da   :  { %v4154_v28 = vpop.permute.xlu2 %1417  ;;  %v1711_v27 = vmul.f32 %v1710_v29, %v4140_v22 }
 0x2db   :  { %4987 = vst [vmem:[#allocation56_spill] sm:$0xff] %v4154_v28  ;;  %v4158_v13 = vpop.permute.xlu1 %1385  ;;  %v1356_v58 = vpop.permute.xlu0 %1355 }
 0x2dc   :  { %4988 = vst [vmem:[#allocation57_spill] sm:$0xff] %v4158_v13 }
 0x2e0   :  { %1699 = vrot.lane.b32.xlu2 %v1688_v50, %s3013_s0  ;;  %v1737_v50 = vmul.f32 %v1736_v52, %v4140_v22 }
 0x2e1   :  { %1721 = vrot.lane.b32.xlu1 %v1712_v60, %s3016_s29  ;;  %1695 = vrot.lane.b32.xlu0 %v1686_v14, %s3013_s0 }
 0x2e2   :  { %v4168_v37 = vpop.permute.xlu2 %1441 }
 0x2e3   :  { %4989 = vst [vmem:[#allocation58_spill] sm:$0xff] %v4168_v37  ;;  %v4170_v28 = vpop.permute.xlu1 %1391  ;;  %v1362_v13 = vpop.permute.xlu0 %1361  ;;  %v1738_v37 = vmul.f32 %v1736_v52, %v4160_v35 }
 0x2e4   :  { %4990 = vst [vmem:[#allocation59_spill] sm:$0xff] %v4170_v28  ;;  %v1714_v28 = vmul.f32 %v1710_v29, %v4156_v15 }
 0x2e8   :  { %1723 = vrot.lane.b32.xlu2 %v1713_v48, %s3016_s29  ;;  %v1740_v48 = vmul.f32 %v1736_v52, %v4156_v15 }
 0x2e9   :  { %1745 = vrot.lane.b32.xlu1 %v1737_v50, %s3016_s29  ;;  %1719 = vrot.lane.b32.xlu0 %v1711_v27, %s3016_s29  ;;  %v943_v50 = vadd.f32 %v3780_v51, %v3683_v47 }
 0x2ea   :  { %v4178_v63 = vpop.permute.xlu2 %1465 }
 0x2eb   :  { %v4180_v60 = vpop.permute.xlu1 %1415  ;;  %v4182_v14 = vpop.permute.xlu0 %1389 }
 0x2ec   :  { %4991 = vst [vmem:[#allocation60_spill] sm:$0xff] %v4180_v60 }
 0x2f0   :  { %1747 = vrot.lane.b32.xlu2 %v1738_v37, %s3016_s29  ;;  %v1051_v37 = vadd.f32 %v3946_v41, %v943_v50  ;;  %v946_v41 = vadd.f32 %v3810_v21, %v3726_v6 }
 0x2f1   :  { %1751 = vrot.lane.b32.xlu1 %v1740_v48, %s3016_s29  ;;  %1725 = vrot.lane.b32.xlu0 %v1714_v28, %s3016_s29  ;;  %v1765_v28 = vmul.f32 %v1762_v17, %v4146_v46  ;;  %v1739_v48 = vmul.f32 %v1736_v52, %v4146_v46 }
 0x2f2   :  { %v4190_v27 = vpop.permute.xlu2 %1489  ;;  %v1155_v29 = vadd.f32 %v4000_v39, %v1051_v37 }
 0x2f3   :  { %v4194_v60 = vpop.permute.xlu1 %1439  ;;  %v4196_v57 = vpop.permute.xlu0 %1413 }
 0x2f4   :  { %4992 = vst [vmem:[#allocation61_spill] sm:$0xff] %v4194_v60  ;;  %v1263_v47 = vadd.f32 %v4034_v0, %v1155_v29  ;;  %v1054_v60 = vadd.f32 %v3958_v7, %v946_v41  ;;  %v1766_v29 = vmul.f32 %v1762_v17, %v4156_v15 }
 0x2f6   :  { %v1367_v50 = vadd.f32 %v1356_v58, %v1263_v47  ;;  %v1764_v58 = vmul.f32 %v1762_v17, %v4160_v35  ;;  %v945_v47 = vadd.f32 %v3868_v44, %v3767_v26  ;;  %v4250_v44 = vstv %s2779_s9  ;;  %s2799_s9 = sld [smem:[#allocation8 + $0x58]] }
 0x2f8   :  { %1771 = vrot.lane.b32.xlu2 %v1763_v4, %s3016_s29  ;;  %v4213_v4 = vstv %s2767_s7  ;;  %s2802_s7 = sld [smem:[#allocation8 + $0x5b]] }
 0x2f9   :  { %1775 = vrot.lane.b32.xlu1 %v1765_v28, %s3016_s29  ;;  %1749 = vrot.lane.b32.xlu0 %v1739_v48, %s3016_s29  ;;  %v1563_v0 = vmul.f32 %v4213_v4, %v4084_v8  ;;  %v1158_v28 = vadd.f32 %v4012_v42, %v1054_v60  ;;  %v4220_v48 = vstv %s2778_s8  ;;  %v971_v60 = vadd.f32 %v3839_v18, %v3765_v34  ;;  %s2806_s8 = sld [smem:[#allocation8 + $0x5f]] }
 0x2fa   :  { %v4207_v51 = vpop.permute.xlu2 %1495  ;;  %v1790_v21 = vmul.f32 %v4220_v48, %v4160_v35  ;;  %v1791_v26 = vmul.f32 %v4220_v48, %v4146_v46 }
 0x2fb   :  { %v1464_v39 = vpop.permute.xlu1 %1463  ;;  %v4211_v37 = vpop.permute.xlu0 %1437  ;;  %v1266_v7 = vadd.f32 %v4046_v36, %v1158_v28  ;;  %v1053_v36 = vadd.f32 %v3906_v61, %v945_v47 }
 0x2fc   :  { %v1475_v52 = vadd.f32 %v1464_v39, %v1367_v50  ;;  %v944_v50 = vadd.f32 %v3886_v9, %v3609_v20 }
 0x2fd   :  { %v1370_v41 = vadd.f32 %v1362_v13, %v1266_v7  ;;  %v1157_v20 = vadd.f32 %v4026_v40, %v1053_v36  ;;  %v4264_v40 = vstv %s2768_s11  ;;  %s2804_s11 = sld [smem:[#allocation8 + $0x5d]] }
 0x2fe   :  { %v4222_v6 = vadd.f32 %v1563_v0, %v1475_v52  ;;  %v1079_v52 = vadd.f32 %v3974_v5, %v971_v60  ;;  %v1052_v34 = vadd.f32 %v3932_v30, %v944_v50  ;;  %v1815_v5 = vmul.f32 %v4250_v44, %v4140_v22 }
 0x2ff   :  { %v1789_v30 = vmul.f32 %v4220_v48, %v4140_v22 }
 0x300   :  { %1777 = vrot.lane.b32.xlu2 %v1766_v29, %s3016_s29  ;;  %v1566_v29 = vmul.f32 %v4213_v4, %v4100_v31  ;;  %v1183_v18 = vadd.f32 %v4024_v54, %v1079_v52  ;;  %v1156_v61 = vadd.f32 %v3968_v25, %v1052_v34  ;;  %v1265_v54 = vadd.f32 %v4072_v53, %v1157_v20  ;;  %v4993_v52 = vld [vmem:[#allocation36_spill] sm:$0xff] }
 0x301   :  { %1799 = vrot.lane.b32.xlu1 %v1790_v21, %s3016_s29  ;;  %1773 = vrot.lane.b32.xlu0 %v1764_v58, %s3016_s29  ;;  %v996_v21 = vadd.f32 %v3865_v56, %v3796_v32  ;;  %v1565_v32 = vmul.f32 %v4213_v4, %v4090_v3  ;;  %v4317_v34 = vstv %s4271_s14  ;;  %s2808_s14 = sld [smem:[#allocation8 + $0x61]] }
 0x302   :  { %v4231_v42 = vpop.permute.xlu2 %1519  ;;  %v1291_v13 = vadd.f32 %v4058_v33, %v1183_v18  ;;  %v1264_v28 = vadd.f32 %v4088_v55, %v1156_v61  ;;  %v970_v33 = vadd.f32 %v3884_v43, %v3798_v16  ;;  %v1369_v53 = vadd.f32 %v4114_v19, %v1265_v54  ;;  %v4997_v18 = vld [vmem:[#allocation27_spill] sm:$0xff]  ;;  %v5000_v54 = vld [vmem:[#allocation34_spill] sm:$0xff] }
 0x303   :  { %v1470_v17 = vpop.permute.xlu1 %1469  ;;  %v4239_v39 = vpop.permute.xlu0 %1443  ;;  %v969_v55 = vadd.f32 %v3898_v23, %v3637_v24  ;;  %v1104_v16 = vadd.f32 %v3988_v62, %v996_v21  ;;  %v1816_v23 = vmul.f32 %v4250_v44, %v4160_v35  ;;  %v4998_v61 = vld [vmem:[#allocation51_spill] sm:$0xff]  ;;  %v5001_v21 = vld [vmem:[#allocation57_spill] sm:$0xff] }
 0x304   :  { %v1478_v0 = vadd.f32 %v1470_v17, %v1370_v41  ;;  %v1399_v58 = vadd.f32 %v4182_v14, %v1291_v13  ;;  %v1368_v7 = vadd.f32 %v4142_v2, %v1264_v28  ;;  %v1575_v41 = vmul.f32 %v4264_v40, %v4090_v3  ;;  %v4999_v13 = vld [vmem:[#allocation49_spill] sm:$0xff] }
 0x305   :  { %v1078_v56 = vadd.f32 %v3918_v1, %v970_v33  ;;  %v1077_v14 = vadd.f32 %v3944_v38, %v969_v55  ;;  %v1212_v2 = vadd.f32 %v4036_v45, %v1104_v16  ;;  %v1818_v38 = vmul.f32 %v4250_v44, %v4156_v15 }
 0x306   :  { %v4252_v9 = vadd.f32 %v1566_v29, %v1478_v0  ;;  %v1476_v24 = vadd.f32 %v4178_v63, %v1368_v7  ;;  %v1792_v63 = vmul.f32 %v4220_v48, %v4156_v15  ;;  %v1564_v45 = vmul.f32 %v4213_v4, %v4106_v11  ;;  %v4994_v4 = vld [vmem:[#allocation31_spill] sm:$0xff] }
 0x307   :  { %v1182_v50 = vadd.f32 %v4038_v49, %v1078_v56  ;;  %v1181_v62 = vadd.f32 %v3984_v59, %v1077_v14  ;;  %v1316_v36 = vadd.f32 %v4070_v10, %v1212_v2  ;;  %v4314_v29 = vstv %s4262_s12  ;;  %v4995_v10 = vld [vmem:[#allocation19_spill] sm:$0xff]  ;;  %v5006_v2 = vld [vmem:[#allocation32_spill] sm:$0xff]  ;;  %s2805_s12 = sld [smem:[#allocation8 + $0x5e]] }
 0x308   :  { %1801 = vrot.lane.b32.xlu2 %v1791_v26, %s3016_s29  ;;  %v4321_v48 = vadd.f32 %v1564_v45, %v1476_v24  ;;  %v1025_v26 = vadd.f32 %v4995_v10, %v4994_v4  ;;  %v972_v28 = vadd.f32 %v5000_v54, %v4999_v13  ;;  %v1584_v55 = vmul.f32 %v4317_v34, %v4106_v11  ;;  %v5005_v24 = vld [vmem:[#allocation26_spill] sm:$0xff]  ;;  %v5007_v45 = vld [vmem:[#allocation40_spill] sm:$0xff]  ;;  %v5010_v10 = vld [vmem:[#allocation13_spill] sm:$0xff] }
 0x309   :  { %1823 = vrot.lane.b32.xlu1 %v1815_v5, %s3017_s6  ;;  %1797 = vrot.lane.b32.xlu0 %v1789_v30, %s3016_s29  ;;  %v1290_v49 = vadd.f32 %v4086_v12, %v1182_v50  ;;  %v1289_v0 = vadd.f32 %v4993_v52, %v1181_v62  ;;  %v4996_v12 = vld [vmem:[#allocation35_spill] sm:$0xff]  ;;  %v1424_v30 = vadd.f32 %v4196_v57, %v1316_v36  ;;  %v5004_v57 = vld [vmem:[#allocation29_spill] sm:$0xff]  ;;  %v5015_v54 = vld [vmem:[#allocation54_spill] sm:$0xff] }
 0x30a   :  { %v4269_v25 = vpop.permute.xlu2 %1543  ;;  %v995_v20 = vadd.f32 %v4997_v18, %v4996_v12  ;;  %v1574_v7 = vmul.f32 %v4264_v40, %v4106_v11  ;;  %v1841_v14 = vmul.f32 %v4314_v29, %v4140_v22  ;;  %v1573_v22 = vmul.f32 %v4264_v40, %v4084_v8  ;;  %v5012_v18 = vld [vmem:[#allocation15_spill] sm:$0xff] }
 0x30b   :  { %v1494_v60 = vpop.permute.xlu1 %1493  ;;  %v1468_v47 = vpop.permute.xlu0 %1467  ;;  %v1398_v5 = vadd.f32 %v4998_v61, %v1290_v49  ;;  %v1397_v33 = vadd.f32 %v5001_v21, %v1289_v0  ;;  %v5008_v49 = vld [vmem:[#allocation20_spill] sm:$0xff]  ;;  %v5009_v0 = vld [vmem:[#allocation23_spill] sm:$0xff] }
 0x30c   :  { %v1503_v43 = vadd.f32 %v1494_v60, %v1399_v58  ;;  %v1477_v19 = vadd.f32 %v1468_v47, %v1369_v53  ;;  %v5002_v60 = vld [vmem:[#allocation17_spill] sm:$0xff] }
 0x30d   :  { %v1103_v47 = vadd.f32 %v5002_v60, %v995_v20  ;;  %v5013_v20 = vld [vmem:[#allocation28_spill] sm:$0xff] }
 0x30e   :  { %v4294_v17 = vadd.f32 %v1575_v41, %v1503_v43  ;;  %v4296_v1 = vadd.f32 %v1565_v32, %v1477_v19  ;;  %v5003_v41 = vld [vmem:[#allocation16_spill] sm:$0xff]  ;;  %v1080_v43 = vadd.f32 %v5004_v57, %v972_v28  ;;  %v1501_v19 = vadd.f32 %v4190_v27, %v1397_v33 }
 0x30f   :  { %v1129_v32 = vadd.f32 %v5003_v41, %v1025_v26  ;;  %v1211_v50 = vadd.f32 %v5006_v2, %v1103_v47  ;;  %v1817_v27 = vmul.f32 %v4250_v44, %v4146_v46  ;;  %v5011_v26 = vld [vmem:[#allocation24_spill] sm:$0xff]  ;;  %v998_v61 = vadd.f32 %v5013_v20, %v5012_v18  ;;  %v5017_v41 = vld [vmem:[#allocation21_spill] sm:$0xff]  ;;  %v5027_v18 = vld [vmem:[#allocation38_spill] sm:$0xff] }
 0x310   :  { %1825 = vrot.lane.b32.xlu2 %v1816_v23, %s3017_s6  ;;  %v1184_v36 = vadd.f32 %v5007_v45, %v1080_v43  ;;  %v1028_v12 = vadd.f32 %v5011_v26, %v5010_v10  ;;  %v4367_v44 = vstv %s4319_s15  ;;  %v1583_v47 = vmul.f32 %v4317_v34, %v4084_v8  ;;  %v5025_v10 = vld [vmem:[#allocation44_spill] sm:$0xff]  ;;  %s2796_s15 = sld [smem:[#allocation8 + $0x55]] }
 0x311   :  { %1829 = vrot.lane.b32.xlu1 %v1818_v38, %s3017_s6  ;;  %1803 = vrot.lane.b32.xlu0 %v1792_v63, %s3016_s29  ;;  %v1237_v23 = vadd.f32 %v5005_v24, %v1129_v32  ;;  %v1843_v63 = vmul.f32 %v4314_v29, %v4146_v46  ;;  %v1315_v4 = vadd.f32 %v5009_v0, %v1211_v50  ;;  %v5021_v24 = vld [vmem:[#allocation33_spill] sm:$0xff]  ;;  %v4392_v50 = vstv %s4342_s16  ;;  %v5024_v0 = vld [vmem:[#allocation47_spill] sm:$0xff]  ;;  %s2798_s16 = sld [smem:[#allocation8 + $0x57]] }
 0x312   :  { %v4311_v59 = vpop.permute.xlu2 %1611  ;;  %v1593_v60 = vmul.f32 %v4367_v44, %v4084_v8  ;;  %v1106_v32 = vadd.f32 %v5017_v41, %v998_v61  ;;  %v1844_v2 = vmul.f32 %v4314_v29, %v4156_v15  ;;  %v1842_v15 = vmul.f32 %v4314_v29, %v4160_v35  ;;  %v5028_v61 = vld [vmem:[#allocation18_spill] sm:$0xff] }
 0x313   :  { %v1518_v53 = vpop.permute.xlu1 %1517  ;;  %v1492_v58 = vpop.permute.xlu0 %1491  ;;  %v1341_v52 = vadd.f32 %v5008_v49, %v1237_v23  ;;  %v1423_v28 = vadd.f32 %v5015_v54, %v1315_v4  ;;  %v1576_v26 = vmul.f32 %v4264_v40, %v4100_v31 }
 0x314   :  { %v1528_v56 = vadd.f32 %v1518_v53, %v1424_v30  ;;  %v1502_v16 = vadd.f32 %v1492_v58, %v1398_v5  ;;  %v4369_v5 = vadd.f32 %v1573_v22, %v1501_v19  ;;  %v5014_v30 = vld [vmem:[#allocation48_spill] sm:$0xff]  ;;  %v5016_v53 = vld [vmem:[#allocation45_spill] sm:$0xff]  ;;  %v5020_v19 = vld [vmem:[#allocation14_spill] sm:$0xff] }
 0x315   :  { %v1292_v13 = vadd.f32 %v5014_v30, %v1184_v36  ;;  %v1449_v21 = vadd.f32 %v4211_v37, %v1341_v52  ;;  %v1132_v58 = vadd.f32 %v5016_v53, %v1028_v12  ;;  %v4384_v37 = vld [vmem:[#allocation2 + $0x23] sm:$0xff] }
 0x316   :  { %v4346_v62 = vadd.f32 %v1584_v55, %v1528_v56  ;;  %v4348_v38 = vadd.f32 %v1574_v7, %v1502_v16  ;;  %v5018_v56 = vld [vmem:[#allocation59_spill] sm:$0xff]  ;;  %v5023_v36 = vld [vmem:[#allocation30_spill] sm:$0xff]  ;;  %v1872_v52 = vmul.f32 %v4392_v50, %v4384_v37  ;;  %v5026_v12 = vld [vmem:[#allocation41_spill] sm:$0xff] }
 0x317   :  { %v1400_v16 = vadd.f32 %v5018_v56, %v1292_v13  ;;  %v1240_v23 = vadd.f32 %v5021_v24, %v1132_v58  ;;  %v1027_v20 = vadd.f32 %v5027_v18, %v5026_v12  ;;  %v5029_v13 = vld [vmem:[#allocation56_spill] sm:$0xff]  ;;  %v5032_v56 = vld [vmem:[#allocation46_spill] sm:$0xff]  ;;  %v5040_v18 = vld [vmem:[#allocation55_spill] sm:$0xff] }
 0x318   :  { %1849 = vrot.lane.b32.xlu2 %v1841_v14, %s3017_s6 }
 0x319   :  { %1853 = vrot.lane.b32.xlu1 %v1843_v63, %s3017_s6  ;;  %1827 = vrot.lane.b32.xlu0 %v1817_v27, %s3017_s6  ;;  %v5022_v63 = vld [vmem:[#allocation39_spill] sm:$0xff]  ;;  %v1504_v27 = vadd.f32 %v4207_v51, %v1400_v16  ;;  %v1344_v4 = vadd.f32 %v5024_v0, %v1240_v23  ;;  %v1896_v23 = vstv %s4396_s17  ;;  %v5038_v0 = vld [vmem:[#allocation22_spill] sm:$0xff]  ;;  %s2797_s17 = sld [smem:[#allocation8 + $0x56]] }
 0x31a   :  { %v1618_v46 = vpop.permute.xlu2 %1617  ;;  %v1214_v8 = vadd.f32 %v5022_v63, %v1106_v32  ;;  %v5033_v16 = vld [vmem:[#allocation43_spill] sm:$0xff] }
 0x31b   :  { %v4375_v33 = vadd.f32 %v1618_v46, %v4252_v9  ;;  %v1542_v55 = vpop.permute.xlu1 %1541  ;;  %v1516_v7 = vpop.permute.xlu0 %1515  ;;  %v5019_v9 = vld [vmem:[#allocation50_spill] sm:$0xff]  ;;  %v1452_v35 = vadd.f32 %v4239_v39, %v1344_v4  ;;  %v4424_v40 = vadd.f32 %v1576_v26, %v1504_v27  ;;  %v4430_v39 = vld [vmem:[#allocation2 + $0x1b] sm:$0xff] }
 0x31c   :  { %v1553_v57 = vadd.f32 %v1542_v55, %v1449_v21  ;;  %v1527_v43 = vadd.f32 %v1516_v7, %v1423_v28  ;;  %v997_v14 = vadd.f32 %v5020_v19, %v5019_v9  ;;  %v1318_v51 = vadd.f32 %v5025_v10, %v1214_v8  ;;  %v4422_v28 = vld [vmem:[#allocation2 + $0x4b] sm:$0xff]  ;;  %v5030_v21 = vld [vmem:[#allocation53_spill] sm:$0xff] }
 0x31d   :  { %v1586_v7 = vmul.f32 %v4317_v34, %v4100_v31  ;;  %v1873_v19 = vmul.f32 %v4392_v50, %v4422_v28  ;;  %v5036_v8 = vld [vmem:[#allocation37_spill] sm:$0xff] }
 0x31e   :  { %v4398_v22 = vadd.f32 %v1593_v60, %v1553_v57  ;;  %v4400_v45 = vadd.f32 %v1583_v47, %v1527_v43  ;;  %v1105_v49 = vadd.f32 %v5023_v36, %v997_v14  ;;  %v1426_v54 = vadd.f32 %v5029_v13, %v1318_v51  ;;  %v5031_v60 = vld [vmem:[#allocation25_spill] sm:$0xff]  ;;  %v5034_v43 = vld [vmem:[#allocation60_spill] sm:$0xff]  ;;  %v5035_v14 = vld [vmem:[#allocation42_spill] sm:$0xff] }
 0x31f   :  { %v1131_v47 = vadd.f32 %v5031_v60, %v1027_v20  ;;  %v1026_v57 = vadd.f32 %v5033_v16, %v5032_v56  ;;  %v1585_v51 = vmul.f32 %v4317_v34, %v4090_v3  ;;  %v1595_v34 = vmul.f32 %v4367_v44, %v4090_v3 }
 0x320   :  { %1855 = vrot.lane.b32.xlu2 %v1844_v2, %s3017_s6  ;;  %v1213_v46 = vadd.f32 %v5028_v61, %v1105_v49  ;;  %v1871_v49 = vmul.f32 %v4392_v50, %v4430_v39  ;;  %v1594_v3 = vmul.f32 %v4367_v44, %v4106_v11  ;;  %v1922_v16 = vstv %s2783_s22  ;;  %s2803_s22 = sld [smem:[#allocation8 + $0x5c]] }
 0x321   :  { %1881 = vrot.lane.b32.xlu1 %v1872_v52, %s3018_s10  ;;  %1851 = vrot.lane.b32.xlu0 %v1842_v15, %s3017_s6  ;;  %v1239_v24 = vadd.f32 %v5035_v14, %v1131_v47  ;;  %v1130_v27 = vadd.f32 %v5036_v8, %v1026_v57  ;;  %v5037_v52 = vld [vmem:[#allocation52_spill] sm:$0xff]  ;;  %v1925_v57 = vmul.f32 %v1922_v16, %v4422_v28  ;;  %v1948_v14 = vstv %s2784_s1  ;;  %s2807_s1 = sld [smem:[#allocation8 + $0x60]] }
 0x322   :  { %v1642_v30 = vpop.permute.xlu2 %1641  ;;  %v1317_v53 = vadd.f32 %v5030_v21, %v1213_v46  ;;  %v5041_v21 = vld [vmem:[#allocation61_spill] sm:$0xff]  ;;  %v1899_v11 = vmul.f32 %v1896_v23, %v4422_v28 }
 0x323   :  { %v4420_v29 = vadd.f32 %v1642_v30, %v4294_v17  ;;  %v1548_v58 = vpop.permute.xlu1 %1547  ;;  %v1522_v55 = vpop.permute.xlu0 %1521  ;;  %v1596_v17 = vmul.f32 %v4367_v44, %v4100_v31  ;;  %v1897_v31 = vmul.f32 %v1896_v23, %v4430_v39  ;;  %v1343_v15 = vadd.f32 %v5037_v52, %v1239_v24 }
 0x324   :  { %v1556_v41 = vadd.f32 %v1548_v58, %v1452_v35  ;;  %v1530_v32 = vadd.f32 %v1522_v55, %v1426_v54  ;;  %v1425_v9 = vadd.f32 %v5034_v43, %v1317_v53  ;;  %v1238_v4 = vadd.f32 %v5038_v0, %v1130_v27  ;;  %v4463_v35 = vld [vmem:[#allocation2 + $0x53] sm:$0xff] }
 0x325   :  { %v1950_v24 = vmul.f32 %v1948_v14, %v4384_v37 }
 0x326   :  { %v1600_v2 = vadd.f32 %v1596_v17, %v1556_v41  ;;  %v4441_v63 = vadd.f32 %v1586_v7, %v1530_v32  ;;  %v1529_v36 = vadd.f32 %v4231_v42, %v1425_v9  ;;  %v5039_v42 = vld [vmem:[#allocation58_spill] sm:$0xff]  ;;  %v1342_v20 = vadd.f32 %v5040_v18, %v1238_v4 }
 0x327   :  { %v1451_v26 = vadd.f32 %v5039_v42, %v1343_v15  ;;  %v1900_v7 = vmul.f32 %v1896_v23, %v4463_v35  ;;  %v1949_v15 = vmul.f32 %v1948_v14, %v4430_v39  ;;  %v1952_v18 = vmul.f32 %v1948_v14, %v4463_v35 }
 0x328   :  { %1883 = vrot.lane.b32.xlu2 %v1873_v19, %s3018_s10  ;;  %v4460_v30 = vadd.f32 %v1585_v51, %v1529_v36  ;;  %v1450_v53 = vadd.f32 %v5041_v21, %v1342_v20  ;;  %v1926_v19 = vmul.f32 %v1922_v16, %v4463_v35 }
 0x329   :  { %1905 = vrot.lane.b32.xlu1 %v1897_v31, %s3018_s10  ;;  %1879 = vrot.lane.b32.xlu0 %v1871_v49, %s3018_s10  ;;  %v1951_v31 = vmul.f32 %v1948_v14, %v4422_v28  ;;  %v1974_v49 = vstv %s2785_s24  ;;  %v4549_v14 = vld [vmem:[#allocation2 + $0x24] sm:$0xff] }
 0x32a   :  { %v1666_v10 = vpop.permute.xlu2 %1665  ;;  %v1554_v55 = vadd.f32 %v4269_v25, %v1450_v53  ;;  %v1975_v52 = vmul.f32 %v1974_v49, %v4430_v39  ;;  %v1976_v42 = vmul.f32 %v1974_v49, %v4384_v37 }
 0x32b   :  { %v4457_v12 = vadd.f32 %v1666_v10, %v4346_v62  ;;  %v1616_v61 = vpop.permute.xlu1 %1615  ;;  %v1546_v46 = vpop.permute.xlu0 %1545  ;;  %v1898_v62 = vmul.f32 %v1896_v23, %v4384_v37  ;;  %v1924_v23 = vmul.f32 %v1922_v16, %v4384_v37 }
 0x32c   :  { %v1625_v13 = vadd.f32 %v1616_v61, %v4296_v1  ;;  %v1555_v54 = vadd.f32 %v1546_v46, %v1451_v26  ;;  %v1874_v1 = vmul.f32 %v4392_v50, %v4463_v35  ;;  %v1598_v32 = vadd.f32 %v1594_v3, %v1554_v55 }
 0x32d   :  { %v1923_v50 = vmul.f32 %v1922_v16, %v4430_v39  ;;  %v1978_v26 = vmul.f32 %v1974_v49, %v4463_v35  ;;  %v1623_v55 = vadd.f32 %v4311_v59, %v4222_v6 }
 0x32e   :  { %v1599_v58 = vadd.f32 %v1595_v34, %v1555_v54 }
 0x330   :  { %1907 = vrot.lane.b32.xlu2 %v1898_v62, %s3018_s10  ;;  %v1977_v62 = vmul.f32 %v1974_v49, %v4422_v28 }
 0x331   :  { %1911 = vrot.lane.b32.xlu1 %v1900_v7, %s3018_s10  ;;  %1885 = vrot.lane.b32.xlu0 %v1874_v1, %s3018_s10 }
 0x332   :  { %v1694_v60 = vpop.permute.xlu2 %1693 }
 0x333   :  { %v4479_v47 = vadd.f32 %v1694_v60, %v4398_v22  ;;  %v1640_v41 = vpop.permute.xlu1 %1639  ;;  %v1614_v25 = vpop.permute.xlu0 %1613 }
 0x334   :  { %v1650_v17 = vadd.f32 %v1640_v41, %v4348_v38  ;;  %v1624_v56 = vadd.f32 %v1614_v25, %v4321_v48 }
 0x338   :  { %1931 = vrot.lane.b32.xlu2 %v1923_v50, %s3019_s13 }
 0x339   :  { %1935 = vrot.lane.b32.xlu1 %v1925_v57, %s3019_s13  ;;  %1909 = vrot.lane.b32.xlu0 %v1899_v11, %s3018_s10  ;;  %s2786_s10 = sld [smem:[#allocation8 + $0x4b]] }
 0x33a   :  { %v1700_v44 = vpop.permute.xlu2 %1699 }
 0x33b   :  { %v4489_v22 = vadd.f32 %v1700_v44, %v1600_v2  ;;  %v1664_v38 = vpop.permute.xlu1 %1663  ;;  %v1638_v43 = vpop.permute.xlu0 %1637  ;;  %v4539_v44 = vld [vmem:[#allocation2 + $0x1c] sm:$0xff] }
 0x33c   :  { %v1675_v48 = vadd.f32 %v1664_v38, %v4400_v45  ;;  %v1649_v9 = vadd.f32 %v1638_v43, %v4369_v5  ;;  %v2056_v43 = vstv %s2788_s27 }
 0x33f   :  { %v2000_v34 = vstv %s2786_s10 }
 0x340   :  { %1937 = vrot.lane.b32.xlu2 %v1926_v19, %s3019_s13  ;;  %v2001_v21 = vmul.f32 %v2000_v34, %v4430_v39  ;;  %v2003_v53 = vmul.f32 %v2000_v34, %v4422_v28  ;;  %v2004_v25 = vmul.f32 %v2000_v34, %v4463_v35 }
 0x341   :  { %1959 = vrot.lane.b32.xlu1 %v1950_v24, %s3019_s13  ;;  %1933 = vrot.lane.b32.xlu0 %v1924_v23, %s3019_s13 }
 0x342   :  { %v1724_v2 = vpop.permute.xlu2 %1723 }
 0x343   :  { %v4499_v8 = vadd.f32 %v1724_v2, %v1625_v13  ;;  %v1670_v45 = vpop.permute.xlu1 %1669  ;;  %v1644_v27 = vpop.permute.xlu0 %1643  ;;  %v4552_v2 = vld [vmem:[#allocation2 + $0x54] sm:$0xff] }
 0x344   :  { %v1678_v5 = vadd.f32 %v1670_v45, %v4441_v63  ;;  %v1652_v36 = vadd.f32 %v1644_v27, %v4424_v40  ;;  %v2058_v45 = vmul.f32 %v2056_v43, %v4549_v14 }
 0x348   :  { %1961 = vrot.lane.b32.xlu2 %v1951_v31, %s3019_s13 }
 0x349   :  { %1983 = vrot.lane.b32.xlu1 %v1975_v52, %s3019_s13  ;;  %1957 = vrot.lane.b32.xlu0 %v1949_v15, %s3019_s13  ;;  %v2082_v15 = vstv %s2789_s28 }
 0x34a   :  { %v1748_v0 = vpop.permute.xlu2 %1747 }
 0x34b   :  { %v4509_v4 = vadd.f32 %v1748_v0, %v1650_v17  ;;  %v1698_v10 = vpop.permute.xlu1 %1697  ;;  %v1668_v63 = vpop.permute.xlu0 %1667  ;;  %v4563_v0 = vld [vmem:[#allocation2 + $0x4c] sm:$0xff] }
 0x34c   :  { %v1707_v51 = vadd.f32 %v1698_v10, %v1599_v58  ;;  %v1677_v40 = vadd.f32 %v1668_v63, %v4460_v30  ;;  %v2083_v10 = vmul.f32 %v2082_v15, %v4539_v44  ;;  %v2059_v63 = vmul.f32 %v2056_v43, %v4563_v0 }
 0x350   :  { %1985 = vrot.lane.b32.xlu2 %v1976_v42, %s3019_s13 }
 0x351   :  { %1989 = vrot.lane.b32.xlu1 %v1978_v26, %s3019_s13  ;;  %1963 = vrot.lane.b32.xlu0 %v1952_v18, %s3019_s13 }
 0x352   :  { %v1772_v20 = vpop.permute.xlu2 %1771 }
 0x353   :  { %v4518_v61 = vadd.f32 %v1772_v20, %v1675_v48  ;;  %v1722_v46 = vpop.permute.xlu1 %1721  ;;  %v1696_v13 = vpop.permute.xlu0 %1695  ;;  %v2086_v20 = vmul.f32 %v2082_v15, %v4552_v2 }
 0x354   :  { %v1732_v54 = vadd.f32 %v1722_v46, %v1624_v56  ;;  %v1706_v30 = vadd.f32 %v1696_v13, %v1598_v32  ;;  %v2026_v32 = vstv %s2787_s26  ;;  %v2002_v56 = vmul.f32 %v2000_v34, %v4384_v37  ;;  %s2698_s26 = sshll.u32 %s4851_s3, 4  ;;  %s2699_s26 = int_to_ptr.hbm [resolvable:$true] %s2698_s26 }
 0x355   :  { %v2028_v17 = vmul.f32 %v2026_v32, %v4384_v37  ;;  %v2029_v38 = vmul.f32 %v2026_v32, %v4422_v28  ;;  %v2057_v37 = vmul.f32 %v2056_v43, %v4539_v44  ;;  %v2027_v48 = vmul.f32 %v2026_v32, %v4430_v39 }
 0x356   :  { %v2060_v39 = vmul.f32 %v2056_v43, %v4552_v2  ;;  %v2030_v27 = vmul.f32 %v2026_v32, %v4463_v35  ;;  %v2085_v35 = vmul.f32 %v2082_v15, %v4563_v0  ;;  %v2108_v46 = vstv %s2790_s30 }
 0x357   :  { %v2110_v13 = vmul.f32 %v2108_v46, %v4549_v14 }
 0x358   :  { %2009 = vrot.lane.b32.xlu2 %v2001_v21, %s3019_s13 }
 0x359   :  { %2013 = vrot.lane.b32.xlu1 %v2003_v53, %s3019_s13  ;;  %1987 = vrot.lane.b32.xlu0 %v1977_v62, %s3019_s13 }
 0x35a   :  { %v1778_v58 = vpop.permute.xlu2 %1777 }
 0x35b   :  { %v4528_v7 = vadd.f32 %v1778_v58, %v1678_v5  ;;  %v1746_v1 = vpop.permute.xlu1 %1745  ;;  %v1720_v60 = vpop.permute.xlu0 %1719  ;;  %v2111_v58 = vmul.f32 %v2108_v46, %v4563_v0 }
 0x35c   :  { %v1757_v3 = vadd.f32 %v1746_v1, %v1649_v9  ;;  %v1731_v41 = vadd.f32 %v1720_v60, %v1623_v55  ;;  %v2109_v60 = vmul.f32 %v2108_v46, %v4539_v44 }
 0x360   :  { %2015 = vrot.lane.b32.xlu2 %v2004_v25, %s3019_s13 }
 0x361   :  { %2037 = vrot.lane.b32.xlu1 %v2028_v17, %s3020_s18  ;;  %2011 = vrot.lane.b32.xlu0 %v2002_v56, %s3019_s13 }
 0x362   :  { %v1802_v6 = vpop.permute.xlu2 %1801 }
 0x363   :  { %v4536_v59 = vadd.f32 %v1802_v6, %v1707_v51  ;;  %v1752_v16 = vpop.permute.xlu1 %1751  ;;  %v1726_v50 = vpop.permute.xlu0 %1725 }
 0x364   :  { %v1760_v57 = vadd.f32 %v1752_v16, %v1652_v36  ;;  %v1734_v11 = vadd.f32 %v1726_v50, %v4375_v33  ;;  %v2112_v16 = vmul.f32 %v2108_v46, %v4552_v2 }
 0x368   :  { %2039 = vrot.lane.b32.xlu2 %v2029_v38, %s3020_s18 }
 0x369   :  { %2065 = vrot.lane.b32.xlu1 %v2057_v37, %s3021_s19  ;;  %2035 = vrot.lane.b32.xlu0 %v2027_v48, %s3020_s18  ;;  %v2160_v37 = vstv %s2792_s4 }
 0x36a   :  { %v1826_v9 = vpop.permute.xlu2 %1825  ;;  %v2161_v48 = vmul.f32 %v2160_v37, %v4539_v44 }
 0x36b   :  { %v4547_v19 = vadd.f32 %v1826_v9, %v1732_v54  ;;  %v1776_v33 = vpop.permute.xlu1 %1775  ;;  %v1750_v24 = vpop.permute.xlu0 %1749  ;;  %v2084_v54 = vmul.f32 %v2082_v15, %v4549_v14  ;;  %v2163_v9 = vmul.f32 %v2160_v37, %v4563_v0 }
 0x36c   :  { %v1785_v23 = vadd.f32 %v1776_v33, %v1677_v40  ;;  %v1759_v28 = vadd.f32 %v1750_v24, %v4420_v29 }
 0x370   :  { %2067 = vrot.lane.b32.xlu2 %v2058_v45, %s3021_s19 }
 0x371   :  { %2071 = vrot.lane.b32.xlu1 %v2060_v39, %s3021_s19  ;;  %2041 = vrot.lane.b32.xlu0 %v2030_v27, %s3020_s18  ;;  %s2791_s18 = sld [smem:[#allocation8 + $0x50]]  ;;  %v2164_v27 = vmul.f32 %v2160_v37, %v4552_v2 }
 0x372   :  { %v1850_v5 = vpop.permute.xlu2 %1849 }
 0x373   :  { %v4560_v36 = vadd.f32 %v1850_v5, %v1757_v3  ;;  %v1800_v31 = vpop.permute.xlu1 %1799  ;;  %v1774_v29 = vpop.permute.xlu0 %1773  ;;  %v2186_v5 = vstv %s2793_s5 }
 0x374   :  { %v1810_v49 = vadd.f32 %v1800_v31, %v1706_v30  ;;  %v1784_v52 = vadd.f32 %v1774_v29, %v4457_v12  ;;  %v2188_v31 = vmul.f32 %v2186_v5, %v4549_v14  ;;  %v2162_v29 = vmul.f32 %v2160_v37, %v4549_v14 }
 0x377   :  { %v2134_v55 = vstv %s2791_s18 }
 0x378   :  { %2091 = vrot.lane.b32.xlu2 %v2083_v10, %s3021_s19  ;;  %v2135_v1 = vmul.f32 %v2134_v55, %v4539_v44  ;;  %v2136_v56 = vmul.f32 %v2134_v55, %v4549_v14  ;;  %v2138_v6 = vmul.f32 %v2134_v55, %v4552_v2  ;;  %v2137_v33 = vmul.f32 %v2134_v55, %v4563_v0 }
 0x379   :  { %2095 = vrot.lane.b32.xlu1 %v2085_v35, %s3021_s19  ;;  %2069 = vrot.lane.b32.xlu0 %v2059_v63, %s3021_s19  ;;  %v2189_v63 = vmul.f32 %v2186_v5, %v4563_v0  ;;  %v2364_v55 = vstv %s2802_s7 }
 0x37a   :  { %v1856_v51 = vpop.permute.xlu2 %1855 }
 0x37b   :  { %v4571_v40 = vadd.f32 %v1856_v51, %v1760_v57  ;;  %v1824_v12 = vpop.permute.xlu1 %1823  ;;  %v1798_v42 = vpop.permute.xlu0 %1797 }
 0x37c   :  { %v1835_v26 = vadd.f32 %v1824_v12, %v1731_v41  ;;  %v1809_v18 = vadd.f32 %v1798_v42, %v4479_v47  ;;  %v2187_v42 = vmul.f32 %v2186_v5, %v4539_v44 }
 0x380   :  { %2097 = vrot.lane.b32.xlu2 %v2086_v20, %s3021_s19 }
 0x381   :  { %2119 = vrot.lane.b32.xlu1 %v2110_v13, %s3021_s19  ;;  %2093 = vrot.lane.b32.xlu0 %v2084_v54, %s3021_s19 }
 0x382   :  { %v1884_v30 = vpop.permute.xlu2 %1883 }
 0x383   :  { %v4580_v34 = vadd.f32 %v1884_v30, %v1785_v23  ;;  %v1830_v21 = vpop.permute.xlu1 %1829  ;;  %v1804_v53 = vpop.permute.xlu0 %1803 }
 0x384   :  { %v1838_v47 = vadd.f32 %v1830_v21, %v1734_v11  ;;  %v1812_v62 = vadd.f32 %v1804_v53, %v4489_v22 }
 0x388   :  { %2121 = vrot.lane.b32.xlu2 %v2111_v58, %s3021_s19 }
 0x389   :  { %2143 = vrot.lane.b32.xlu1 %v2135_v1, %s3022_s25  ;;  %2117 = vrot.lane.b32.xlu0 %v2109_v60, %s3021_s19  ;;  %v4639_v1 = vld [vmem:[#allocation2 + $0x4e] sm:$0xff] }
 0x38a   :  { %v1908_v3 = vpop.permute.xlu2 %1907 }
 0x38b   :  { %v4589_v41 = vadd.f32 %v1908_v3, %v1810_v49  ;;  %v1854_v25 = vpop.permute.xlu1 %1853  ;;  %v1828_v32 = vpop.permute.xlu0 %1827 }
 0x38c   :  { %v1863_v17 = vadd.f32 %v1854_v25, %v1759_v28  ;;  %v1837_v22 = vadd.f32 %v1828_v32, %v4499_v8 }
 0x390   :  { %2145 = vrot.lane.b32.xlu2 %v2136_v56, %s3022_s25 }
 0x391   :  { %2149 = vrot.lane.b32.xlu1 %v2138_v6, %s3022_s25  ;;  %2123 = vrot.lane.b32.xlu0 %v2112_v16, %s3021_s19  ;;  %s2794_s19 = sld [smem:[#allocation8 + $0x53]]  ;;  %v4652_v16 = vld [vmem:[#allocation2 + $0x26] sm:$0xff] }
 0x392   :  { %v1932_v50 = vpop.permute.xlu2 %1931 }
 0x393   :  { %v4598_v57 = vadd.f32 %v1932_v50, %v1835_v26  ;;  %v1882_v11 = vpop.permute.xlu1 %1881  ;;  %v1852_v38 = vpop.permute.xlu0 %1851 }
 0x394   :  { %v1892_v43 = vadd.f32 %v1882_v11, %v1784_v52  ;;  %v1862_v8 = vadd.f32 %v1852_v38, %v4509_v4  ;;  %v2468_v11 = vstv %s2806_s8  ;;  %v2366_v38 = vmul.f32 %v2364_v55, %v4652_v16 }
 0x397   :  { %v2212_v51 = vstv %s2794_s19 }
 0x398   :  { %2169 = vrot.lane.b32.xlu2 %v2161_v48, %s3022_s25  ;;  %v2213_v12 = vmul.f32 %v2212_v51, %v4539_v44  ;;  %v2214_v54 = vmul.f32 %v2212_v51, %v4549_v14  ;;  %v2216_v30 = vmul.f32 %v2212_v51, %v4552_v2  ;;  %v2190_v44 = vmul.f32 %v2186_v5, %v4552_v2  ;;  %v4673_v5 = vld [vmem:[#allocation2 + $0x25] sm:$0xff] }
 0x399   :  { %2173 = vrot.lane.b32.xlu1 %v2163_v9, %s3022_s25  ;;  %2147 = vrot.lane.b32.xlu0 %v2137_v33, %s3022_s25  ;;  %v2367_v2 = vmul.f32 %v2364_v55, %v4639_v1  ;;  %v2215_v3 = vmul.f32 %v2212_v51, %v4563_v0  ;;  %v2470_v0 = vmul.f32 %v2468_v11, %v4652_v16  ;;  %v4663_v33 = vld [vmem:[#allocation2 + $0x1d] sm:$0xff] }
 0x39a   :  { %v1938_v24 = vpop.permute.xlu2 %1937 }
 0x39b   :  { %v4607_v23 = vadd.f32 %v1938_v24, %v1838_v47  ;;  %v1906_v28 = vpop.permute.xlu1 %1905  ;;  %v1880_v45 = vpop.permute.xlu0 %1879  ;;  %v4636_v47 = vld [vmem:[#allocation2 + $0x1e] sm:$0xff]  ;;  %v2471_v24 = vmul.f32 %v2468_v11, %v4639_v1 }
 0x39c   :  { %v1917_v4 = vadd.f32 %v1906_v28, %v1809_v18  ;;  %v1891_v39 = vadd.f32 %v1880_v45, %v4518_v61  ;;  %v2365_v60 = vmul.f32 %v2364_v55, %v4636_v47  ;;  %v2282_v28 = vstv %s2799_s9 }
 0x39d   :  { %v2283_v45 = vmul.f32 %v2282_v28, %v4663_v33 }
 0x3a0   :  { %2175 = vrot.lane.b32.xlu2 %v2164_v27, %s3022_s25 }
 0x3a1   :  { %2197 = vrot.lane.b32.xlu1 %v2188_v31, %s3022_s25  ;;  %2171 = vrot.lane.b32.xlu0 %v2162_v29, %s3022_s25 }
 0x3a2   :  { %v1962_v49 = vpop.permute.xlu2 %1961 }
 0x3a3   :  { %v4616_v52 = vadd.f32 %v1962_v49, %v1863_v17  ;;  %v1912_v15 = vpop.permute.xlu1 %1911  ;;  %v1886_v10 = vpop.permute.xlu0 %1885 }
 0x3a4   :  { %v1920_v61 = vadd.f32 %v1912_v15, %v1812_v62  ;;  %v1894_v35 = vadd.f32 %v1886_v10, %v4528_v7  ;;  %v4678_v15 = vld [vmem:[#allocation2 + $0x55] sm:$0xff]  ;;  %v2284_v10 = vmul.f32 %v2282_v28, %v4673_v5 }
 0x3a8   :  { %2199 = vrot.lane.b32.xlu2 %v2189_v63, %s3022_s25 }
 0x3a9   :  { %2221 = vrot.lane.b32.xlu1 %v2213_v12, %s3022_s25  ;;  %2195 = vrot.lane.b32.xlu0 %v2187_v42, %s3022_s25 }
 0x3aa   :  { %v1986_v26 = vpop.permute.xlu2 %1985 }
 0x3ab   :  { %v4625_v18 = vadd.f32 %v1986_v26, %v1892_v43  ;;  %v1936_v20 = vpop.permute.xlu1 %1935  ;;  %v1910_v46 = vpop.permute.xlu0 %1909 }
 0x3ac   :  { %v1945_v13 = vadd.f32 %v1936_v20, %v1837_v22  ;;  %v1919_v7 = vadd.f32 %v1910_v46, %v4536_v59  ;;  %v4691_v46 = vld [vmem:[#allocation2 + $0x4d] sm:$0xff] }
 0x3b0   :  { %2223 = vrot.lane.b32.xlu2 %v2214_v54, %s3022_s25  ;;  %v2285_v54 = vmul.f32 %v2282_v28, %v4691_v46 }
 0x3b1   :  { %2227 = vrot.lane.b32.xlu1 %v2216_v30, %s3022_s25  ;;  %2201 = vrot.lane.b32.xlu0 %v2190_v44, %s3022_s25 }
 0x3b2   :  { %v2010_v21 = vpop.permute.xlu2 %2009 }
 0x3b3   :  { %v4634_v53 = vadd.f32 %v2010_v21, %v1917_v4  ;;  %v1960_v62 = vpop.permute.xlu1 %1959  ;;  %v1934_v59 = vpop.permute.xlu0 %1933  ;;  %v2469_v4 = vmul.f32 %v2468_v11, %v4636_v47 }
 0x3b4   :  { %v1970_v58 = vadd.f32 %v1960_v62, %v1862_v8  ;;  %v1944_v14 = vadd.f32 %v1934_v59, %v4547_v19  ;;  %v4649_v19 = vld [vmem:[#allocation2 + $0x56] sm:$0xff] }
 0x3b5   :  { %v2368_v50 = vmul.f32 %v2364_v55, %v4649_v19 }
 0x3b8   :  { %2373 = vrot.lane.b32.xlu2 %v2365_v60, %s3013_s0 }
 0x3b9   :  { %2377 = vrot.lane.b32.xlu1 %v2367_v2, %s3013_s0  ;;  %2225 = vrot.lane.b32.xlu0 %v2215_v3, %s3022_s25  ;;  %s2801_s25 = sld [smem:[#allocation8 + $0x5a]] }
 0x3ba   :  { %v2016_v25 = vpop.permute.xlu2 %2015 }
 0x3bb   :  { %v4647_v32 = vadd.f32 %v2016_v25, %v1920_v61  ;;  %v1984_v17 = vpop.permute.xlu1 %1983  ;;  %v1958_v22 = vpop.permute.xlu0 %1957  ;;  %v2286_v61 = vmul.f32 %v2282_v28, %v4678_v15 }
 0x3bc   :  { %v1995_v56 = vadd.f32 %v1984_v17, %v1891_v39  ;;  %v1969_v6 = vadd.f32 %v1958_v22, %v4560_v36 }
 0x3c0   :  { %2379 = vrot.lane.b32.xlu2 %v2368_v50, %s3013_s0 }
 0x3c1   :  { %2479 = vrot.lane.b32.xlu1 %v2470_v0, %s3016_s29  ;;  %2375 = vrot.lane.b32.xlu0 %v2366_v38, %s3013_s0  ;;  %s2800_s0 = sld [smem:[#allocation8 + $0x59]] }
 0x3c2   :  { %v2040_v43 = vpop.permute.xlu2 %2039 }
 0x3c3   :  { %v4660_v8 = vadd.f32 %v2040_v43, %v1945_v13  ;;  %v1990_v36 = vpop.permute.xlu1 %1989  ;;  %v1964_v37 = vpop.permute.xlu0 %1963 }
 0x3c4   :  { %v1998_v48 = vadd.f32 %v1990_v36, %v1894_v35  ;;  %v1972_v9 = vadd.f32 %v1964_v37, %v4571_v40  ;;  %v2472_v35 = vmul.f32 %v2468_v11, %v4649_v19 }
 0x3c7   :  { %v2308_v20 = vstv %s2800_s0 }
 0x3c8   :  { %2481 = vrot.lane.b32.xlu2 %v2471_v24, %s3016_s29  ;;  %v2309_v13 = vmul.f32 %v2308_v20, %v4663_v33  ;;  %v2310_v60 = vmul.f32 %v2308_v20, %v4673_v5 }
 0x3c9   :  { %2291 = vrot.lane.b32.xlu1 %v2283_v45, %s3015_s23  ;;  %2477 = vrot.lane.b32.xlu0 %v2469_v4, %s3016_s29 }
 0x3ca   :  { %v2068_v39 = vpop.permute.xlu2 %2067 }
 0x3cb   :  { %v4671_v27 = vadd.f32 %v2068_v39, %v1970_v58  ;;  %v2014_v40 = vpop.permute.xlu1 %2013  ;;  %v1988_v31 = vpop.permute.xlu0 %1987  ;;  %v2312_v58 = vmul.f32 %v2308_v20, %v4678_v15 }
 0x3cc   :  { %v4675_v29 = vadd.f32 %v2014_v40, %v1919_v7  ;;  %v1997_v49 = vadd.f32 %v1988_v31, %v4580_v34  ;;  %v2311_v7 = vmul.f32 %v2308_v20, %v4691_v46 }
 0x3d0   :  { %2293 = vrot.lane.b32.xlu2 %v2284_v10, %s3015_s23 }
 0x3d1   :  { %2297 = vrot.lane.b32.xlu1 %v2286_v61, %s3015_s23  ;;  %2483 = vrot.lane.b32.xlu0 %v2472_v35, %s3016_s29 }
 0x3d2   :  { %v2092_v63 = vpop.permute.xlu2 %2091 }
 0x3d3   :  { %v4686_v51 = vadd.f32 %v2092_v63, %v1995_v56  ;;  %v2038_v12 = vpop.permute.xlu1 %2037  ;;  %v2012_v34 = vpop.permute.xlu0 %2011  ;;  %v2416_v56 = vstv %s2804_s11 }
 0x3d4   :  { %v2048_v42 = vadd.f32 %v2038_v12, %v1944_v14  ;;  %v4689_v26 = vadd.f32 %v2012_v34, %v4589_v41  ;;  %v2334_v14 = vstv %s2801_s25  ;;  %v2418_v37 = vmul.f32 %v2416_v56, %v4652_v16 }
 0x3d5   :  { %v2336_v55 = vmul.f32 %v2334_v14, %v4673_v5  ;;  %v2337_v22 = vmul.f32 %v2334_v14, %v4691_v46  ;;  %v2335_v50 = vmul.f32 %v2334_v14, %v4663_v33  ;;  %v2520_v34 = vstv %s2808_s14 }
 0x3d8   :  { %2317 = vrot.lane.b32.xlu2 %v2309_v13, %s3015_s23 }
 0x3d9   :  { %2321 = vrot.lane.b32.xlu1 %v2311_v7, %s3015_s23  ;;  %2295 = vrot.lane.b32.xlu0 %v2285_v54, %s3015_s23 }
 0x3da   :  { %v2098_v30 = vpop.permute.xlu2 %2097 }
 0x3db   :  { %v4699_v44 = vadd.f32 %v2098_v30, %v1998_v48  ;;  %v2066_v41 = vpop.permute.xlu1 %2065  ;;  %v2036_v21 = vpop.permute.xlu0 %2035  ;;  %v2420_v48 = vmul.f32 %v2416_v56, %v4649_v19 }
 0x3dc   :  { %v2077_v62 = vadd.f32 %v2066_v41, %v1969_v6  ;;  %v2047_v59 = vadd.f32 %v2036_v21, %v4598_v57  ;;  %v2417_v6 = vmul.f32 %v2416_v56, %v4636_v47  ;;  %v2523_v21 = vmul.f32 %v2520_v34, %v4639_v1 }
 0x3e0   :  { %2323 = vrot.lane.b32.xlu2 %v2312_v58, %s3015_s23 }
 0x3e1   :  { %2345 = vrot.lane.b32.xlu1 %v2336_v55, %s3015_s23  ;;  %2319 = vrot.lane.b32.xlu0 %v2310_v60, %s3015_s23 }
 0x3e2   :  { %v4708_v2 = vpop.permute.xlu2 %2121 }
 0x3e3   :  { %v2072_v3 = vpop.permute.xlu1 %2071  ;;  %v2042_v25 = vpop.permute.xlu0 %2041 }
 0x3e4   :  { %v2080_v17 = vadd.f32 %v2072_v3, %v1972_v9  ;;  %v2050_v57 = vadd.f32 %v2042_v25, %v4607_v23  ;;  %v2338_v9 = vmul.f32 %v2334_v14, %v4678_v15 }
 0x3e8   :  { %2347 = vrot.lane.b32.xlu2 %v2337_v22, %s3015_s23 }
 0x3e9   :  { %2425 = vrot.lane.b32.xlu1 %v2417_v6, %s3016_s29  ;;  %2343 = vrot.lane.b32.xlu0 %v2335_v50, %s3015_s23  ;;  %v2252_v6 = vstv %s2796_s15  ;;  %v2272_v50 = vstv %s2798_s16 }
 0x3ea   :  { %v2146_v11 = vpop.permute.xlu2 %2145 }
 0x3eb   :  { %v2156_v0 = vadd.f32 %v2146_v11, %v2048_v42  ;;  %v2096_v38 = vpop.permute.xlu1 %2095  ;;  %v2070_v43 = vpop.permute.xlu0 %2069  ;;  %v2522_v42 = vmul.f32 %v2520_v34, %v4652_v16  ;;  %v2253_v11 = vmul.f32 %v2252_v6, %v4663_v33 }
 0x3ec   :  { %v2105_v36 = vadd.f32 %v2096_v38, %v1997_v49  ;;  %v2079_v23 = vadd.f32 %v2070_v43, %v4616_v52  ;;  %v2442_v52 = vstv %s2805_s12  ;;  %v2419_v49 = vmul.f32 %v2416_v56, %v4639_v1 }
 0x3ed   :  { %v2443_v40 = vmul.f32 %v2442_v52, %v4636_v47  ;;  %v2445_v31 = vmul.f32 %v2442_v52, %v4639_v1  ;;  %v2444_v20 = vmul.f32 %v2442_v52, %v4652_v16  ;;  %v2524_v56 = vmul.f32 %v2520_v34, %v4649_v19 }
 0x3f0   :  { %2427 = vrot.lane.b32.xlu2 %v2418_v37, %s3016_s29 }
 0x3f1   :  { %2431 = vrot.lane.b32.xlu1 %v2420_v48, %s3016_s29  ;;  %2349 = vrot.lane.b32.xlu0 %v2338_v9, %s3015_s23  ;;  %s2795_s23 = sld [smem:[#allocation8 + $0x54]]  ;;  %v2256_v48 = vmul.f32 %v2252_v6, %v4678_v15 }
 0x3f2   :  { %v2170_v24 = vpop.permute.xlu2 %2169 }
 0x3f3   :  { %v2181_v28 = vadd.f32 %v2170_v24, %v2077_v62  ;;  %v2120_v45 = vpop.permute.xlu1 %2119  ;;  %v2094_v4 = vpop.permute.xlu0 %2093 }
 0x3f4   :  { %v2104_v39 = vadd.f32 %v2094_v4, %v4625_v18  ;;  %v2446_v18 = vmul.f32 %v2442_v52, %v4649_v19 }
 0x3f5   :  { %v4750_v43 = vadd.f32 %v2253_v11, %v2181_v28 }
 0x3f7   :  { %v2242_v62 = vstv %s2795_s23 }
 0x3f8   :  { %2451 = vrot.lane.b32.xlu2 %v2443_v40, %s3016_s29  ;;  %v2244_v58 = vmul.f32 %v2242_v62, %v4673_v5 }
 0x3f9   :  { %2455 = vrot.lane.b32.xlu1 %v2445_v31, %s3016_s29  ;;  %2429 = vrot.lane.b32.xlu0 %v2419_v49, %s3016_s29  ;;  %v2273_v31 = vmul.f32 %v2272_v50, %v4663_v33 }
 0x3fa   :  { %v2176_v10 = vpop.permute.xlu2 %2175  ;;  %v2248_v55 = vadd.f32 %v2244_v58, %v2156_v0  ;;  %v2274_v0 = vmul.f32 %v2272_v50, %v4673_v5  ;;  %v2131_v58 = vadd.f32 %v4708_v2, %v4675_v29  ;;  %v2254_v2 = vmul.f32 %v2252_v6, %v4673_v5 }
 0x3fb   :  { %v2184_v61 = vadd.f32 %v2176_v10, %v2080_v17  ;;  %v2144_v35 = vpop.permute.xlu1 %2143  ;;  %v2118_v63 = vpop.permute.xlu0 %2117 }
 0x3fc   :  { %v2155_v12 = vadd.f32 %v2144_v35, %v2047_v59  ;;  %v2521_v59 = vmul.f32 %v2520_v34, %v4636_v47  ;;  %v2129_v4 = vadd.f32 %v2118_v63, %v4634_v53 }
 0x3fd   :  { %v4756_v24 = vadd.f32 %v2256_v48, %v2184_v61  ;;  %v2246_v61 = vmul.f32 %v2242_v62, %v4678_v15 }
 0x400   :  { %2457 = vrot.lane.b32.xlu2 %v2446_v18, %s3016_s29 }
 0x401   :  { %2531 = vrot.lane.b32.xlu1 %v2522_v42, %s3017_s6  ;;  %2453 = vrot.lane.b32.xlu0 %v2444_v20, %s3016_s29 }
 0x402   :  { %v2200_v13 = vpop.permute.xlu2 %2199 }
 0x403   :  { %v2209_v7 = vadd.f32 %v2200_v13, %v2105_v36  ;;  %v2150_v54 = vpop.permute.xlu1 %2149  ;;  %v2124_v30 = vpop.permute.xlu0 %2123 }
 0x404   :  { %v2158_v41 = vadd.f32 %v2150_v54, %v2050_v57  ;;  %v2130_v57 = vadd.f32 %v2120_v45, %v4689_v26  ;;  %v2243_v45 = vmul.f32 %v2242_v62, %v4663_v33  ;;  %v2132_v42 = vadd.f32 %v2124_v30, %v4647_v32 }
 0x406   :  { %v2247_v40 = vadd.f32 %v2243_v45, %v2155_v12  ;;  %v2250_v63 = vadd.f32 %v2246_v61, %v2158_v41  ;;  %v2276_v12 = vmul.f32 %v2272_v50, %v4678_v15  ;;  %v2275_v41 = vmul.f32 %v2272_v50, %v4691_v46 }
 0x408   :  { %2533 = vrot.lane.b32.xlu2 %v2523_v21, %s3017_s6 }
 0x409   :  { %2529 = vrot.lane.b32.xlu0 %v2521_v59, %s3017_s6  ;;  %v2255_v59 = vmul.f32 %v2252_v6, %v4691_v46 }
 0x40a   :  { %v2224_v14 = vpop.permute.xlu2 %2223 }
 0x40b   :  { %v2174_v60 = vpop.permute.xlu1 %2173  ;;  %v2148_v3 = vpop.permute.xlu0 %2147  ;;  %v2234_v22 = vadd.f32 %v2224_v14, %v2130_v57  ;;  %v2245_v14 = vmul.f32 %v2242_v62, %v4691_v46 }
 0x40c   :  { %v2183_v25 = vadd.f32 %v2174_v60, %v2079_v23  ;;  %v2157_v17 = vadd.f32 %v2148_v3, %v4660_v8 }
 0x40d   :  { %v2278_v8 = vadd.f32 %v2274_v0, %v2234_v22 }
 0x40e   :  { %v4773_v60 = vadd.f32 %v2255_v59, %v2183_v25  ;;  %v2249_v57 = vadd.f32 %v2245_v14, %v2157_v17 }
 0x411   :  { %2535 = vrot.lane.b32.xlu0 %v2524_v56, %s3017_s6 }
 0x412   :  { %v4747_v38 = vpop.permute.xlu2 %2373 }
 0x413   :  { %v2198_v36 = vpop.permute.xlu1 %2197  ;;  %v2172_v23 = vpop.permute.xlu0 %2171 }
 0x414   :  { %v2208_v37 = vadd.f32 %v2198_v36, %v2104_v39  ;;  %v2182_v26 = vadd.f32 %v2172_v23, %v4671_v27  ;;  %v2262_v27 = vstv %s2797_s17  ;;  %v2390_v36 = vstv %s2803_s22 }
 0x415   :  { %v2265_v35 = vmul.f32 %v2262_v27, %v4691_v46  ;;  %v2264_v11 = vmul.f32 %v2262_v27, %v4673_v5  ;;  %v2392_v48 = vmul.f32 %v2390_v36, %v4652_v16  ;;  %v2263_v5 = vmul.f32 %v2262_v27, %v4663_v33 }
 0x416   :  { %v2258_v46 = vadd.f32 %v2254_v2, %v2182_v26  ;;  %v2394_v61 = vmul.f32 %v2390_v36, %v4649_v19 }
 0x417   :  { %v2269_v34 = vadd.f32 %v2265_v35, %v2209_v7  ;;  %v4780_v0 = vadd.f32 %v2264_v11, %v2208_v37 }
 0x41a   :  { %v4754_v9 = vpop.permute.xlu2 %2379 }
 0x41b   :  { %v2222_v52 = vpop.permute.xlu1 %2221  ;;  %v2196_v28 = vpop.permute.xlu0 %2195 }
 0x41c   :  { %v2233_v49 = vadd.f32 %v2222_v52, %v2129_v4  ;;  %v2207_v39 = vadd.f32 %v2196_v28, %v4686_v51  ;;  %v2391_v4 = vmul.f32 %v2390_v36, %v4636_v47 }
 0x41e   :  { %v2277_v10 = vadd.f32 %v2273_v31, %v2233_v49  ;;  %v2267_v26 = vadd.f32 %v2263_v5, %v2207_v39 }
 0x420   :  { %v2385_v23 = vadd.f32 %v4747_v38, %v2277_v10  ;;  %v2494_v38 = vstv %s2807_s1 }
 0x421   :  { %v2495_v31 = vmul.f32 %v2494_v38, %v4636_v47 }
 0x422   :  { %v2482_v18 = vpop.permute.xlu2 %2481 }
 0x423   :  { %v2228_v20 = vpop.permute.xlu1 %2227  ;;  %v2202_v53 = vpop.permute.xlu0 %2201 }
 0x424   :  { %v2236_v13 = vadd.f32 %v2228_v20, %v2132_v42  ;;  %v2210_v54 = vadd.f32 %v2202_v53, %v4699_v44  ;;  %v2497_v20 = vmul.f32 %v2494_v38, %v4639_v1 }
 0x426   :  { %v2280_v21 = vadd.f32 %v2276_v12, %v2236_v13  ;;  %v2496_v12 = vmul.f32 %v2494_v38, %v4652_v16 }
 0x428   :  { %v2388_v33 = vadd.f32 %v4754_v9, %v2280_v21  ;;  %v2498_v9 = vmul.f32 %v2494_v38, %v4649_v19 }
 0x42a   :  { %v2294_v51 = vpop.permute.xlu2 %2293 }
 0x42b   :  { %v4770_v7 = vadd.f32 %v2294_v51, %v2248_v55  ;;  %v2378_v32 = vpop.permute.xlu1 %2377  ;;  %v2226_v30 = vpop.permute.xlu0 %2225 }
 0x42c   :  { %v2235_v3 = vadd.f32 %v2226_v30, %v2131_v58 }
 0x42e   :  { %v2279_v44 = vadd.f32 %v2275_v41, %v2235_v3 }
 0x430   :  { %v2387_v22 = vadd.f32 %v2378_v32, %v2279_v44 }
 0x432   :  { %v4776_v56 = vpop.permute.xlu2 %2317  ;;  %v2491_v29 = vadd.f32 %v2482_v18, %v2387_v22 }
 0x433   :  { %v2480_v55 = vpop.permute.xlu1 %2479  ;;  %v2376_v62 = vpop.permute.xlu0 %2375  ;;  %v2329_v2 = vadd.f32 %v4776_v56, %v4750_v43 }
 0x434   :  { %v2386_v25 = vadd.f32 %v2376_v62, %v2278_v8  ;;  %2573 = vrot.lane.b32.xlu0 %v2491_v29, %s3016_s29 }
 0x436   :  { %v2490_v50 = vadd.f32 %v2480_v55, %v2386_v25 }
 0x438   :  { %2571 = vrot.lane.b32.xlu2 %v2490_v50, %s3016_s29 }
 0x43a   :  { %v4784_v17 = vpop.permute.xlu2 %2323 }
 0x43b   :  { %v2292_v6 = vpop.permute.xlu1 %2291  ;;  %v2478_v37 = vpop.permute.xlu0 %2477  ;;  %v2332_v25 = vadd.f32 %v4784_v17, %v4756_v24 }
 0x43c   :  { %v4789_v45 = vadd.f32 %v2292_v6, %v2247_v40  ;;  %v2489_v8 = vadd.f32 %v2478_v37, %v2385_v23  ;;  %2401 = vrot.lane.b32.xlu0 %v2392_v48, %s3016_s29  ;;  %v2266_v40 = vmul.f32 %v2262_v27, %v4678_v15  ;;  %v2393_v15 = vmul.f32 %v2390_v36, %v4639_v1 }
 0x43e   :  { %2569 = vrot.lane.b32.xlu1 %v2489_v8, %s3016_s29  ;;  %v2270_v18 = vadd.f32 %v2266_v40, %v2210_v54 }
 0x440   :  { %2399 = vrot.lane.b32.xlu2 %v2391_v4, %s3016_s29 }
 0x442   :  { %v2348_v52 = vpop.permute.xlu2 %2347 }
 0x443   :  { %v4795_v28 = vadd.f32 %v2348_v52, %v2269_v34  ;;  %v2298_v49 = vpop.permute.xlu1 %2297  ;;  %v2484_v10 = vpop.permute.xlu0 %2483 }
 0x444   :  { %v4800_v35 = vadd.f32 %v2298_v49, %v2250_v63  ;;  %v2492_v39 = vadd.f32 %v2484_v10, %v2388_v33  ;;  %2503 = vrot.lane.b32.xlu0 %v2495_v31, %s3017_s6 }
 0x446   :  { %2575 = vrot.lane.b32.xlu1 %v2492_v39, %s3016_s29 }
 0x448   :  { %2405 = vrot.lane.b32.xlu2 %v2394_v61, %s3016_s29 }
 0x44a   :  { %v2428_v27 = vpop.permute.xlu2 %2427 }
 0x44b   :  { %v2322_v34 = vpop.permute.xlu1 %2321  ;;  %v2296_v47 = vpop.permute.xlu0 %2295 }
 0x44c   :  { %v4807_v42 = vadd.f32 %v2296_v47, %v2249_v57  ;;  %2509 = vrot.lane.b32.xlu0 %v2498_v9, %s3017_s6  ;;  %v2331_v32 = vadd.f32 %v2322_v34, %v4773_v60 }
 0x44e   :  { %2403 = vrot.lane.b32.xlu1 %v2393_v15, %s3016_s29  ;;  %v2606_v15 = vstv %s4850_s2  ;;  %s3023_s2 = smov [#allocation9]  }
 0x450   :  { %2507 = vrot.lane.b32.xlu2 %v2497_v20, %s3017_s6 }
 0x452   :  { %v2452_v19 = vpop.permute.xlu2 %2451 }
 0x453   :  { %v2346_v53 = vpop.permute.xlu1 %2345  ;;  %v2320_v63 = vpop.permute.xlu0 %2319 }
 0x454   :  { %v2330_v57 = vadd.f32 %v2320_v63, %v2258_v46  ;;  %v2356_v23 = vadd.f32 %v2346_v53, %v4780_v0 }
 0x456   :  { %2505 = vrot.lane.b32.xlu1 %v2496_v12, %s3017_s6  ;;  %v2438_v16 = vadd.f32 %v2428_v27, %v2330_v57 }
 0x45a   :  { %v2458_v51 = vpop.permute.xlu2 %2457 }
 0x45b   :  { %v2426_v13 = vpop.permute.xlu1 %2425  ;;  %v2344_v54 = vpop.permute.xlu0 %2343 }
 0x45c   :  { %v2355_v21 = vadd.f32 %v2344_v54, %v2267_v26  ;;  %v2437_v55 = vadd.f32 %v2426_v13, %v2329_v2 }
 0x45e   :  { %v2463_v48 = vadd.f32 %v2452_v19, %v2355_v21 }
 0x462   :  { %v2534_v3 = vpop.permute.xlu2 %2533 }
 0x463   :  { %v2432_v59 = vpop.permute.xlu1 %2431  ;;  %v2350_v58 = vpop.permute.xlu0 %2349 }
 0x464   :  { %v2358_v14 = vadd.f32 %v2350_v58, %v2270_v18  ;;  %v2440_v46 = vadd.f32 %v2432_v59, %v2332_v25 }
 0x466   :  { %v2466_v43 = vadd.f32 %v2458_v51, %v2358_v14 }
 0x46b   :  { %v2456_v30 = vpop.permute.xlu1 %2455  ;;  %v2430_v1 = vpop.permute.xlu0 %2429 }
 0x46c   :  { %v2439_v41 = vadd.f32 %v2430_v1, %v2331_v32  ;;  %v2465_v56 = vadd.f32 %v2456_v30, %v4795_v28 }
 0x46e   :  { %v2543_v44 = vadd.f32 %v2534_v3, %v2439_v41 }
 0x470   :  { %2553 = vrot.lane.b32.xlu0 %v2543_v44, %s3016_s29 }
 0x473   :  { %v2532_v22 = vpop.permute.xlu1 %2531  ;;  %v2454_v11 = vpop.permute.xlu0 %2453 }
 0x474   :  { %v2542_v29 = vadd.f32 %v2532_v22, %v2438_v16  ;;  %v2464_v5 = vadd.f32 %v2454_v11, %v2356_v23 }
 0x476   :  { %2551 = vrot.lane.b32.xlu2 %v2542_v29, %s3016_s29 }
 0x47b   :  { %v2530_v62 = vpop.permute.xlu0 %2529 }
 0x47c   :  { %v2541_v60 = vadd.f32 %v2530_v62, %v2437_v55 }
 0x47e   :  { %2549 = vrot.lane.b32.xlu1 %v2541_v60, %s3016_s29 }
 0x483   :  { %v2536_v50 = vpop.permute.xlu0 %2535 }
 0x484   :  { %v2544_v36 = vadd.f32 %v2536_v50, %v2440_v46 }
 0x486   :  { %2555 = vrot.lane.b32.xlu1 %v2544_v36, %s3016_s29 }
 0x492   :  { %v2572_v6 = vpop.permute.xlu2 %2571 }
 0x493   :  { %v2582_v37 = vadd.f32 %v2572_v6, %v2464_v5 }
 0x495   :  { %2591 = vrot.lane.b32.xlu0 %v2582_v37, %s3019_s13 }
 0x49a   :  { %v2400_v38 = vpop.permute.xlu2 %2399 }
 0x49b   :  { %v2411_v20 = vadd.f32 %v2400_v38, %v4789_v45 }
 0x4a2   :  { %v2406_v31 = vpop.permute.xlu2 %2405 }
 0x4a6   :  { %v2574_v8 = vpop.permute.xlu0 %2573 }
 0x4a7   :  { %v2583_v26 = vadd.f32 %v2574_v8, %v2465_v56 }
 0x4a9   :  { %2593 = vrot.lane.b32.xlu1 %v2583_v26, %s3019_s13 }
 0x4aa   :  { %v2508_v10 = vpop.permute.xlu2 %2507 }
 0x4ae   :  { %v2402_v0 = vpop.permute.xlu0 %2401 }
 0x4af   :  { %v2412_v18 = vadd.f32 %v2402_v0, %v4770_v7  ;;  %v2414_v7 = vadd.f32 %v2406_v31, %v4800_v35 }
 0x4b0   :  { %v2570_v24 = vpop.permute.xlu1 %2569 }
 0x4b1   :  { %v2581_v17 = vadd.f32 %v2570_v24, %v2463_v48 }
 0x4b3   :  { %2589 = vrot.lane.b32.xlu2 %v2581_v17, %s3019_s13 }
 0x4b6   :  { %v2504_v33 = vpop.permute.xlu0 %2503 }
 0x4b7   :  { %v2515_v63 = vadd.f32 %v2504_v33, %v2411_v20 }
 0x4b8   :  { %v2576_v4 = vpop.permute.xlu1 %2575 }
 0x4b9   :  { %v2584_v52 = vadd.f32 %v2576_v4, %v2466_v43 }
 0x4bb   :  { %2595 = vrot.lane.b32.xlu2 %v2584_v52, %s3019_s13  ;;  %s2696_s13 = sshll.u32 %s3023_s2, 4  ;;  %s2697_s13 = int_to_ptr.vmem [resolvable:$true] %s2696_s13 }
 0x4be   :  { %v2510_v49 = vpop.permute.xlu0 %2509 }
 0x4bf   :  { %v2518_v58 = vadd.f32 %v2510_v49, %v2414_v7 }
 0x4c0   :  { %v2404_v40 = vpop.permute.xlu1 %2403 }
 0x4c1   :  { %v2413_v30 = vadd.f32 %v2404_v40, %v4807_v42 }
 0x4c3   :  { %v2517_v57 = vadd.f32 %v2508_v10, %v2413_v30 }
 0x4c8   :  { %v2506_v28 = vpop.permute.xlu1 %2505 }
 0x4c9   :  { %v2516_v9 = vadd.f32 %v2506_v28, %v2412_v18 }
 0x4d0   :  { %v2552_v61 = vpop.permute.xlu2 %2551 }
 0x4d1   :  { %v2562_v34 = vadd.f32 %v2552_v61, %v2516_v9 }
 0x4e2   :  { %v2554_v39 = vpop.permute.xlu0 %2553 }
 0x4e3   :  { %v2563_v22 = vadd.f32 %v2554_v39, %v2517_v57 }
 0x4f0   :  { %v2550_v47 = vpop.permute.xlu1 %2549 }
 0x4f1   :  { %v2561_v19 = vadd.f32 %v2550_v47, %v2515_v63 }
 0x4f8   :  { %v2556_v59 = vpop.permute.xlu1 %2555 }
 0x4f9   :  { %v2564_v1 = vadd.f32 %v2556_v59, %v2518_v58 }
 0x507   :  { %v2592_v27 = vpop.permute.xlu0 %2591 }
 0x508   :  { %v2602_v53 = vadd.f32 %v2592_v27, %v2562_v34 }
 0x50a   :  { %v2608_v12 = vadd.f32 %v2606_v15, %v2602_v53 }
 0x50c   :  { %v2810_v13 = vmul.f32 -1.442695, %v2608_v12 }
 0x50d   :  { %v2590_v54 = vpop.permute.xlu2 %2589 }
 0x50e   :  { %2924 = vpow2.f32 %v2810_v13  ;;  %v2601_v21 = vadd.f32 %v2590_v54, %v2561_v19 }
 0x510   :  { %v2607_v51 = vadd.f32 %v2606_v15, %v2601_v21 }
 0x512   :  { %v2809_v14 = vmul.f32 -1.442695, %v2607_v51 }
 0x514   :  { %v2925_v32 = vpop.eup %2924  ;;  %2926 = vpow2.f32 %v2809_v14 }
 0x515   :  { %v2624_v45 = vadd.f32 1.0, %v2925_v32  ;;  %v2596_v41 = vpop.permute.xlu2 %2595 }
 0x516   :  { %v2604_v3 = vadd.f32 %v2596_v41, %v2564_v1 }
 0x517   :  { %2928 = vrcp.f32 %v2624_v45  ;;  %v2653_v46 = vand.u32 2147483648, %v2624_v45  ;;  %v2651_v23 = vand.u32 2147483647, %v2624_v45  ;;  %vm2647_vm0 = vweird.f32 %v2624_v45 }
 0x518   :  { %v2610_v44 = vadd.f32 %v2606_v15, %v2604_v3 }
 0x519   :  { %v2654_v43 = vor.u32 1.1754944e-38, %v2653_v46  ;;  %vm2652_vm3 = vcmp.eq.f32.partialorder %v2651_v23, 8.507059e+37 }
 0x51a   :  { %v2927_v16 = vpop.eup %2926  ;;  %v2812_v11 = vmul.f32 -1.442695, %v2610_v44 }
 0x51b   :  { %v2623_v29 = vadd.f32 1.0, %v2927_v16  ;;  %v2594_v35 = vpop.permute.xlu1 %2593 }
 0x51c   :  { %2930 = vpow2.f32 %v2812_v11  ;;  %v2603_v2 = vadd.f32 %v2594_v35, %v2563_v22 }
 0x51d   :  { %v2929_v55 = vpop.eup %2928  ;;  %2932 = vrcp.f32 %v2623_v29  ;;  %v2638_v26 = vand.u32 2147483648, %v2623_v29  ;;  %v2636_v52 = vand.u32 2147483647, %v2623_v29  ;;  %vm2632_vm5 = vweird.f32 %v2623_v29 }
 0x51e   :  { %v2643_v62 = vmul.f32 %v2929_v55, %v2624_v45  ;;  %v2609_v60 = vadd.f32 %v2606_v15, %v2603_v2  ;;  %vm2648_vm15 = vweird.f32 %v2929_v55 }
 0x51f   :  { %vm2649_vm1 = vmor %vm2647_vm0, %vm2648_vm15  ;;  %v2639_v31 = vor.u32 1.1754944e-38, %v2638_v26  ;;  %vm2637_vm7 = vcmp.eq.f32.partialorder %v2636_v52, 8.507059e+37 }
 0x520   :  { %v2644_v42 = vsub.f32 1.0, %v2643_v62  ;;  %v2811_v25 = vmul.f32 -1.442695, %v2609_v60 }
 0x522   :  { %v2931_v50 = vpop.eup %2930  ;;  %2934 = vpow2.f32 %v2811_v25  ;;  %v2645_v36 = vmul.f32 %v2929_v55, %v2644_v42 }
 0x523   :  { %v2933_v48 = vpop.eup %2932  ;;  %v2626_v5 = vadd.f32 1.0, %v2931_v50 }
 0x524   :  { %v2628_v6 = vmul.f32 %v2933_v48, %v2623_v29  ;;  %v2646_v37 = vadd.f32 %v2929_v55, %v2645_v36  ;;  %vm2633_vm4 = vweird.f32 %v2933_v48 }
 0x525   :  { %2936 = vrcp.f32 %v2626_v5  ;;  %vm2634_vm6 = vmor %vm2632_vm5, %vm2633_vm4  ;;  %v2683_v39 = vand.u32 2147483648, %v2626_v5  ;;  %v2681_v61 = vand.u32 2147483647, %v2626_v5  ;;  %vm2677_vm9 = vweird.f32 %v2626_v5 }
 0x526   :  { %v2629_v56 = vsub.f32 1.0, %v2628_v6  ;;  %v2650_v8 = vsel %vm2649_vm1, %v2929_v55, %v2646_v37 }
 0x527   :  { %v2655_v24 = vsel %vm2652_vm3, %v2654_v43, %v2650_v8  ;;  %v2684_v15 = vor.u32 1.1754944e-38, %v2683_v39  ;;  %vm2682_vm11 = vcmp.eq.f32.partialorder %v2681_v61, 8.507059e+37 }
 0x528   :  { %v2935_v17 = vpop.eup %2934  ;;  %v2630_v4 = vmul.f32 %v2933_v48, %v2629_v56  ;;  %2689 = vst.msk [vmem:[#allocation9 + $0x8] sm:$0xff] %vm2687_vm2, %v2655_v24 }
 0x529   :  { %v2625_v0 = vadd.f32 1.0, %v2935_v17 }
 0x52a   :  { %v2631_v38 = vadd.f32 %v2933_v48, %v2630_v4 }
 0x52b   :  { %v2937_v33 = vpop.eup %2936  ;;  %2938 = vrcp.f32 %v2625_v0  ;;  %v2668_v53 = vand.u32 2147483648, %v2625_v0  ;;  %v2666_v19 = vand.u32 2147483647, %v2625_v0  ;;  %vm2662_vm13 = vweird.f32 %v2625_v0 }
 0x52c   :  { %v2673_v40 = vmul.f32 %v2937_v33, %v2626_v5  ;;  %v2635_v49 = vsel %vm2634_vm6, %v2933_v48, %v2631_v38  ;;  %vm2678_vm8 = vweird.f32 %v2937_v33 }
 0x52d   :  { %v2640_v10 = vsel %vm2637_vm7, %v2639_v31, %v2635_v49  ;;  %vm2679_vm10 = vmor %vm2677_vm9, %vm2678_vm8  ;;  %v2669_v54 = vor.u32 1.1754944e-38, %v2668_v53  ;;  %vm2667_vm15 = vcmp.eq.f32.partialorder %v2666_v19, 8.507059e+37 }
 0x52e   :  { %v2674_v28 = vsub.f32 1.0, %v2673_v40  ;;  %2688 = vst.msk [vmem:[#allocation9] sm:$0xff] %vm2687_vm2, %v2640_v10 }
 0x530   :  { %v2675_v18 = vmul.f32 %v2937_v33, %v2674_v28 }
 0x531   :  { %v2939_v9 = vpop.eup %2938 }
 0x532   :  { %v2658_v34 = vmul.f32 %v2939_v9, %v2625_v0  ;;  %v2676_v47 = vadd.f32 %v2937_v33, %v2675_v18  ;;  %vm2663_vm12 = vweird.f32 %v2939_v9 }
 0x533   :  { %vm2664_vm14 = vmor %vm2662_vm13, %vm2663_vm12 }
 0x534   :  { %v2659_v27 = vsub.f32 1.0, %v2658_v34  ;;  %v2680_v20 = vsel %vm2679_vm10, %v2937_v33, %v2676_v47 }
 0x535   :  { %v2685_v63 = vsel %vm2682_vm11, %v2684_v15, %v2680_v20 }
 0x536   :  { %v2660_v12 = vmul.f32 %v2939_v9, %v2659_v27  ;;  %2691 = vst.msk [vmem:[#allocation9 + $0x18] sm:$0xff] %vm2687_vm2, %v2685_v63 }
 0x538   :  { %v2661_v13 = vadd.f32 %v2939_v9, %v2660_v12 }
 0x53a   :  { %v2665_v21 = vsel %vm2664_vm14, %v2939_v9, %v2661_v13 }
 0x53b   :  { %v2670_v7 = vsel %vm2667_vm15, %v2669_v54, %v2665_v21 }
 0x53c   :  { %2690 = vst.msk [vmem:[#allocation9 + $0x10] sm:$0xff] %vm2687_vm2, %v2670_v7 }
 0x53d   :  { %2704 = dma.vmem_to_hbm [thread:$0]  %s2697_s13, 512, %s2699_s26, [#allocation6], %s3010_s20, %s3010_s20, %s3011_s21  }
 0x53e   :  { %3007 = dma.done.wait [#allocation6], 512  }
 0x53f   :  { %3008 = vsyncadd [#allocation6], 4294966784 }
 0x540   :  { %2709 = vsyncpa [#allocation5], 1 }
 0x541   :  { %2710 = vsyncpa [#allocation6], 1 }
 0x542   :  { %2711 = vsyncpa [#allocation7], 1 }

</bundles_post_ra>
